<compile_context>
chip_gen: v7x
topology: tpu7x:2x2x1
jax: 0.10.0
libtpu: 0.0.40
codegen_flags: <defaults>
</compile_context>

<pallas_src>
import functools
import math

import jax
import jax.numpy as jnp
import numpy as np
from jax import lax
from jax.experimental import pallas as pl
from jax.experimental.pallas import tpu as pltpu

_VMEM_LIMIT_MAIN = 48 * 1024 * 1024   # <= v7x 64 MiB physical
_VMEM_LIMIT_SMALL = 32 * 1024 * 1024


def _round_up(x: int, m: int) -> int:
    return (x + m - 1) // m * m


def _pick_row_tile(n_rows: int, bytes_per_row: int, cap: int = 256,
                   budget: int = 8 * 1024 * 1024) -> int:
    t = max(8, min(cap, (budget // max(bytes_per_row, 1)) // 8 * 8))
    return min(t, _round_up(n_rows, 8))


# ---------------------------------------------------------------------------
# Kernel 1: InfoNCE prep — fused L2 norm with rsqrt(T) folded in, bf16 cast of
# the normalized rows, and the positive-pair logit (f32).
# ---------------------------------------------------------------------------
def _infonce_prep_kernel(z1_ref, z2_ref, zn1_ref, zn2_ref, pos_ref, *, inv_sqrt_t):
    z1 = z1_ref[...]
    z2 = z2_ref[...]
    inv1 = lax.rsqrt(jnp.maximum(jnp.sum(z1 * z1, axis=-1, keepdims=True), 1e-24)) * inv_sqrt_t
    inv2 = lax.rsqrt(jnp.maximum(jnp.sum(z2 * z2, axis=-1, keepdims=True), 1e-24)) * inv_sqrt_t
    zn1 = z1 * inv1                          # zn_i . zn_j == (zi.zj)/(|zi||zj| T)
    zn2 = z2 * inv2
    pos_ref[...] = jnp.sum(zn1 * zn2, axis=-1, keepdims=True)   # f32 positive logit
    zn1_ref[...] = zn1.astype(jnp.bfloat16)
    zn2_ref[...] = zn2.astype(jnp.bfloat16)


# ---------------------------------------------------------------------------
# Kernel 2: flash-style InfoNCE — bf16 MXU similarity tiles + online logsumexp.
# per-row output:  log(sum_{j != i, j valid} exp(s_ij)) - pos_logit_i
# Masking is gated to the tiles that intersect the diagonal / padded tail.
# ---------------------------------------------------------------------------
def _infonce_kernel(zr_ref, zc_ref, pos_ref, out_ref, m_sc, l_sc,
                    *, tm, tn, n_valid, padded):
    i = pl.program_id(0)
    k = pl.program_id(1)

    @pl.when(k == 0)
    def _init():
        m_sc[...] = jnp.full_like(m_sc, -1e30)
        l_sc[...] = jnp.zeros_like(l_sc)

    # bf16 x bf16 -> f32 accumulation, contracting D on both sides (no transpose)
    s = lax.dot_general(zr_ref[...], zc_ref[...], (((1,), (1,)), ((), ())),
                        preferred_element_type=jnp.float32)

    row0 = i * tm
    col0 = k * tn
    needs_diag = (row0 < col0 + tn) & (col0 < row0 + tm)
    if padded:
        needs_mask = needs_diag | (col0 + tn > n_valid)
    else:
        needs_mask = needs_diag

    def _update(sv):
        m_prev = m_sc[...]
        m_new = jnp.maximum(m_prev, jnp.max(sv, axis=-1, keepdims=True))
        alpha = jnp.exp(m_prev - m_new)
        l_sc[...] = alpha * l_sc[...] + jnp.sum(jnp.exp(sv - m_new),
                                                axis=-1, keepdims=True)
        m_sc[...] = m_new

    @pl.when(needs_mask)
    def _masked():
        row = lax.broadcasted_iota(jnp.int32, (tm, tn), 0) + row0
        col = lax.broadcasted_iota(jnp.int32, (tm, tn), 1) + col0
        _update(jnp.where((row == col) | (col >= n_valid), jnp.float32(-1e30), s))

    @pl.when(jnp.logical_not(needs_mask))
    def _unmasked():
        _update(s)

    @pl.when(k == pl.num_programs(1) - 1)
    def _finalize():
        out_ref[...] = (m_sc[...] + jnp.log(l_sc[...])) - pos_ref[...]


def _choose_infonce_tiles(two_m: int, d: int):
    # Column tile: 128-aligned (clean on v5e's 4x128 MXU) for small problems.
    tn = 256 if two_m >= 1024 else 128
    # Row tile drives the column stream's arithmetic intensity (~tm FLOP/byte bf16).
    if two_m >= 2048:
        tm = 1024
    elif two_m >= 1024:
        tm = 512
    elif two_m >= 512:
        tm = 256
    else:
        tm = 128
    # VMEM cap: double-buffered bf16 row+col tiles must fit under ~36 MiB.
    budget = 36 * 1024 * 1024
    while tm > tn and 2 * 2 * d * (tm + tn) > budget:
        tm //= 2
    pp = _round_up(two_m, max(tm, tn))
    # Keep >= 2 row-grid steps so both v7x TensorCores get work.
    while tm > tn and pp // tm < 2:
        tm //= 2
        pp = _round_up(two_m, max(tm, tn))
    return tm, tn, pp


def infonce_loss(z1, z2, temperature: float):
    m, d = z1.shape
    two_m = 2 * m
    inv_sqrt_t = float(1.0 / math.sqrt(temperature))

    # ---- prep pass: normalize + bf16 cast + positive logits ----
    # per-row VMEM: 2 f32 inputs + 2 bf16 outputs, double-buffered ~ 24*d bytes
    ptm = _pick_row_tile(m, 24 * d, cap=512, budget=12 * 1024 * 1024)
    mp = _round_up(m, ptm)
    z1p = jnp.pad(z1, ((0, mp - m), (0, 0)))
    z2p = jnp.pad(z2, ((0, mp - m), (0, 0)))

    zn1, zn2, pos = pl.pallas_call(
        functools.partial(_infonce_prep_kernel, inv_sqrt_t=inv_sqrt_t),
        out_shape=(jax.ShapeDtypeStruct((mp, d), jnp.bfloat16),
                   jax.ShapeDtypeStruct((mp, d), jnp.bfloat16),
                   jax.ShapeDtypeStruct((mp, 1), jnp.float32)),
        grid_spec=pltpu.PrefetchScalarGridSpec(
            num_scalar_prefetch=0,
            grid=(mp // ptm,),
            in_specs=[pl.BlockSpec((ptm, d), lambda i: (i, 0)),
                      pl.BlockSpec((ptm, d), lambda i: (i, 0))],
            out_specs=(pl.BlockSpec((ptm, d), lambda i: (i, 0)),
                       pl.BlockSpec((ptm, d), lambda i: (i, 0)),
                       pl.BlockSpec((ptm, 1), lambda i: (i, 0))),
        ),
        compiler_params=pltpu.CompilerParams(
            dimension_semantics=("parallel",),
            vmem_limit_bytes=_VMEM_LIMIT_SMALL),
    )(z1p, z2p)

    # ---- fused similarity + masked online logsumexp ----
    tm, tn, pp = _choose_infonce_tiles(two_m, d)

    z = jnp.concatenate([zn1[:m], zn2[:m]], axis=0)           # (2m, d) bf16
    z = jnp.pad(z, ((0, pp - two_m), (0, 0)))
    pos_full = jnp.concatenate([pos[:m], pos[:m]], axis=0)    # (2m, 1) f32
    pos_full = jnp.pad(pos_full, ((0, pp - two_m), (0, 0)))

    per_row = pl.pallas_call(
        functools.partial(_infonce_kernel, tm=tm, tn=tn, n_valid=two_m,
                          padded=(pp != two_m)),
        out_shape=jax.ShapeDtypeStruct((pp, 1), jnp.float32),
        grid_spec=pltpu.PrefetchScalarGridSpec(
            num_scalar_prefetch=0,
            grid=(pp // tm, pp // tn),
            in_specs=[
                pl.BlockSpec((tm, d), lambda i, k: (i, 0)),   # resident row block (bf16)
                pl.BlockSpec((tn, d), lambda i, k: (k, 0)),   # streamed column block (bf16)
                pl.BlockSpec((tm, 1), lambda i, k: (i, 0)),   # positive-pair logit
            ],
            out_specs=pl.BlockSpec((tm, 1), lambda i, k: (i, 0)),
            scratch_shapes=[pltpu.VMEM((tm, 1), jnp.float32),   # running max
                            pltpu.VMEM((tm, 1), jnp.float32)],  # running sum
        ),
        compiler_params=pltpu.CompilerParams(
            dimension_semantics=("parallel", "arbitrary"),
            vmem_limit_bytes=_VMEM_LIMIT_MAIN),
    )(z, z, pos_full)

    return jnp.mean(per_row[:two_m, 0])


# ---------------------------------------------------------------------------
# Kernel 3: per-row cross entropy (log-softmax + iota==label select, no gather)
# ---------------------------------------------------------------------------
def _ce_kernel(logits_ref, labels_ref, out_ref):
    x = logits_ref[...]                       # (tb, C) f32
    lbl = labels_ref[...]                     # (tb, 1) int32
    m = jnp.max(x, axis=-1, keepdims=True)
    lse = m + jnp.log(jnp.sum(jnp.exp(x - m), axis=-1, keepdims=True))
    col = lax.broadcasted_iota(jnp.int32, x.shape, 1)
    picked = jnp.sum(jnp.where(col == lbl, x, 0.0), axis=-1, keepdims=True)
    out_ref[...] = lse - picked


def cross_entropy_mean(logits, labels):
    b, c = logits.shape
    tb = _pick_row_tile(b, 2 * (4 * c + 4))
    bp = _round_up(b, tb)
    lp = jnp.pad(logits, ((0, bp - b), (0, 0)))
    yp = jnp.pad(labels.astype(jnp.int32), ((0, bp - b),)).reshape(bp, 1)
    per_row = pl.pallas_call(
        _ce_kernel,
        out_shape=jax.ShapeDtypeStruct((bp, 1), jnp.float32),
        grid_spec=pltpu.PrefetchScalarGridSpec(
            num_scalar_prefetch=0,
            grid=(bp // tb,),
            in_specs=[pl.BlockSpec((tb, c), lambda i: (i, 0)),
                      pl.BlockSpec((tb, 1), lambda i: (i, 0))],
            out_specs=pl.BlockSpec((tb, 1), lambda i: (i, 0)),
        ),
        compiler_params=pltpu.CompilerParams(
            dimension_semantics=("parallel",),
            vmem_limit_bytes=_VMEM_LIMIT_SMALL),
    )(lp, yp)
    return jnp.mean(per_row[:b, 0])


# ---------------------------------------------------------------------------
# Kernel 4: softmax-entropy + class-probability sums (for the MI term) in one
# pass over logits.  The (1, C) prob-sum block stays resident across row tiles.
# ---------------------------------------------------------------------------
def _entropy_kernel(logits_ref, ent_ref, psum_ref, *, tb, n_valid):
    i = pl.program_id(0)

    @pl.when(i == 0)
    def _init():
        psum_ref[...] = jnp.zeros_like(psum_ref)

    x = logits_ref[...]                       # (tb, C) f32
    m = jnp.max(x, axis=-1, keepdims=True)
    e = jnp.exp(x - m)
    s = jnp.sum(e, axis=-1, keepdims=True)
    p = e * pl.reciprocal(s, approx=True)     # EUP reciprocal (free slot)
    logp = (x - m) - jnp.log(s)
    ent_ref[...] = -jnp.sum(p * logp, axis=-1, keepdims=True)

    row = lax.broadcasted_iota(jnp.int32, (tb, 1), 0) + i * tb
    p_valid = jnp.where(row < n_valid, p, 0.0)    # padded rows must not pollute y_dis
    psum_ref[...] += jnp.sum(p_valid, axis=0, keepdims=True)


def softmax_entropy_stats(logits):
    r, c = logits.shape
    tb = _pick_row_tile(r, 2 * 4 * c)
    rp = _round_up(r, tb)
    lp = jnp.pad(logits, ((0, rp - r), (0, 0)))
    ent, psum = pl.pallas_call(
        functools.partial(_entropy_kernel, tb=tb, n_valid=r),
        out_shape=(jax.ShapeDtypeStruct((rp, 1), jnp.float32),
                   jax.ShapeDtypeStruct((1, c), jnp.float32)),
        grid_spec=pltpu.PrefetchScalarGridSpec(
            num_scalar_prefetch=0,
            grid=(rp // tb,),
            in_specs=[pl.BlockSpec((tb, c), lambda i: (i, 0))],
            out_specs=(pl.BlockSpec((tb, 1), lambda i: (i, 0)),
                       pl.BlockSpec((1, c), lambda i: (0, 0))),
        ),
        compiler_params=pltpu.CompilerParams(
            dimension_semantics=("arbitrary",),
            vmem_limit_bytes=_VMEM_LIMIT_SMALL),
    )(lp)
    condi_entropy = jnp.mean(ent[:r, 0])
    y_dis = psum[0] / jnp.float32(r)
    y_entropy = -jnp.sum(y_dis * jnp.log(y_dis))
    return condi_entropy, y_entropy


# ---------------------------------------------------------------------------
# Top-level forward (mirrors contrastive_da_loss_with_MI_maximization.forward)
# ---------------------------------------------------------------------------
@functools.partial(jax.jit, static_argnames=("temperature", "mi_threshold", "weight"))
def contrastive_da_loss_with_mi_forward(z1_src, z2_src, z1_tgt, z2_tgt,
                                        logits, labels, *,
                                        temperature, mi_threshold, weight=1.0):
    if labels is not None:
        cls_loss = cross_entropy_mean(logits[0], labels)
    else:
        cls_loss = jnp.float32(0.0)

    if z2_src is not None:
        z1 = jnp.concatenate([z1_src, z1_tgt], axis=0)
        z2 = jnp.concatenate([z2_src, z2_tgt], axis=0)
        contrast_loss = infonce_loss(z1, z2, temperature)
    else:
        contrast_loss = jnp.float32(0.0)

    if len(logits) > 1:
        condi_entropy, y_entropy = softmax_entropy_stats(
            jnp.concatenate(logits[1:], axis=0))
        # TODO(synk): PyTorch branches on y_entropy.item(); here it is a
        # trace-safe jnp.where with identical values.
        entropy_loss = jnp.where(y_entropy < mi_threshold,
                                 -y_entropy + condi_entropy, condi_entropy)
    else:
        entropy_loss = jnp.float32(0.0)
        y_entropy = jnp.float32(0.0)

    total = cls_loss + weight * contrast_loss + entropy_loss
    return total, contrast_loss, cls_loss, entropy_loss, y_entropy


# ---------------------------------------------------------------------------
# Pure-JAX reference (mirrors the PyTorch module) for a sanity check
# ---------------------------------------------------------------------------
def _reference_forward(z1_src, z2_src, z1_tgt, z2_tgt, logits, labels,
                       temperature, mi_threshold, weight):
    x0 = logits[0]
    m0 = jnp.max(x0, axis=-1, keepdims=True)
    lse = (m0 + jnp.log(jnp.sum(jnp.exp(x0 - m0), axis=-1, keepdims=True)))[:, 0]
    picked = jnp.take_along_axis(x0, labels[:, None].astype(jnp.int32), axis=-1)[:, 0]
    cls_loss = jnp.mean(lse - picked)

    z1 = jnp.concatenate([z1_src, z1_tgt], axis=0)
    z2 = jnp.concatenate([z2_src, z2_tgt], axis=0)
    z1n = z1 / jnp.linalg.norm(z1, axis=-1, keepdims=True)
    z2n = z2 / jnp.linalg.norm(z2, axis=-1, keepdims=True)
    z = jnp.concatenate([z1n, z2n], axis=0)
    n = z.shape[0]
    sim = jnp.exp(z @ z.T / temperature)
    neg = jnp.sum(sim * (1.0 - jnp.eye(n, dtype=sim.dtype)), axis=-1)
    pos = jnp.exp(jnp.sum(z1n * z2n, axis=-1) / temperature)
    pos = jnp.concatenate([pos, pos], axis=0)
    contrast_loss = -jnp.mean(jnp.log(pos / neg))

    xr = jnp.concatenate(logits[1:], axis=0)
    p = jax.nn.softmax(xr, axis=-1)
    condi = -jnp.mean(jnp.sum(p * jnp.log(p), axis=-1))
    y_dis = jnp.mean(p, axis=0)
    y_entropy = -jnp.sum(y_dis * jnp.log(y_dis))
    entropy_loss = jnp.where(y_entropy < mi_threshold, -y_entropy + condi, condi)

    total = cls_loss + weight * contrast_loss + entropy_loss
    return total, contrast_loss, cls_loss, entropy_loss, y_entropy


if __name__ == "__main__":
    key = jax.random.PRNGKey(0)
    k1, k2, k3, k4, k5, k6, k7, k8 = jax.random.split(key, 8)

    # n_tgt chosen so 2M=248 is NOT tile-aligned -> exercises the padded-tail
    # mask gating as well as the diagonal gating on a 2x2 tile grid.
    n_src, n_tgt, d = 64, 60, 32
    b, c = 8, 16
    temperature = 0.5
    mi_threshold = 1.5
    weight = 1.0

    z1_src = jax.random.normal(k1, (n_src, d), jnp.float32)
    z2_src = jax.random.normal(k2, (n_src, d), jnp.float32)
    z1_tgt = jax.random.normal(k3, (n_tgt, d), jnp.float32)
    z2_tgt = jax.random.normal(k4, (n_tgt, d), jnp.float32)
    logits = (jax.random.normal(k5, (b, c), jnp.float32),
              jax.random.normal(k6, (b, c), jnp.float32),
              jax.random.normal(k7, (b, c), jnp.float32))
    labels = jax.random.randint(k8, (b,), 0, c, jnp.int32)

    out = contrastive_da_loss_with_mi_forward(
        z1_src, z2_src, z1_tgt, z2_tgt, logits, labels,
        temperature=temperature, mi_threshold=mi_threshold, weight=weight)
    out = jax.block_until_ready(out)

    ref = _reference_forward(z1_src, z2_src, z1_tgt, z2_tgt, logits, labels,
                             temperature, mi_threshold, weight)
    ref = jax.block_until_ready(ref)

    for got, want in zip(out, ref):
        np.testing.assert_allclose(np.asarray(got), np.asarray(want),
                                   rtol=2e-2, atol=2e-2)

    print("KERNEL_OK")
</pallas_src>

<mosaic_0001>
module attributes {stable_mosaic.version = 11 : i64} {
  func.func @_ce_kernel(%arg0: i32, %arg1: memref<8x16xf32, #tpu.memory_space<vmem>>, %arg2: memref<8x1xi32, #tpu.memory_space<vmem>>, %arg3: memref<8x1xf32, #tpu.memory_space<vmem>>) attributes {dimension_semantics = [#tpu.dimension_semantics<parallel>], iteration_bounds = array<i64: 1>, scalar_prefetch = 0 : i64, scratch_operands = 0 : i64, tpu.core_type = #tpu.core_type<tc>, window_params = [{transform_indices = @transform_0, window_bounds = array<i64: 8, 16>}, {transform_indices = @transform_1, window_bounds = array<i64: 8, 1>}, {transform_indices = @transform_2, window_bounds = array<i64: 8, 1>}]} {
    %c0 = arith.constant 0 : index
    %c0_0 = arith.constant 0 : index
    %0 = vector.load %arg1[%c0, %c0_0] : memref<8x16xf32, #tpu.memory_space<vmem>>, vector<8x16xf32>
    %c0_1 = arith.constant 0 : index
    %c0_2 = arith.constant 0 : index
    %1 = vector.load %arg2[%c0_1, %c0_2] : memref<8x1xi32, #tpu.memory_space<vmem>>, vector<8x1xi32>
    %cst = arith.constant dense<0xFF800000> : vector<8xf32>
    %2 = vector.multi_reduction <maximumf>, %0, %cst [1] : vector<8x16xf32> to vector<8xf32>
    %3 = vector.shape_cast %2 : vector<8xf32> to vector<8x1xf32>
    %4 = vector.broadcast %3 : vector<8x1xf32> to vector<8x16xf32>
    %5 = arith.subf %0, %4 : vector<8x16xf32>
    %6 = math.exp %5 : vector<8x16xf32>
    %cst_3 = arith.constant dense<0.000000e+00> : vector<8xf32>
    %7 = vector.multi_reduction <add>, %6, %cst_3 [1] : vector<8x16xf32> to vector<8xf32>
    %8 = vector.shape_cast %7 : vector<8xf32> to vector<8x1xf32>
    %9 = math.log %8 : vector<8x1xf32>
    %10 = arith.addf %3, %9 : vector<8x1xf32>
    %11 = tpu.iota {dimensions = array<i32: 1>} : vector<8x16xi32>
    %12 = vector.broadcast %1 : vector<8x1xi32> to vector<8x16xi32>
    %13 = arith.cmpi eq, %11, %12 : vector<8x16xi32>
    %cst_4 = arith.constant 0.000000e+00 : f32
    %14 = vector.broadcast %cst_4 : f32 to vector<8x16xf32>
    %15 = arith.select %13, %0, %14 : vector<8x16xi1>, vector<8x16xf32>
    %cst_5 = arith.constant dense<0.000000e+00> : vector<8xf32>
    %16 = vector.multi_reduction <add>, %15, %cst_5 [1] : vector<8x16xf32> to vector<8xf32>
    %17 = vector.shape_cast %16 : vector<8xf32> to vector<8x1xf32>
    %18 = arith.subf %10, %17 : vector<8x1xf32>
    %c0_6 = arith.constant 0 : index
    %c0_7 = arith.constant 0 : index
    %19 = vector.load %arg3[%c0_6, %c0_7] : memref<8x1xf32, #tpu.memory_space<vmem>>, vector<8x1xf32>
    tpu.vector_store %arg3[%c0_6, %c0_7], %18 {strides = array<i32>} : memref<8x1xf32, #tpu.memory_space<vmem>>, vector<8x1xf32>,
    return
  }
  func.func @transform_0(%arg0: i32) -> (i32, i32) {
    %c0_i32 = arith.constant 0 : i32
    %c0_i32_0 = arith.constant 0 : i32
    return %arg0, %c0_i32 : i32, i32
  }
  func.func @transform_1(%arg0: i32) -> (i32, i32) {
    %c0_i32 = arith.constant 0 : i32
    %c0_i32_0 = arith.constant 0 : i32
    return %arg0, %c0_i32 : i32, i32
  }
  func.func @transform_2(%arg0: i32) -> (i32, i32) {
    %c0_i32 = arith.constant 0 : i32
    %c0_i32_0 = arith.constant 0 : i32
    return %arg0, %c0_i32 : i32, i32
  }
}

module attributes {stable_mosaic.version = 11 : i64} {
  func.func @_infonce_prep_kernel(%arg0: i32, %arg1: memref<128x32xf32, #tpu.memory_space<vmem>>, %arg2: memref<128x32xf32, #tpu.memory_space<vmem>>, %arg3: memref<128x32xbf16, #tpu.memory_space<vmem>>, %arg4: memref<128x32xbf16, #tpu.memory_space<vmem>>, %arg5: memref<128x1xf32, #tpu.memory_space<vmem>>) attributes {dimension_semantics = [#tpu.dimension_semantics<parallel>], iteration_bounds = array<i64: 1>, scalar_prefetch = 0 : i64, scratch_operands = 0 : i64, tpu.core_type = #tpu.core_type<tc>, window_params = [{transform_indices = @transform_0, window_bounds = array<i64: 128, 32>}, {transform_indices = @transform_1, window_bounds = array<i64: 128, 32>}, {transform_indices = @transform_2, window_bounds = array<i64: 128, 32>}, {transform_indices = @transform_3, window_bounds = array<i64: 128, 32>}, {transform_indices = @transform_4, window_bounds = array<i64: 128, 1>}]} {
    %c0 = arith.constant 0 : index
    %c0_0 = arith.constant 0 : index
    %0 = vector.load %arg1[%c0, %c0_0] : memref<128x32xf32, #tpu.memory_space<vmem>>, vector<128x32xf32>
    %c0_1 = arith.constant 0 : index
    %c0_2 = arith.constant 0 : index
    %1 = vector.load %arg2[%c0_1, %c0_2] : memref<128x32xf32, #tpu.memory_space<vmem>>, vector<128x32xf32>
    %2 = arith.mulf %0, %0 : vector<128x32xf32>
    %cst = arith.constant dense<0.000000e+00> : vector<128xf32>
    %3 = vector.multi_reduction <add>, %2, %cst [1] : vector<128x32xf32> to vector<128xf32>
    %4 = vector.shape_cast %3 : vector<128xf32> to vector<128x1xf32>
    %cst_3 = arith.constant 1.000000e-24 : f32
    %5 = vector.broadcast %cst_3 : f32 to vector<128x1xf32>
    %6 = arith.maximumf %4, %5 : vector<128x1xf32>
    %7 = math.rsqrt %6 : vector<128x1xf32>
    %cst_4 = arith.constant 1.41421354 : f32
    %8 = vector.broadcast %cst_4 : f32 to vector<128x1xf32>
    %9 = arith.mulf %7, %8 : vector<128x1xf32>
    %10 = arith.mulf %1, %1 : vector<128x32xf32>
    %cst_5 = arith.constant dense<0.000000e+00> : vector<128xf32>
    %11 = vector.multi_reduction <add>, %10, %cst_5 [1] : vector<128x32xf32> to vector<128xf32>
    %12 = vector.shape_cast %11 : vector<128xf32> to vector<128x1xf32>
    %cst_6 = arith.constant 1.000000e-24 : f32
    %13 = vector.broadcast %cst_6 : f32 to vector<128x1xf32>
    %14 = arith.maximumf %12, %13 : vector<128x1xf32>
    %15 = math.rsqrt %14 : vector<128x1xf32>
    %cst_7 = arith.constant 1.41421354 : f32
    %16 = vector.broadcast %cst_7 : f32 to vector<128x1xf32>
    %17 = arith.mulf %15, %16 : vector<128x1xf32>
    %18 = vector.broadcast %9 : vector<128x1xf32> to vector<128x32xf32>
    %19 = arith.mulf %0, %18 : vector<128x32xf32>
    %20 = vector.broadcast %17 : vector<128x1xf32> to vector<128x32xf32>
    %21 = arith.mulf %1, %20 : vector<128x32xf32>
    %22 = arith.mulf %19, %21 : vector<128x32xf32>
    %cst_8 = arith.constant dense<0.000000e+00> : vector<128xf32>
    %23 = vector.multi_reduction <add>, %22, %cst_8 [1] : vector<128x32xf32> to vector<128xf32>
    %24 = vector.shape_cast %23 : vector<128xf32> to vector<128x1xf32>
    %c0_9 = arith.constant 0 : index
    %c0_10 = arith.constant 0 : index
    %25 = vector.load %arg5[%c0_9, %c0_10] : memref<128x1xf32, #tpu.memory_space<vmem>>, vector<128x1xf32>
    tpu.vector_store %arg5[%c0_9, %c0_10], %24 {strides = array<i32>} : memref<128x1xf32, #tpu.memory_space<vmem>>, vector<128x1xf32>,
    %26 = arith.truncf %19 : vector<128x32xf32> to vector<128x32xbf16>
    %c0_11 = arith.constant 0 : index
    %c0_12 = arith.constant 0 : index
    %27 = vector.load %arg3[%c0_11, %c0_12] : memref<128x32xbf16, #tpu.memory_space<vmem>>, vector<128x32xbf16>
    tpu.vector_store %arg3[%c0_11, %c0_12], %26 {strides = array<i32>} : memref<128x32xbf16, #tpu.memory_space<vmem>>, vector<128x32xbf16>,
    %28 = arith.truncf %21 : vector<128x32xf32> to vector<128x32xbf16>
    %c0_13 = arith.constant 0 : index
    %c0_14 = arith.constant 0 : index
    %29 = vector.load %arg4[%c0_13, %c0_14] : memref<128x32xbf16, #tpu.memory_space<vmem>>, vector<128x32xbf16>
    tpu.vector_store %arg4[%c0_13, %c0_14], %28 {strides = array<i32>} : memref<128x32xbf16, #tpu.memory_space<vmem>>, vector<128x32xbf16>,
    return
  }
  func.func @transform_0(%arg0: i32) -> (i32, i32) {
    %c0_i32 = arith.constant 0 : i32
    %c0_i32_0 = arith.constant 0 : i32
    return %arg0, %c0_i32 : i32, i32
  }
  func.func @transform_1(%arg0: i32) -> (i32, i32) {
    %c0_i32 = arith.constant 0 : i32
    %c0_i32_0 = arith.constant 0 : i32
    return %arg0, %c0_i32 : i32, i32
  }
  func.func @transform_2(%arg0: i32) -> (i32, i32) {
    %c0_i32 = arith.constant 0 : i32
    %c0_i32_0 = arith.constant 0 : i32
    return %arg0, %c0_i32 : i32, i32
  }
  func.func @transform_3(%arg0: i32) -> (i32, i32) {
    %c0_i32 = arith.constant 0 : i32
    %c0_i32_0 = arith.constant 0 : i32
    return %arg0, %c0_i32 : i32, i32
  }
  func.func @transform_4(%arg0: i32) -> (i32, i32) {
    %c0_i32 = arith.constant 0 : i32
    %c0_i32_0 = arith.constant 0 : i32
    return %arg0, %c0_i32 : i32, i32
  }
}

module attributes {stable_mosaic.version = 11 : i64} {
  func.func @_infonce_kernel(%arg0: i32, %arg1: i32, %arg2: memref<128x32xbf16, #tpu.memory_space<vmem>>, %arg3: memref<128x32xbf16, #tpu.memory_space<vmem>>, %arg4: memref<128x1xf32, #tpu.memory_space<vmem>>, %arg5: memref<128x1xf32, #tpu.memory_space<vmem>>, %arg6: memref<128x1xf32, #tpu.memory_space<vmem>>, %arg7: memref<128x1xf32, #tpu.memory_space<vmem>>) attributes {dimension_semantics = [#tpu.dimension_semantics<parallel>, #tpu.dimension_semantics<arbitrary>], iteration_bounds = array<i64: 2, 2>, scalar_prefetch = 0 : i64, scratch_operands = 2 : i64, tpu.core_type = #tpu.core_type<tc>, window_params = [{transform_indices = @transform_0, window_bounds = array<i64: 128, 32>}, {transform_indices = @transform_1, window_bounds = array<i64: 128, 32>}, {transform_indices = @transform_2, window_bounds = array<i64: 128, 1>}, {transform_indices = @transform_3, window_bounds = array<i64: 128, 1>}]} {
    %c0_i32 = arith.constant 0 : i32
    %0 = arith.cmpi eq, %arg1, %c0_i32 : i32
    %1 = arith.extui %0 : i1 to i32
    %c0_i32_0 = arith.constant 0 : i32
    %2 = arith.cmpi ne, %1, %c0_i32_0 : i32
    scf.if %2 {
      %cst_11 = arith.constant -1.000000e+30 : f32
      %24 = vector.broadcast %cst_11 : f32 to vector<128x1xf32>
      %c0_12 = arith.constant 0 : index
      %c0_13 = arith.constant 0 : index
      %25 = vector.load %arg6[%c0_12, %c0_13] : memref<128x1xf32, #tpu.memory_space<vmem>>, vector<128x1xf32>
      tpu.vector_store %arg6[%c0_12, %c0_13], %24 {strides = array<i32>} : memref<128x1xf32, #tpu.memory_space<vmem>>, vector<128x1xf32>,
      %cst_14 = arith.constant 0.000000e+00 : f32
      %26 = vector.broadcast %cst_14 : f32 to vector<128x1xf32>
      %c0_15 = arith.constant 0 : index
      %c0_16 = arith.constant 0 : index
      %27 = vector.load %arg7[%c0_15, %c0_16] : memref<128x1xf32, #tpu.memory_space<vmem>>, vector<128x1xf32>
      tpu.vector_store %arg7[%c0_15, %c0_16], %26 {strides = array<i32>} : memref<128x1xf32, #tpu.memory_space<vmem>>, vector<128x1xf32>,
    } else {
    }
    %c0 = arith.constant 0 : index
    %c0_1 = arith.constant 0 : index
    %3 = vector.load %arg2[%c0, %c0_1] : memref<128x32xbf16, #tpu.memory_space<vmem>>, vector<128x32xbf16>
    %c0_2 = arith.constant 0 : index
    %c0_3 = arith.constant 0 : index
    %4 = vector.load %arg3[%c0_2, %c0_3] : memref<128x32xbf16, #tpu.memory_space<vmem>>, vector<128x32xbf16>
    %cst = arith.constant dense<0.000000e+00> : vector<128x128xf32>
    %5 = tpu.matmul %3, %4, %cst {dimension_numbers = #tpu.dot_dimension_numbers<[1], [1], [0], [0], [0, 0, 1, 0], [], []>} : vector<128x32xbf16>, vector<128x32xbf16>, vector<128x128xf32> -> vector<128x128xf32>
    %c128_i32 = arith.constant 128 : i32
    %6 = arith.muli %arg0, %c128_i32 : i32
    %c128_i32_4 = arith.constant 128 : i32
    %7 = arith.muli %arg1, %c128_i32_4 : i32
    %c128_i32_5 = arith.constant 128 : i32
    %8 = arith.addi %7, %c128_i32_5 : i32
    %9 = arith.cmpi slt, %6, %8 : i32
    %c128_i32_6 = arith.constant 128 : i32
    %10 = arith.addi %6, %c128_i32_6 : i32
    %11 = arith.cmpi slt, %7, %10 : i32
    %12 = arith.andi %9, %11 : i1
    %c128_i32_7 = arith.constant 128 : i32
    %13 = arith.addi %7, %c128_i32_7 : i32
    %c248_i32 = arith.constant 248 : i32
    %14 = arith.cmpi sgt, %13, %c248_i32 : i32
    %15 = arith.ori %12, %14 : i1
    %16 = arith.extui %15 : i1 to i32
    %c0_i32_8 = arith.constant 0 : i32
    %17 = arith.cmpi ne, %16, %c0_i32_8 : i32
    scf.if %17 {
      %24 = tpu.iota {dimensions = array<i32: 0>} : vector<128x128xi32>
      %25 = vector.broadcast %6 : i32 to vector<128x128xi32>
      %26 = arith.addi %24, %25 : vector<128x128xi32>
      %27 = tpu.iota {dimensions = array<i32: 1>} : vector<128x128xi32>
      %28 = vector.broadcast %7 : i32 to vector<128x128xi32>
      %29 = arith.addi %27, %28 : vector<128x128xi32>
      %30 = arith.cmpi eq, %26, %29 : vector<128x128xi32>
      %c248_i32_11 = arith.constant 248 : i32
      %31 = vector.broadcast %c248_i32_11 : i32 to vector<128x128xi32>
      %32 = arith.cmpi sge, %29, %31 : vector<128x128xi32>
      %33 = arith.ori %30, %32 : vector<128x128xi1>
      %cst_12 = arith.constant -1.000000e+30 : f32
      %34 = vector.broadcast %cst_12 : f32 to vector<128x128xf32>
      %35 = arith.select %33, %34, %5 : vector<128x128xi1>, vector<128x128xf32>
      %c0_13 = arith.constant 0 : index
      %c0_14 = arith.constant 0 : index
      %36 = vector.load %arg6[%c0_13, %c0_14] : memref<128x1xf32, #tpu.memory_space<vmem>>, vector<128x1xf32>
      %cst_15 = arith.constant dense<0xFF800000> : vector<128xf32>
      %37 = vector.multi_reduction <maximumf>, %35, %cst_15 [1] : vector<128x128xf32> to vector<128xf32>
      %38 = vector.shape_cast %37 : vector<128xf32> to vector<128x1xf32>
      %39 = arith.maximumf %36, %38 : vector<128x1xf32>
      %40 = arith.subf %36, %39 : vector<128x1xf32>
      %41 = math.exp %40 : vector<128x1xf32>
      %c0_16 = arith.constant 0 : index
      %c0_17 = arith.constant 0 : index
      %42 = vector.load %arg7[%c0_16, %c0_17] : memref<128x1xf32, #tpu.memory_space<vmem>>, vector<128x1xf32>
      %43 = arith.mulf %41, %42 : vector<128x1xf32>
      %44 = vector.broadcast %39 : vector<128x1xf32> to vector<128x128xf32>
      %45 = arith.subf %35, %44 : vector<128x128xf32>
      %46 = math.exp %45 : vector<128x128xf32>
      %cst_18 = arith.constant dense<0.000000e+00> : vector<128xf32>
      %47 = vector.multi_reduction <add>, %46, %cst_18 [1] : vector<128x128xf32> to vector<128xf32>
      %48 = vector.shape_cast %47 : vector<128xf32> to vector<128x1xf32>
      %49 = arith.addf %43, %48 : vector<128x1xf32>
      %c0_19 = arith.constant 0 : index
      %c0_20 = arith.constant 0 : index
      %50 = vector.load %arg7[%c0_19, %c0_20] : memref<128x1xf32, #tpu.memory_space<vmem>>, vector<128x1xf32>
      tpu.vector_store %arg7[%c0_19, %c0_20], %49 {strides = array<i32>} : memref<128x1xf32, #tpu.memory_space<vmem>>, vector<128x1xf32>,
      %c0_21 = arith.constant 0 : index
      %c0_22 = arith.constant 0 : index
      %51 = vector.load %arg6[%c0_21, %c0_22] : memref<128x1xf32, #tpu.memory_space<vmem>>, vector<128x1xf32>
      tpu.vector_store %arg6[%c0_21, %c0_22], %39 {strides = array<i32>} : memref<128x1xf32, #tpu.memory_space<vmem>>, vector<128x1xf32>,
    } else {
    }
    %true = arith.constant true
    %18 = arith.xori %15, %true : i1
    %19 = arith.extui %18 : i1 to i32
    %c0_i32_9 = arith.constant 0 : i32
    %20 = arith.cmpi ne, %19, %c0_i32_9 : i32
    scf.if %20 {
      %c0_11 = arith.constant 0 : index
      %c0_12 = arith.constant 0 : index
      %24 = vector.load %arg6[%c0_11, %c0_12] : memref<128x1xf32, #tpu.memory_space<vmem>>, vector<128x1xf32>
      %cst_13 = arith.constant dense<0xFF800000> : vector<128xf32>
      %25 = vector.multi_reduction <maximumf>, %5, %cst_13 [1] : vector<128x128xf32> to vector<128xf32>
      %26 = vector.shape_cast %25 : vector<128xf32> to vector<128x1xf32>
      %27 = arith.maximumf %24, %26 : vector<128x1xf32>
      %28 = arith.subf %24, %27 : vector<128x1xf32>
      %29 = math.exp %28 : vector<128x1xf32>
      %c0_14 = arith.constant 0 : index
      %c0_15 = arith.constant 0 : index
      %30 = vector.load %arg7[%c0_14, %c0_15] : memref<128x1xf32, #tpu.memory_space<vmem>>, vector<128x1xf32>
      %31 = arith.mulf %29, %30 : vector<128x1xf32>
      %32 = vector.broadcast %27 : vector<128x1xf32> to vector<128x128xf32>
      %33 = arith.subf %5, %32 : vector<128x128xf32>
      %34 = math.exp %33 : vector<128x128xf32>
      %cst_16 = arith.constant dense<0.000000e+00> : vector<128xf32>
      %35 = vector.multi_reduction <add>, %34, %cst_16 [1] : vector<128x128xf32> to vector<128xf32>
      %36 = vector.shape_cast %35 : vector<128xf32> to vector<128x1xf32>
      %37 = arith.addf %31, %36 : vector<128x1xf32>
      %c0_17 = arith.constant 0 : index
      %c0_18 = arith.constant 0 : index
      %38 = vector.load %arg7[%c0_17, %c0_18] : memref<128x1xf32, #tpu.memory_space<vmem>>, vector<128x1xf32>
      tpu.vector_store %arg7[%c0_17, %c0_18], %37 {strides = array<i32>} : memref<128x1xf32, #tpu.memory_space<vmem>>, vector<128x1xf32>,
      %c0_19 = arith.constant 0 : index
      %c0_20 = arith.constant 0 : index
      %39 = vector.load %arg6[%c0_19, %c0_20] : memref<128x1xf32, #tpu.memory_space<vmem>>, vector<128x1xf32>
      tpu.vector_store %arg6[%c0_19, %c0_20], %27 {strides = array<i32>} : memref<128x1xf32, #tpu.memory_space<vmem>>, vector<128x1xf32>,
    } else {
    }
    %c1_i32 = arith.constant 1 : i32
    %21 = arith.cmpi eq, %arg1, %c1_i32 : i32
    %22 = arith.extui %21 : i1 to i32
    %c0_i32_10 = arith.constant 0 : i32
    %23 = arith.cmpi ne, %22, %c0_i32_10 : i32
    scf.if %23 {
      %c0_11 = arith.constant 0 : index
      %c0_12 = arith.constant 0 : index
      %24 = vector.load %arg6[%c0_11, %c0_12] : memref<128x1xf32, #tpu.memory_space<vmem>>, vector<128x1xf32>
      %c0_13 = arith.constant 0 : index
      %c0_14 = arith.constant 0 : index
      %25 = vector.load %arg7[%c0_13, %c0_14] : memref<128x1xf32, #tpu.memory_space<vmem>>, vector<128x1xf32>
      %26 = math.log %25 : vector<128x1xf32>
      %27 = arith.addf %24, %26 : vector<128x1xf32>
      %c0_15 = arith.constant 0 : index
      %c0_16 = arith.constant 0 : index
      %28 = vector.load %arg4[%c0_15, %c0_16] : memref<128x1xf32, #tpu.memory_space<vmem>>, vector<128x1xf32>
      %29 = arith.subf %27, %28 : vector<128x1xf32>
      %c0_17 = arith.constant 0 : index
      %c0_18 = arith.constant 0 : index
      %30 = vector.load %arg5[%c0_17, %c0_18] : memref<128x1xf32, #tpu.memory_space<vmem>>, vector<128x1xf32>
      tpu.vector_store %arg5[%c0_17, %c0_18], %29 {strides = array<i32>} : memref<128x1xf32, #tpu.memory_space<vmem>>, vector<128x1xf32>,
    } else {
    }
    return
  }
  func.func @transform_0(%arg0: i32, %arg1: i32) -> (i32, i32) {
    %c0_i32 = arith.constant 0 : i32
    %c0_i32_0 = arith.constant 0 : i32
    return %arg0, %c0_i32 : i32, i32
  }
  func.func @transform_1(%arg0: i32, %arg1: i32) -> (i32, i32) {
    %c0_i32 = arith.constant 0 : i32
    %c0_i32_0 = arith.constant 0 : i32
    return %arg1, %c0_i32 : i32, i32
  }
  func.func @transform_2(%arg0: i32, %arg1: i32) -> (i32, i32) {
    %c0_i32 = arith.constant 0 : i32
    %c0_i32_0 = arith.constant 0 : i32
    return %arg0, %c0_i32 : i32, i32
  }
  func.func @transform_3(%arg0: i32, %arg1: i32) -> (i32, i32) {
    %c0_i32 = arith.constant 0 : i32
    %c0_i32_0 = arith.constant 0 : i32
    return %arg0, %c0_i32 : i32, i32
  }
}

module attributes {stable_mosaic.version = 11 : i64} {
  func.func @_entropy_kernel(%arg0: i32, %arg1: memref<16x16xf32, #tpu.memory_space<vmem>>, %arg2: memref<16x1xf32, #tpu.memory_space<vmem>>, %arg3: memref<1x16xf32, #tpu.memory_space<vmem>>) attributes {dimension_semantics = [#tpu.dimension_semantics<arbitrary>], iteration_bounds = array<i64: 1>, scalar_prefetch = 0 : i64, scratch_operands = 0 : i64, tpu.core_type = #tpu.core_type<tc>, window_params = [{transform_indices = @transform_0, window_bounds = array<i64: 16, 16>}, {transform_indices = @transform_1, window_bounds = array<i64: 16, 1>}, {pipeline_mode = #tpu.pipeline_mode<synchronous>, transform_indices = @transform_2, window_bounds = array<i64: 1, 16>}]} {
    %c0_i32 = arith.constant 0 : i32
    %0 = arith.cmpi eq, %arg0, %c0_i32 : i32
    %1 = arith.extui %0 : i1 to i32
    %c0_i32_0 = arith.constant 0 : i32
    %2 = arith.cmpi ne, %1, %c0_i32_0 : i32
    scf.if %2 {
      %cst_14 = arith.constant 0.000000e+00 : f32
      %40 = vector.broadcast %cst_14 : f32 to vector<1x16xf32>
      %c0_15 = arith.constant 0 : index
      %c0_16 = arith.constant 0 : index
      %41 = vector.load %arg3[%c0_15, %c0_16] : memref<1x16xf32, #tpu.memory_space<vmem>>, vector<1x16xf32>
      tpu.vector_store %arg3[%c0_15, %c0_16], %40 {strides = array<i32>} : memref<1x16xf32, #tpu.memory_space<vmem>>, vector<1x16xf32>,
    } else {
    }
    %c0 = arith.constant 0 : index
    %c0_1 = arith.constant 0 : index
    %3 = vector.load %arg1[%c0, %c0_1] : memref<16x16xf32, #tpu.memory_space<vmem>>, vector<16x16xf32>
    %cst = arith.constant dense<0xFF800000> : vector<16xf32>
    %4 = vector.multi_reduction <maximumf>, %3, %cst [1] : vector<16x16xf32> to vector<16xf32>
    %5 = vector.shape_cast %4 : vector<16xf32> to vector<16x1xf32>
    %6 = vector.broadcast %5 : vector<16x1xf32> to vector<16x16xf32>
    %7 = arith.subf %3, %6 : vector<16x16xf32>
    %8 = math.exp %7 : vector<16x16xf32>
    %cst_2 = arith.constant dense<0.000000e+00> : vector<16xf32>
    %9 = vector.multi_reduction <add>, %8, %cst_2 [1] : vector<16x16xf32> to vector<16xf32>
    %10 = vector.shape_cast %9 : vector<16xf32> to vector<16x1xf32>
    %11 = tpu.reciprocal %10 {approx = true} : vector<16x1xf32> -> vector<16x1xf32>
    %12 = vector.broadcast %11 : vector<16x1xf32> to vector<16x16xf32>
    %13 = arith.mulf %8, %12 : vector<16x16xf32>
    %14 = vector.broadcast %5 : vector<16x1xf32> to vector<16x16xf32>
    %15 = arith.subf %3, %14 : vector<16x16xf32>
    %16 = math.log %10 : vector<16x1xf32>
    %17 = vector.broadcast %16 : vector<16x1xf32> to vector<16x16xf32>
    %18 = arith.subf %15, %17 : vector<16x16xf32>
    %19 = arith.mulf %13, %18 : vector<16x16xf32>
    %cst_3 = arith.constant dense<0.000000e+00> : vector<16xf32>
    %20 = vector.multi_reduction <add>, %19, %cst_3 [1] : vector<16x16xf32> to vector<16xf32>
    %21 = vector.shape_cast %20 : vector<16xf32> to vector<16x1xf32>
    %cst_4 = arith.constant 0.000000e+00 : f32
    %22 = vector.broadcast %cst_4 : f32 to vector<16x1xf32>
    %23 = arith.subf %22, %21 : vector<16x1xf32>
    %c0_5 = arith.constant 0 : index
    %c0_6 = arith.constant 0 : index
    %24 = vector.load %arg2[%c0_5, %c0_6] : memref<16x1xf32, #tpu.memory_space<vmem>>, vector<16x1xf32>
    tpu.vector_store %arg2[%c0_5, %c0_6], %23 {strides = array<i32>} : memref<16x1xf32, #tpu.memory_space<vmem>>, vector<16x1xf32>,
    %25 = tpu.iota {dimensions = array<i32: 0>} : vector<16x1xi32>
    %c16_i32 = arith.constant 16 : i32
    %26 = arith.muli %arg0, %c16_i32 : i32
    %27 = vector.broadcast %26 : i32 to vector<16x1xi32>
    %28 = arith.addi %25, %27 : vector<16x1xi32>
    %c16_i32_7 = arith.constant 16 : i32
    %29 = vector.broadcast %c16_i32_7 : i32 to vector<16x1xi32>
    %30 = arith.cmpi slt, %28, %29 : vector<16x1xi32>
    %cst_8 = arith.constant 0.000000e+00 : f32
    %31 = vector.shape_cast %30 : vector<16x1xi1> to vector<16x1xi1>
    %32 = vector.broadcast %31 : vector<16x1xi1> to vector<16x16xi1>
    %33 = vector.broadcast %cst_8 : f32 to vector<16x16xf32>
    %34 = arith.select %32, %13, %33 : vector<16x16xi1>, vector<16x16xf32>
    %c0_9 = arith.constant 0 : index
    %c0_10 = arith.constant 0 : index
    %35 = vector.load %arg3[%c0_9, %c0_10] : memref<1x16xf32, #tpu.memory_space<vmem>>, vector<1x16xf32>
    %cst_11 = arith.constant dense<0.000000e+00> : vector<16xf32>
    %36 = vector.multi_reduction <add>, %34, %cst_11 [0] : vector<16x16xf32> to vector<16xf32>
    %37 = vector.shape_cast %36 : vector<16xf32> to vector<1x16xf32>
    %38 = arith.addf %35, %37 : vector<1x16xf32>
    %c0_12 = arith.constant 0 : index
    %c0_13 = arith.constant 0 : index
    %39 = vector.load %arg3[%c0_12, %c0_13] : memref<1x16xf32, #tpu.memory_space<vmem>>, vector<1x16xf32>
    tpu.vector_store %arg3[%c0_12, %c0_13], %38 {strides = array<i32>} : memref<1x16xf32, #tpu.memory_space<vmem>>, vector<1x16xf32>,
    return
  }
  func.func @transform_0(%arg0: i32) -> (i32, i32) {
    %c0_i32 = arith.constant 0 : i32
    %c0_i32_0 = arith.constant 0 : i32
    return %arg0, %c0_i32 : i32, i32
  }
  func.func @transform_1(%arg0: i32) -> (i32, i32) {
    %c0_i32 = arith.constant 0 : i32
    %c0_i32_0 = arith.constant 0 : i32
    return %arg0, %c0_i32 : i32, i32
  }
  func.func @transform_2(%arg0: i32) -> (i32, i32) {
    %c0_i32 = arith.constant 0 : i32
    %c0_i32_0 = arith.constant 0 : i32
    %c0_i32_1 = arith.constant 0 : i32
    return %c0_i32, %c0_i32_0 : i32, i32
  }
}

</mosaic_0001>

<bundles_post_ra>
// kernel: contrastive_da_loss_with_mi_forward.4
= control target key start
LH: loop header
LB: loop body
LE: loop exit
PB: predicated region body
PF: predicated region fallthrough
CT: control target
= control target key end

     0   :  { %vm13_vm0 = vcmask 130048   ;;  %v49_v1 = vmov 0   ;;  %v26_v7 = vlaneseq  ;;  %vm37_vm2 = vcmask 7168   ;;  %s77_s0 = inlined_call_operand.vmem [shape: f32[8,16], index: 0, kind: input, shape index: {}]   ;;  %s78_s1 = inlined_call_operand.vmem [shape: s32[8,1], index: 1, kind: input, shape index: {}]   ;;  %s79_s2 = inlined_call_operand.vmem [shape: f32[8,1], index: 2, kind: output, shape index: {}]  }
   0x1   :  { %v11_v0 = vld [vmem:[%s77_s0] sm:$0xff]  ;;  %44 = vset.pattern.permute.xlu0 %v49_v1 }
   0x2   :  { %v14_v2 = vsel %vm13_vm0, %v11_v0, -inf  ;;  %v12_v3 = vld [vmem:[%s78_s1] sm:$0xff]  ;;  %v27_v8 = vand.u32 127, %v26_v7 }
   0x3   :  { %15 = vmax.xlane.f32.xlu0 %v14_v2 }
  0x19   :  { %29 = vperm.xlu0 %44, %v12_v3  }
  0x90   :  { %v16_v4 = vpop.xlane.xlu0 %15 }
  0x91   :  { %v17_v5 = vsub.f32 %v11_v0, %v16_v4 }
  0x93   :  { %v18_v6 = vmul.f32 1.442695, %v17_v5 }
  0x95   :  { %45 = vpow2.f32 %v18_v6 }
  0x98   :  { %v30_v9 = vpop.permute.xlu0 %29 }
  0x99   :  { %vm31_vm1 = vcmp.eq.s32.totalorder %v27_v8, %v30_v9 }
  0x9a   :  { %v32_v11 = vsel %vm31_vm1, %v11_v0, 0.0 }
  0x9b   :  { %v33_v13 = vsel %vm13_vm0, %v32_v11, 0.0 }
  0x9f   :  { %v46_v10 = vpop.eup %45 }
  0xa0   :  { %v20_v12 = vsel %vm13_vm0, %v46_v10, 0.0 }
  0xa1   :  { %21 = vadd.xlane.f32.xlu1 %v20_v12 }
  0xa5   :  { %34 = vadd.xlane.f32.xlu1 %v33_v13 }
 0x12e   :  { %v22_v14 = vpop.xlane.xlu1 %21 }
 0x12f   :  { %47 = vlog2.f32 %v22_v14 }
 0x132   :  { %v35_v17 = vpop.xlane.xlu1 %34 }
 0x139   :  { %v48_v15 = vpop.eup %47 }
 0x13a   :  { %v24_v16 = vmul.f32 0.6931472, %v48_v15 }
 0x13c   :  { %v25_v18 = vadd.f32 %v24_v16, %v16_v4 }
 0x13e   :  { %v36_v19 = vsub.f32 %v25_v18, %v35_v17 }
 0x140   :  { %38 = vst.msk [vmem:[%s79_s2] sm:$0xff] %vm37_vm2, %v36_v19 }

// kernel: contrastive_da_loss_with_mi_forward.5
= control target key start
LH: loop header
LB: loop body
LE: loop exit
PB: predicated region body
PF: predicated region fallthrough
CT: control target
= control target key end

     0   :  { %vm62_vm0 = vcmask 261120   ;;  %vm448_vm1 = vcmask 257024   ;;  %vm367_vm2 = vcmask 7168   ;;  %s1286_s0 = inlined_call_operand.vmem [shape: f32[128,32], index: 0, kind: input, shape index: {}]   ;;  %s1287_s1 = inlined_call_operand.vmem [shape: f32[128,32], index: 1, kind: input, shape index: {}]   ;;  %s1288_s2 = inlined_call_operand.vmem [shape: bf16[128,32], index: 2, kind: output, shape index: {0}]   ;;  %s1289_s3 = inlined_call_operand.vmem [shape: bf16[128,32], index: 3, kind: output, shape index: {1}]   ;;  %s1290_s4 = inlined_call_operand.vmem [shape: f32[128,1], index: 4, kind: output, shape index: {2}]  }
   0x1   :  { %v713_v0 = vld [vmem:[%s1286_s0 + $0x10] sm:$0xff]  ;;  %v718_v1 = vld [vmem:[%s1286_s0] sm:$0xff]  ;;  %v723_v2 = vld [vmem:[%s1286_s0 + $0x18] sm:$0xff] }
   0x2   :  { %v48_v3 = vmul.f32 %v713_v0, %v713_v0  ;;  %v46_v4 = vmul.f32 %v718_v1, %v718_v1  ;;  %v49_v5 = vmul.f32 %v723_v2, %v723_v2  ;;  %v734_v6 = vld [vmem:[%s1286_s0 + $0x8] sm:$0xff]  ;;  %v746_v9 = vld [vmem:[%s1286_s0 + $0x20] sm:$0xff]  ;;  %v759_v16 = vld [vmem:[%s1286_s0 + $0x38] sm:$0xff] }
   0x3   :  { %v47_v7 = vmul.f32 %v734_v6, %v734_v6  ;;  %v741_v8 = vld [vmem:[%s1286_s0 + $0x28] sm:$0xff]  ;;  %v50_v15 = vmul.f32 %v746_v9, %v746_v9  ;;  %v764_v17 = vld [vmem:[%s1286_s0 + $0x30] sm:$0xff]  ;;  %v53_v20 = vmul.f32 %v759_v16, %v759_v16  ;;  %v780_v23 = vld [vmem:[%s1286_s0 + $0x40] sm:$0xff] }
   0x4   :  { %v69_v10 = vsel %vm62_vm0, %v48_v3, 0.0  ;;  %v63_v11 = vsel %vm62_vm0, %v46_v4, 0.0  ;;  %v72_v12 = vsel %vm62_vm0, %v49_v5, 0.0  ;;  %v51_v14 = vmul.f32 %v741_v8, %v741_v8  ;;  %v775_v22 = vld [vmem:[%s1286_s0 + $0x48] sm:$0xff]  ;;  %v791_v28 = vld [vmem:[%s1286_s0 + $0x58] sm:$0xff]  ;;  %v796_v29 = vld [vmem:[%s1286_s0 + $0x50] sm:$0xff] }
   0x5   :  { %70 = vadd.xlane.f32.xlu1 %v69_v10  ;;  %64 = vadd.xlane.f32.xlu0 %v63_v11  ;;  %v66_v13 = vsel %vm62_vm0, %v47_v7, 0.0  ;;  %v75_v19 = vsel %vm62_vm0, %v50_v15, 0.0  ;;  %v52_v21 = vmul.f32 %v764_v17, %v764_v17  ;;  %v84_v24 = vsel %vm62_vm0, %v53_v20, 0.0  ;;  %v807_v34 = vld [vmem:[%s1286_s0 + $0x68] sm:$0xff]  ;;  %v812_v35 = vld [vmem:[%s1286_s0 + $0x60] sm:$0xff]  ;;  %v823_v40 = vld [vmem:[%s1286_s0 + $0x78] sm:$0xff] }
   0x6   :  { %v78_v18 = vsel %vm62_vm0, %v51_v14, 0.0  ;;  %v55_v26 = vmul.f32 %v775_v22, %v775_v22  ;;  %v54_v27 = vmul.f32 %v780_v23, %v780_v23  ;;  %v57_v32 = vmul.f32 %v791_v28, %v791_v28  ;;  %v828_v41 = vld [vmem:[%s1286_s0 + $0x70] sm:$0xff]  ;;  %v839_v46 = vld [vmem:[%s1287_s1 + $0x8] sm:$0xff]  ;;  %v844_v47 = vld [vmem:[%s1287_s1] sm:$0xff] }
   0x7   :  { %v81_v25 = vsel %vm62_vm0, %v52_v21, 0.0  ;;  %v56_v33 = vmul.f32 %v796_v29, %v796_v29  ;;  %v59_v38 = vmul.f32 %v807_v34, %v807_v34  ;;  %v58_v39 = vmul.f32 %v812_v35, %v812_v35  ;;  %v855_v52 = vld [vmem:[%s1287_s1 + $0x18] sm:$0xff]  ;;  %v860_v53 = vld [vmem:[%s1287_s1 + $0x10] sm:$0xff]  ;;  %v871_v58 = vld [vmem:[%s1287_s1 + $0x28] sm:$0xff] }
   0x8   :  { %v90_v30 = vsel %vm62_vm0, %v55_v26, 0.0  ;;  %v87_v31 = vsel %vm62_vm0, %v54_v27, 0.0  ;;  %v96_v36 = vsel %vm62_vm0, %v57_v32, 0.0  ;;  %v61_v44 = vmul.f32 %v823_v40, %v823_v40  ;;  %v876_v59 = vld [vmem:[%s1287_s1 + $0x20] sm:$0xff]  ;;  %v887_v3 = vld [vmem:[%s1287_s1 + $0x38] sm:$0xff]  ;;  %v892_v4 = vld [vmem:[%s1287_s1 + $0x30] sm:$0xff] }
   0x9   :  { %73 = vadd.xlane.f32.xlu1 %v72_v12  ;;  %67 = vadd.xlane.f32.xlu0 %v66_v13  ;;  %v93_v37 = vsel %vm62_vm0, %v56_v33, 0.0  ;;  %v102_v42 = vsel %vm62_vm0, %v59_v38, 0.0  ;;  %v99_v43 = vsel %vm62_vm0, %v58_v39, 0.0  ;;  %v60_v45 = vmul.f32 %v828_v41, %v828_v41  ;;  %v903_v12 = vld [vmem:[%s1287_s1 + $0x48] sm:$0xff]  ;;  %v908_v13 = vld [vmem:[%s1287_s1 + $0x40] sm:$0xff]  ;;  %v919_v20 = vld [vmem:[%s1287_s1 + $0x58] sm:$0xff] }
   0xa   :  { %v108_v48 = vsel %vm62_vm0, %v61_v44, 0.0  ;;  %v160_v50 = vmul.f32 %v839_v46, %v839_v46  ;;  %v159_v51 = vmul.f32 %v844_v47, %v844_v47  ;;  %v162_v56 = vmul.f32 %v855_v52, %v855_v52  ;;  %v924_v21 = vld [vmem:[%s1287_s1 + $0x50] sm:$0xff]  ;;  %v951_v38 = vld [vmem:[%s1287_s1 + $0x78] sm:$0xff] }
   0xb   :  { %v105_v49 = vsel %vm62_vm0, %v60_v45, 0.0  ;;  %v161_v57 = vmul.f32 %v860_v53, %v860_v53  ;;  %v164_v62 = vmul.f32 %v871_v58, %v871_v58  ;;  %v163_v63 = vmul.f32 %v876_v59, %v876_v59  ;;  %v956_v39 = vld [vmem:[%s1287_s1 + $0x70] sm:$0xff] }
   0xc   :  { %v178_v54 = vsel %vm62_vm0, %v160_v50, 0.0  ;;  %v175_v55 = vsel %vm62_vm0, %v159_v51, 0.0  ;;  %v184_v60 = vsel %vm62_vm0, %v162_v56, 0.0  ;;  %v166_v10 = vmul.f32 %v887_v3, %v887_v3 }
   0xd   :  { %79 = vadd.xlane.f32.xlu1 %v78_v18  ;;  %76 = vadd.xlane.f32.xlu0 %v75_v19  ;;  %v181_v61 = vsel %vm62_vm0, %v161_v57, 0.0  ;;  %v190_v5 = vsel %vm62_vm0, %v164_v62, 0.0  ;;  %v187_v7 = vsel %vm62_vm0, %v163_v63, 0.0  ;;  %v165_v11 = vmul.f32 %v892_v4, %v892_v4 }
   0xe   :  { %v196_v14 = vsel %vm62_vm0, %v166_v10, 0.0  ;;  %v168_v18 = vmul.f32 %v903_v12, %v903_v12  ;;  %v167_v19 = vmul.f32 %v908_v13, %v908_v13  ;;  %v170_v26 = vmul.f32 %v919_v20, %v919_v20 }
   0xf   :  { %v193_v15 = vsel %vm62_vm0, %v165_v11, 0.0  ;;  %v169_v27 = vmul.f32 %v924_v21, %v924_v21  ;;  %v174_v44 = vmul.f32 %v951_v38, %v951_v38  ;;  %v173_v45 = vmul.f32 %v956_v39, %v956_v39 }
  0x10   :  { %v208_v32 = vsel %vm62_vm0, %v170_v26, 0.0 }
  0x11   :  { %85 = vadd.xlane.f32.xlu1 %v84_v24  ;;  %82 = vadd.xlane.f32.xlu0 %v81_v25  ;;  %v202_v24 = vsel %vm62_vm0, %v168_v18, 0.0  ;;  %v199_v25 = vsel %vm62_vm0, %v167_v19, 0.0  ;;  %v205_v33 = vsel %vm62_vm0, %v169_v27, 0.0 }
  0x15   :  { %91 = vadd.xlane.f32.xlu1 %v90_v30  ;;  %88 = vadd.xlane.f32.xlu0 %v87_v31  ;;  %v935_v30 = vld [vmem:[%s1287_s1 + $0x68] sm:$0xff]  ;;  %v940_v31 = vld [vmem:[%s1287_s1 + $0x60] sm:$0xff] }
  0x19   :  { %97 = vadd.xlane.f32.xlu1 %v96_v36  ;;  %94 = vadd.xlane.f32.xlu0 %v93_v37  ;;  %v172_v36 = vmul.f32 %v935_v30, %v935_v30  ;;  %v171_v37 = vmul.f32 %v940_v31, %v940_v31 }
  0x1d   :  { %103 = vadd.xlane.f32.xlu1 %v102_v42  ;;  %100 = vadd.xlane.f32.xlu0 %v99_v43  ;;  %v214_v42 = vsel %vm62_vm0, %v172_v36, 0.0  ;;  %v211_v43 = vsel %vm62_vm0, %v171_v37, 0.0 }
  0x21   :  { %109 = vadd.xlane.f32.xlu1 %v108_v48  ;;  %106 = vadd.xlane.f32.xlu0 %v105_v49  ;;  %v220_v48 = vsel %vm62_vm0, %v174_v44, 0.0  ;;  %v217_v49 = vsel %vm62_vm0, %v173_v45, 0.0 }
  0x25   :  { %179 = vadd.xlane.f32.xlu1 %v178_v54  ;;  %176 = vadd.xlane.f32.xlu0 %v175_v55 }
  0x29   :  { %185 = vadd.xlane.f32.xlu1 %v184_v60  ;;  %182 = vadd.xlane.f32.xlu0 %v181_v61 }
  0x2d   :  { %191 = vadd.xlane.f32.xlu1 %v190_v5  ;;  %188 = vadd.xlane.f32.xlu0 %v187_v7 }
  0x31   :  { %197 = vadd.xlane.f32.xlu1 %v196_v14  ;;  %194 = vadd.xlane.f32.xlu0 %v193_v15 }
  0x35   :  { %203 = vadd.xlane.f32.xlu1 %v202_v24  ;;  %200 = vadd.xlane.f32.xlu0 %v199_v25 }
  0x39   :  { %209 = vadd.xlane.f32.xlu1 %v208_v32  ;;  %206 = vadd.xlane.f32.xlu0 %v205_v33 }
  0x3d   :  { %215 = vadd.xlane.f32.xlu1 %v214_v42  ;;  %212 = vadd.xlane.f32.xlu0 %v211_v43 }
  0x41   :  { %221 = vadd.xlane.f32.xlu1 %v220_v48  ;;  %218 = vadd.xlane.f32.xlu0 %v217_v49 }
  0x92   :  { %v71_v50 = vpop.xlane.xlu1 %70  ;;  %v65_v51 = vpop.xlane.xlu0 %64 }
  0x93   :  { %v113_v54 = vmax.f32 %v71_v50, 1e-24  ;;  %v111_v55 = vmax.f32 %v65_v51, 1e-24 }
  0x95   :  { %621 = vrsqrt.f32 %v113_v54 }
  0x96   :  { %623 = vrsqrt.f32 %v111_v55  ;;  %v74_v56 = vpop.xlane.xlu1 %73  ;;  %v68_v57 = vpop.xlane.xlu0 %67 }
  0x97   :  { %v114_v60 = vmax.f32 %v74_v56, 1e-24  ;;  %v112_v61 = vmax.f32 %v68_v57, 1e-24 }
  0x99   :  { %625 = vrsqrt.f32 %v114_v60 }
  0x9a   :  { %627 = vrsqrt.f32 %v112_v61  ;;  %v80_v62 = vpop.xlane.xlu1 %79  ;;  %v77_v63 = vpop.xlane.xlu0 %76 }
  0x9b   :  { %v116_v5 = vmax.f32 %v80_v62, 1e-24  ;;  %v115_v7 = vmax.f32 %v77_v63, 1e-24 }
  0x9d   :  { %629 = vrsqrt.f32 %v116_v5 }
  0x9e   :  { %631 = vrsqrt.f32 %v115_v7  ;;  %v86_v10 = vpop.xlane.xlu1 %85  ;;  %v83_v11 = vpop.xlane.xlu0 %82 }
  0x9f   :  { %v622_v14 = vpop.eup %621  ;;  %v118_v15 = vmax.f32 %v86_v10, 1e-24  ;;  %v117_v18 = vmax.f32 %v83_v11, 1e-24 }
  0xa0   :  { %v624_v19 = vpop.eup %623  ;;  %v145_v24 = vmul.f32 1.4142135, %v622_v14 }
  0xa1   :  { %v143_v25 = vmul.f32 1.4142135, %v624_v19  ;;  %633 = vrsqrt.f32 %v118_v15 }
  0xa2   :  { %635 = vrsqrt.f32 %v117_v18  ;;  %v92_v26 = vpop.xlane.xlu1 %91  ;;  %v89_v27 = vpop.xlane.xlu0 %88  ;;  %v967_v32 = vmul.f32 %v145_v24, %v713_v0 }
  0xa3   :  { %v626_v33 = vpop.eup %625  ;;  %v120_v36 = vmax.f32 %v92_v26, 1e-24  ;;  %v119_v37 = vmax.f32 %v89_v27, 1e-24  ;;  %v970_v42 = vmul.f32 %v143_v25, %v718_v1 }
  0xa4   :  { %v628_v43 = vpop.eup %627  ;;  %v146_v44 = vmul.f32 1.4142135, %v626_v33  ;;  %v591_v45 = vpack.c.bf16 %v967_v32, %v967_v32 }
  0xa5   :  { %v144_v48 = vmul.f32 1.4142135, %v628_v43  ;;  %637 = vrsqrt.f32 %v120_v36  ;;  %v589_v49 = vpack.c.bf16 %v970_v42, %v970_v42 }
  0xa6   :  { %639 = vrsqrt.f32 %v119_v37  ;;  %v98_v0 = vpop.xlane.xlu1 %97  ;;  %v95_v50 = vpop.xlane.xlu0 %94  ;;  %v977_v51 = vmul.f32 %v146_v44, %v723_v2  ;;  %451 = vst.msk [vmem:[%s1288_s2 + $0x8] sm:$0xf] %vm448_vm1, %v591_v45 }
  0xa7   :  { %v630_v1 = vpop.eup %629  ;;  %v122_v54 = vmax.f32 %v98_v0, 1e-24  ;;  %v121_v55 = vmax.f32 %v95_v50, 1e-24  ;;  %v984_v56 = vmul.f32 %v144_v48, %v734_v6  ;;  %449 = vst.msk [vmem:[%s1288_s2] sm:$0xf] %vm448_vm1, %v589_v49 }
  0xa8   :  { %v632_v57 = vpop.eup %631  ;;  %v148_v60 = vmul.f32 1.4142135, %v630_v1  ;;  %v592_v2 = vpack.c.bf16 %v977_v51, %v977_v51 }
  0xa9   :  { %v147_v61 = vmul.f32 1.4142135, %v632_v57  ;;  %641 = vrsqrt.f32 %v122_v54  ;;  %v590_v62 = vpack.c.bf16 %v984_v56, %v984_v56 }
  0xaa   :  { %643 = vrsqrt.f32 %v121_v55  ;;  %v104_v63 = vpop.xlane.xlu1 %103  ;;  %v101_v5 = vpop.xlane.xlu0 %100  ;;  %452 = vst.msk [vmem:[%s1288_s2 + $0xc] sm:$0xf] %vm448_vm1, %v592_v2  ;;  %v999_v6 = vmul.f32 %v148_v60, %v741_v8 }
  0xab   :  { %v634_v7 = vpop.eup %633  ;;  %v124_v10 = vmax.f32 %v104_v63, 1e-24  ;;  %v123_v11 = vmax.f32 %v101_v5, 1e-24  ;;  %450 = vst.msk [vmem:[%s1288_s2 + $0x4] sm:$0xf] %vm448_vm1, %v590_v62  ;;  %v1006_v14 = vmul.f32 %v147_v61, %v746_v9 }
  0xac   :  { %v636_v15 = vpop.eup %635  ;;  %v150_v18 = vmul.f32 1.4142135, %v634_v7  ;;  %v594_v19 = vpack.c.bf16 %v999_v6, %v999_v6 }
  0xad   :  { %v149_v24 = vmul.f32 1.4142135, %v636_v15  ;;  %645 = vrsqrt.f32 %v124_v10  ;;  %v593_v8 = vpack.c.bf16 %v1006_v14, %v1006_v14 }
  0xae   :  { %647 = vrsqrt.f32 %v123_v11  ;;  %v110_v25 = vpop.xlane.xlu1 %109  ;;  %v107_v26 = vpop.xlane.xlu0 %106  ;;  %454 = vst.msk [vmem:[%s1288_s2 + $0x14] sm:$0xf] %vm448_vm1, %v594_v19  ;;  %v1017_v9 = vmul.f32 %v150_v18, %v759_v16 }
  0xaf   :  { %v638_v27 = vpop.eup %637  ;;  %v126_v33 = vmax.f32 %v110_v25, 1e-24  ;;  %v125_v36 = vmax.f32 %v107_v26, 1e-24  ;;  %453 = vst.msk [vmem:[%s1288_s2 + $0x10] sm:$0xf] %vm448_vm1, %v593_v8  ;;  %v1024_v37 = vmul.f32 %v149_v24, %v764_v17 }
  0xb0   :  { %v640_v43 = vpop.eup %639  ;;  %v152_v44 = vmul.f32 1.4142135, %v638_v27  ;;  %v596_v45 = vpack.c.bf16 %v1017_v9, %v1017_v9 }
  0xb1   :  { %v151_v48 = vmul.f32 1.4142135, %v640_v43  ;;  %649 = vrsqrt.f32 %v126_v33  ;;  %v595_v16 = vpack.c.bf16 %v1024_v37, %v1024_v37 }
  0xb2   :  { %651 = vrsqrt.f32 %v125_v36  ;;  %v180_v49 = vpop.xlane.xlu1 %179  ;;  %v177_v0 = vpop.xlane.xlu0 %176  ;;  %456 = vst.msk [vmem:[%s1288_s2 + $0x1c] sm:$0xf] %vm448_vm1, %v596_v45  ;;  %v1035_v17 = vmul.f32 %v152_v44, %v775_v22 }
  0xb3   :  { %v642_v50 = vpop.eup %641  ;;  %v224_v1 = vmax.f32 %v180_v49, 1e-24  ;;  %v223_v54 = vmax.f32 %v177_v0, 1e-24  ;;  %455 = vst.msk [vmem:[%s1288_s2 + $0x18] sm:$0xf] %vm448_vm1, %v595_v16  ;;  %v1042_v55 = vmul.f32 %v151_v48, %v780_v23 }
  0xb4   :  { %v644_v57 = vpop.eup %643  ;;  %v154_v60 = vmul.f32 1.4142135, %v642_v50  ;;  %v598_v2 = vpack.c.bf16 %v1035_v17, %v1035_v17 }
  0xb5   :  { %v153_v61 = vmul.f32 1.4142135, %v644_v57  ;;  %653 = vrsqrt.f32 %v224_v1  ;;  %v597_v22 = vpack.c.bf16 %v1042_v55, %v1042_v55 }
  0xb6   :  { %655 = vrsqrt.f32 %v223_v54  ;;  %v186_v62 = vpop.xlane.xlu1 %185  ;;  %v183_v63 = vpop.xlane.xlu0 %182  ;;  %458 = vst.msk [vmem:[%s1288_s2 + $0x24] sm:$0xf] %vm448_vm1, %v598_v2  ;;  %v1053_v23 = vmul.f32 %v154_v60, %v791_v28 }
  0xb7   :  { %v646_v5 = vpop.eup %645  ;;  %v226_v7 = vmax.f32 %v186_v62, 1e-24  ;;  %v225_v10 = vmax.f32 %v183_v63, 1e-24  ;;  %457 = vst.msk [vmem:[%s1288_s2 + $0x20] sm:$0xf] %vm448_vm1, %v597_v22  ;;  %v1060_v11 = vmul.f32 %v153_v61, %v796_v29 }
  0xb8   :  { %v648_v15 = vpop.eup %647  ;;  %v156_v18 = vmul.f32 1.4142135, %v646_v5  ;;  %v600_v19 = vpack.c.bf16 %v1053_v23, %v1053_v23 }
  0xb9   :  { %v155_v24 = vmul.f32 1.4142135, %v648_v15  ;;  %657 = vrsqrt.f32 %v226_v7  ;;  %v599_v28 = vpack.c.bf16 %v1060_v11, %v1060_v11 }
  0xba   :  { %659 = vrsqrt.f32 %v225_v10  ;;  %v192_v8 = vpop.xlane.xlu1 %191  ;;  %v189_v25 = vpop.xlane.xlu0 %188  ;;  %460 = vst.msk [vmem:[%s1288_s2 + $0x2c] sm:$0xf] %vm448_vm1, %v600_v19  ;;  %v1071_v29 = vmul.f32 %v156_v18, %v807_v34 }
  0xbb   :  { %v650_v26 = vpop.eup %649  ;;  %v228_v27 = vmax.f32 %v192_v8, 1e-24  ;;  %v227_v33 = vmax.f32 %v189_v25, 1e-24  ;;  %459 = vst.msk [vmem:[%s1288_s2 + $0x28] sm:$0xf] %vm448_vm1, %v599_v28  ;;  %v1078_v36 = vmul.f32 %v155_v24, %v812_v35 }
  0xbc   :  { %v652_v43 = vpop.eup %651  ;;  %v158_v44 = vmul.f32 1.4142135, %v650_v26  ;;  %v602_v45 = vpack.c.bf16 %v1071_v29, %v1071_v29 }
  0xbd   :  { %v157_v48 = vmul.f32 1.4142135, %v652_v43  ;;  %661 = vrsqrt.f32 %v228_v27  ;;  %v601_v34 = vpack.c.bf16 %v1078_v36, %v1078_v36 }
  0xbe   :  { %663 = vrsqrt.f32 %v227_v33  ;;  %v198_v16 = vpop.xlane.xlu1 %197  ;;  %v195_v49 = vpop.xlane.xlu0 %194  ;;  %462 = vst.msk [vmem:[%s1288_s2 + $0x34] sm:$0xf] %vm448_vm1, %v602_v45  ;;  %v1089_v35 = vmul.f32 %v158_v44, %v823_v40 }
  0xbf   :  { %v654_v0 = vpop.eup %653  ;;  %v230_v50 = vmax.f32 %v198_v16, 1e-24  ;;  %v229_v1 = vmax.f32 %v195_v49, 1e-24  ;;  %461 = vst.msk [vmem:[%s1288_s2 + $0x30] sm:$0xf] %vm448_vm1, %v601_v34  ;;  %v1096_v54 = vmul.f32 %v157_v48, %v828_v41 }
  0xc0   :  { %v656_v57 = vpop.eup %655  ;;  %v256_v60 = vmul.f32 1.4142135, %v654_v0  ;;  %v604_v2 = vpack.c.bf16 %v1089_v35, %v1089_v35 }
  0xc1   :  { %v255_v61 = vmul.f32 1.4142135, %v656_v57  ;;  %665 = vrsqrt.f32 %v230_v50  ;;  %v603_v40 = vpack.c.bf16 %v1096_v54, %v1096_v54 }
  0xc2   :  { %667 = vrsqrt.f32 %v229_v1  ;;  %v204_v22 = vpop.xlane.xlu1 %203  ;;  %v201_v62 = vpop.xlane.xlu0 %200  ;;  %v288_v63 = vmul.f32 %v256_v60, %v839_v46  ;;  %464 = vst.msk [vmem:[%s1288_s2 + $0x3c] sm:$0xf] %vm448_vm1, %v604_v2 }
  0xc3   :  { %v658_v41 = vpop.eup %657  ;;  %v232_v5 = vmax.f32 %v204_v22, 1e-24  ;;  %v231_v7 = vmax.f32 %v201_v62, 1e-24  ;;  %v287_v10 = vmul.f32 %v255_v61, %v844_v47  ;;  %463 = vst.msk [vmem:[%s1288_s2 + $0x38] sm:$0xf] %vm448_vm1, %v603_v40 }
  0xc4   :  { %v660_v15 = vpop.eup %659  ;;  %v258_v18 = vmul.f32 1.4142135, %v658_v41  ;;  %v304_v19 = vmul.f32 %v288_v63, %v984_v56  ;;  %v606_v46 = vpack.c.bf16 %v288_v63, %v288_v63 }
  0xc5   :  { %v257_v24 = vmul.f32 1.4142135, %v660_v15  ;;  %669 = vrsqrt.f32 %v232_v5  ;;  %v303_v28 = vmul.f32 %v287_v10, %v970_v42  ;;  %v605_v8 = vpack.c.bf16 %v287_v10, %v287_v10 }
  0xc6   :  { %671 = vrsqrt.f32 %v231_v7  ;;  %v210_v25 = vpop.xlane.xlu1 %209  ;;  %v207_v26 = vpop.xlane.xlu0 %206  ;;  %v322_v47 = vsel %vm62_vm0, %v304_v19, 0.0  ;;  %530 = vst.msk [vmem:[%s1289_s3 + $0x4] sm:$0xf] %vm448_vm1, %v606_v46  ;;  %v290_v27 = vmul.f32 %v258_v18, %v855_v52 }
  0xc7   :  { %v662_v33 = vpop.eup %661  ;;  %v234_v56 = vmax.f32 %v210_v25, 1e-24  ;;  %v233_v43 = vmax.f32 %v207_v26, 1e-24  ;;  %323 = vadd.xlane.f32.xlu1 %v322_v47  ;;  %v319_v44 = vsel %vm62_vm0, %v303_v28, 0.0  ;;  %v289_v42 = vmul.f32 %v257_v24, %v860_v53 }
  0xc8   :  { %529 = vst.msk [vmem:[%s1289_s3] sm:$0xf] %vm448_vm1, %v605_v8  ;;  %v664_v45 = vpop.eup %663  ;;  %v260_v48 = vmul.f32 1.4142135, %v662_v33  ;;  %320 = vadd.xlane.f32.xlu0 %v319_v44  ;;  %v306_v34 = vmul.f32 %v290_v27, %v977_v51  ;;  %v608_v16 = vpack.c.bf16 %v290_v27, %v290_v27 }
  0xc9   :  { %v259_v52 = vmul.f32 1.4142135, %v664_v45  ;;  %673 = vrsqrt.f32 %v234_v56  ;;  %v305_v49 = vmul.f32 %v289_v42, %v967_v32  ;;  %v607_v0 = vpack.c.bf16 %v289_v42, %v289_v42 }
  0xca   :  { %675 = vrsqrt.f32 %v233_v43  ;;  %v216_v50 = vpop.xlane.xlu1 %215  ;;  %v213_v1 = vpop.xlane.xlu0 %212  ;;  %v328_v57 = vsel %vm62_vm0, %v306_v34, 0.0  ;;  %532 = vst.msk [vmem:[%s1289_s3 + $0xc] sm:$0xf] %vm448_vm1, %v608_v16  ;;  %v292_v53 = vmul.f32 %v260_v48, %v871_v58 }
  0xcb   :  { %v666_v60 = vpop.eup %665  ;;  %v236_v51 = vmax.f32 %v216_v50, 1e-24  ;;  %v235_v2 = vmax.f32 %v213_v1, 1e-24  ;;  %329 = vadd.xlane.f32.xlu1 %v328_v57  ;;  %v325_v61 = vsel %vm62_vm0, %v305_v49, 0.0  ;;  %v291_v32 = vmul.f32 %v259_v52, %v876_v59 }
  0xcc   :  { %531 = vst.msk [vmem:[%s1289_s3 + $0x8] sm:$0xf] %vm448_vm1, %v607_v0  ;;  %v668_v40 = vpop.eup %667  ;;  %v262_v22 = vmul.f32 1.4142135, %v666_v60  ;;  %326 = vadd.xlane.f32.xlu0 %v325_v61  ;;  %v308_v62 = vmul.f32 %v292_v53, %v999_v6  ;;  %v610_v63 = vpack.c.bf16 %v292_v53, %v292_v53 }
  0xcd   :  { %v261_v58 = vmul.f32 1.4142135, %v668_v40  ;;  %677 = vrsqrt.f32 %v236_v51  ;;  %v307_v41 = vmul.f32 %v291_v32, %v1006_v14  ;;  %v609_v5 = vpack.c.bf16 %v291_v32, %v291_v32 }
  0xce   :  { %679 = vrsqrt.f32 %v235_v2  ;;  %v222_v7 = vpop.xlane.xlu1 %221  ;;  %v219_v10 = vpop.xlane.xlu0 %218  ;;  %v334_v15 = vsel %vm62_vm0, %v308_v62, 0.0  ;;  %534 = vst.msk [vmem:[%s1289_s3 + $0x14] sm:$0xf] %vm448_vm1, %v610_v63  ;;  %v294_v59 = vmul.f32 %v262_v22, %v887_v3 }
  0xcf   :  { %v670_v18 = vpop.eup %669  ;;  %v238_v6 = vmax.f32 %v222_v7, 1e-24  ;;  %v237_v19 = vmax.f32 %v219_v10, 1e-24  ;;  %335 = vadd.xlane.f32.xlu1 %v334_v15  ;;  %v331_v46 = vsel %vm62_vm0, %v307_v41, 0.0  ;;  %v293_v14 = vmul.f32 %v261_v58, %v892_v4 }
  0xd0   :  { %533 = vst.msk [vmem:[%s1289_s3 + $0x10] sm:$0xf] %vm448_vm1, %v609_v5  ;;  %v672_v24 = vpop.eup %671  ;;  %v264_v28 = vmul.f32 1.4142135, %v670_v18  ;;  %332 = vadd.xlane.f32.xlu0 %v331_v46  ;;  %v310_v8 = vmul.f32 %v294_v59, %v1017_v9  ;;  %v612_v25 = vpack.c.bf16 %v294_v59, %v294_v59 }
  0xd1   :  { %v263_v3 = vmul.f32 1.4142135, %v672_v24  ;;  %681 = vrsqrt.f32 %v238_v6  ;;  %v309_v26 = vmul.f32 %v293_v14, %v1024_v37  ;;  %v611_v47 = vpack.c.bf16 %v293_v14, %v293_v14 }
  0xd2   :  { %683 = vrsqrt.f32 %v237_v19  ;;  %v340_v27 = vsel %vm62_vm0, %v310_v8, 0.0  ;;  %536 = vst.msk [vmem:[%s1289_s3 + $0x1c] sm:$0xf] %vm448_vm1, %v612_v25  ;;  %v296_v4 = vmul.f32 %v264_v28, %v903_v12 }
  0xd3   :  { %v674_v33 = vpop.eup %673  ;;  %341 = vadd.xlane.f32.xlu1 %v340_v27  ;;  %v337_v9 = vsel %vm62_vm0, %v309_v26, 0.0  ;;  %535 = vst.msk [vmem:[%s1289_s3 + $0x18] sm:$0xf] %vm448_vm1, %v611_v47  ;;  %v295_v37 = vmul.f32 %v263_v3, %v908_v13 }
  0xd4   :  { %v676_v56 = vpop.eup %675  ;;  %v266_v43 = vmul.f32 1.4142135, %v674_v33  ;;  %338 = vadd.xlane.f32.xlu0 %v337_v9  ;;  %v312_v44 = vmul.f32 %v296_v4, %v1035_v17  ;;  %v614_v42 = vpack.c.bf16 %v296_v4, %v296_v4 }
  0xd5   :  { %v265_v45 = vmul.f32 1.4142135, %v676_v56  ;;  %v311_v12 = vmul.f32 %v295_v37, %v1042_v55  ;;  %v613_v48 = vpack.c.bf16 %v295_v37, %v295_v37 }
  0xd6   :  { %v346_v34 = vsel %vm62_vm0, %v312_v44, 0.0  ;;  %538 = vst.msk [vmem:[%s1289_s3 + $0x24] sm:$0xf] %vm448_vm1, %v614_v42  ;;  %v298_v16 = vmul.f32 %v266_v43, %v919_v20 }
  0xd7   :  { %v678_v13 = vpop.eup %677  ;;  %347 = vadd.xlane.f32.xlu1 %v346_v34  ;;  %v343_v52 = vsel %vm62_vm0, %v311_v12, 0.0  ;;  %537 = vst.msk [vmem:[%s1289_s3 + $0x20] sm:$0xf] %vm448_vm1, %v613_v48  ;;  %v297_v17 = vmul.f32 %v265_v45, %v924_v21 }
  0xd8   :  { %v680_v55 = vpop.eup %679  ;;  %v268_v49 = vmul.f32 1.4142135, %v678_v13  ;;  %344 = vadd.xlane.f32.xlu0 %v343_v52  ;;  %v314_v0 = vmul.f32 %v298_v16, %v1053_v23  ;;  %v616_v50 = vpack.c.bf16 %v298_v16, %v298_v16 }
  0xd9   :  { %v267_v1 = vmul.f32 1.4142135, %v680_v55  ;;  %v313_v20 = vmul.f32 %v297_v17, %v1060_v11  ;;  %v615_v57 = vpack.c.bf16 %v297_v17, %v297_v17 }
  0xda   :  { %v352_v53 = vsel %vm62_vm0, %v314_v0, 0.0  ;;  %540 = vst.msk [vmem:[%s1289_s3 + $0x2c] sm:$0xf] %vm448_vm1, %v616_v50  ;;  %v300_v60 = vmul.f32 %v268_v49, %v935_v30 }
  0xdb   :  { %v682_v21 = vpop.eup %681  ;;  %353 = vadd.xlane.f32.xlu1 %v352_v53  ;;  %v349_v51 = vsel %vm62_vm0, %v313_v20, 0.0  ;;  %539 = vst.msk [vmem:[%s1289_s3 + $0x28] sm:$0xf] %vm448_vm1, %v615_v57  ;;  %v299_v23 = vmul.f32 %v267_v1, %v940_v31 }
  0xdc   :  { %v684_v11 = vpop.eup %683  ;;  %v270_v2 = vmul.f32 1.4142135, %v682_v21  ;;  %350 = vadd.xlane.f32.xlu0 %v349_v51  ;;  %v316_v61 = vmul.f32 %v300_v60, %v1071_v29  ;;  %v618_v32 = vpack.c.bf16 %v300_v60, %v300_v60 }
  0xdd   :  { %v269_v40 = vmul.f32 1.4142135, %v684_v11  ;;  %v315_v30 = vmul.f32 %v299_v23, %v1078_v36  ;;  %v617_v22 = vpack.c.bf16 %v299_v23, %v299_v23 }
  0xde   :  { %v358_v62 = vsel %vm62_vm0, %v316_v61, 0.0  ;;  %542 = vst.msk [vmem:[%s1289_s3 + $0x34] sm:$0xf] %vm448_vm1, %v618_v32  ;;  %v302_v63 = vmul.f32 %v270_v2, %v951_v38 }
  0xdf   :  { %359 = vadd.xlane.f32.xlu1 %v358_v62  ;;  %v355_v31 = vsel %vm62_vm0, %v315_v30, 0.0  ;;  %541 = vst.msk [vmem:[%s1289_s3 + $0x30] sm:$0xf] %vm448_vm1, %v617_v22  ;;  %v301_v29 = vmul.f32 %v269_v40, %v956_v39 }
  0xe0   :  { %356 = vadd.xlane.f32.xlu0 %v355_v31  ;;  %v318_v36 = vmul.f32 %v302_v63, %v1089_v35  ;;  %v620_v58 = vpack.c.bf16 %v302_v63, %v302_v63 }
  0xe1   :  { %v317_v41 = vmul.f32 %v301_v29, %v1096_v54  ;;  %v619_v5 = vpack.c.bf16 %v301_v29, %v301_v29 }
  0xe2   :  { %v364_v7 = vsel %vm62_vm0, %v318_v36, 0.0  ;;  %544 = vst.msk [vmem:[%s1289_s3 + $0x3c] sm:$0xf] %vm448_vm1, %v620_v58 }
  0xe3   :  { %365 = vadd.xlane.f32.xlu1 %v364_v7  ;;  %v361_v38 = vsel %vm62_vm0, %v317_v41, 0.0  ;;  %543 = vst.msk [vmem:[%s1289_s3 + $0x38] sm:$0xf] %vm448_vm1, %v619_v5 }
  0xe4   :  { %362 = vadd.xlane.f32.xlu0 %v361_v38 }
 0x154   :  { %v324_v39 = vpop.xlane.xlu1 %323 }
 0x155   :  { %369 = vst.msk [vmem:[%s1290_s4 + $0x8] sm:$0xff] %vm367_vm2, %v324_v39  ;;  %v321_v35 = vpop.xlane.xlu0 %320 }
 0x156   :  { %368 = vst.msk [vmem:[%s1290_s4] sm:$0xff] %vm367_vm2, %v321_v35 }
 0x158   :  { %v330_v54 = vpop.xlane.xlu1 %329 }
 0x159   :  { %371 = vst.msk [vmem:[%s1290_s4 + $0x18] sm:$0xff] %vm367_vm2, %v330_v54  ;;  %v327_v10 = vpop.xlane.xlu0 %326 }
 0x15a   :  { %370 = vst.msk [vmem:[%s1290_s4 + $0x10] sm:$0xff] %vm367_vm2, %v327_v10 }
 0x15c   :  { %v336_v15 = vpop.xlane.xlu1 %335 }
 0x15d   :  { %373 = vst.msk [vmem:[%s1290_s4 + $0x28] sm:$0xff] %vm367_vm2, %v336_v15  ;;  %v333_v59 = vpop.xlane.xlu0 %332 }
 0x15e   :  { %372 = vst.msk [vmem:[%s1290_s4 + $0x20] sm:$0xff] %vm367_vm2, %v333_v59 }
 0x160   :  { %v342_v18 = vpop.xlane.xlu1 %341 }
 0x161   :  { %375 = vst.msk [vmem:[%s1290_s4 + $0x38] sm:$0xff] %vm367_vm2, %v342_v18  ;;  %v339_v6 = vpop.xlane.xlu0 %338 }
 0x162   :  { %374 = vst.msk [vmem:[%s1290_s4 + $0x30] sm:$0xff] %vm367_vm2, %v339_v6 }
 0x164   :  { %v348_v19 = vpop.xlane.xlu1 %347 }
 0x165   :  { %377 = vst.msk [vmem:[%s1290_s4 + $0x48] sm:$0xff] %vm367_vm2, %v348_v19  ;;  %v345_v46 = vpop.xlane.xlu0 %344 }
 0x166   :  { %376 = vst.msk [vmem:[%s1290_s4 + $0x40] sm:$0xff] %vm367_vm2, %v345_v46 }
 0x168   :  { %v354_v14 = vpop.xlane.xlu1 %353 }
 0x169   :  { %379 = vst.msk [vmem:[%s1290_s4 + $0x58] sm:$0xff] %vm367_vm2, %v354_v14  ;;  %v351_v24 = vpop.xlane.xlu0 %350 }
 0x16a   :  { %378 = vst.msk [vmem:[%s1290_s4 + $0x50] sm:$0xff] %vm367_vm2, %v351_v24 }
 0x16c   :  { %v360_v28 = vpop.xlane.xlu1 %359 }
 0x16d   :  { %381 = vst.msk [vmem:[%s1290_s4 + $0x68] sm:$0xff] %vm367_vm2, %v360_v28  ;;  %v357_v8 = vpop.xlane.xlu0 %356 }
 0x16e   :  { %380 = vst.msk [vmem:[%s1290_s4 + $0x60] sm:$0xff] %vm367_vm2, %v357_v8 }
 0x170   :  { %v366_v25 = vpop.xlane.xlu1 %365 }
 0x171   :  { %383 = vst.msk [vmem:[%s1290_s4 + $0x78] sm:$0xff] %vm367_vm2, %v366_v25  ;;  %v363_v3 = vpop.xlane.xlu0 %362 }
 0x172   :  { %382 = vst.msk [vmem:[%s1290_s4 + $0x70] sm:$0xff] %vm367_vm2, %v363_v3 }

// kernel: contrastive_da_loss_with_mi_forward.7
= control target key start
LH: loop header
LB: loop body
LE: loop exit
PB: predicated region body
PF: predicated region fallthrough
CT: control target
= control target key end

     0   :  { %vm18_vm0 = vcmask 130048   ;;  %vm14_vm1 = vcmask 122880   ;;  %v109_v14 = vmov 0.0   ;;  %vm57_vm2 = vcmask 7168   ;;  %s156_s0 = inlined_call_operand.vmem [shape: f32[16,16], index: 0, kind: input, shape index: {}]   ;;  %s157_s2 = inlined_call_operand.vmem [shape: f32[1,16], index: 2, kind: output, shape index: {1}]   ;;  %s158_s1 = inlined_call_operand.vmem [shape: f32[16,1], index: 1, kind: output, shape index: {0}]  }
   0x1   :  { %v16_v0 = vld [vmem:[%s156_s0] sm:$0xff]  ;;  %v17_v1 = vld [vmem:[%s156_s0 + $0x8] sm:$0xff]  ;;  %15 = vst.msk [vmem:[%s157_s2] sm:$0x1] %vm14_vm1, %v109_v14 }
   0x2   :  { %v19_v2 = vsel %vm18_vm0, %v16_v0, -inf  ;;  %v22_v3 = vsel %vm18_vm0, %v17_v1, -inf }
   0x3   :  { %20 = vmax.xlane.f32.xlu0 %v19_v2 }
   0x7   :  { %23 = vmax.xlane.f32.xlu0 %v22_v3 }
   0x8   :  { %v75_v39 = vld [vmem:[%s157_s2] sm:$0x1] }
  0x90   :  { %v21_v4 = vpop.xlane.xlu0 %20 }
  0x91   :  { %v25_v5 = vsub.f32 %v16_v0, %v21_v4 }
  0x93   :  { %v27_v6 = vmul.f32 1.442695, %v25_v5 }
  0x94   :  { %v24_v7 = vpop.xlane.xlu0 %23 }
  0x95   :  { %97 = vpow2.f32 %v27_v6  ;;  %v26_v8 = vsub.f32 %v17_v1, %v24_v7 }
  0x97   :  { %v29_v9 = vmul.f32 1.442695, %v26_v8 }
  0x99   :  { %99 = vpow2.f32 %v29_v9 }
  0x9f   :  { %v98_v10 = vpop.eup %97 }
  0xa0   :  { %v31_v11 = vsel %vm18_vm0, %v98_v10, 0.0 }
  0xa1   :  { %32 = vadd.xlane.f32.xlu1 %v31_v11 }
  0xa3   :  { %v100_v12 = vpop.eup %99 }
  0xa4   :  { %v34_v13 = vsel %vm18_vm0, %v100_v12, 0.0 }
  0xa5   :  { %35 = vadd.xlane.f32.xlu1 %v34_v13 }
 0x12e   :  { %v33_v15 = vpop.xlane.xlu1 %32 }
 0x12f   :  { %101 = vrcp.f32 %v33_v15 }
 0x130   :  { %103 = vlog2.f32 %v33_v15 }
 0x132   :  { %v36_v16 = vpop.xlane.xlu1 %35 }
 0x133   :  { %105 = vrcp.f32 %v36_v16 }
 0x134   :  { %107 = vlog2.f32 %v36_v16 }
 0x139   :  { %v102_v17 = vpop.eup %101 }
 0x13a   :  { %v104_v18 = vpop.eup %103  ;;  %v39_v20 = vmul.f32 %v102_v17, %v98_v10 }
 0x13b   :  { %v42_v19 = vmul.f32 0.6931472, %v104_v18 }
 0x13c   :  { %v76_v27 = vsel %vm18_vm0, %v39_v20, 0.0 }
 0x13d   :  { %v106_v21 = vpop.eup %105  ;;  %v45_v22 = vsub.f32 %v25_v5, %v42_v19 }
 0x13e   :  { %v108_v23 = vpop.eup %107  ;;  %v40_v24 = vmul.f32 %v106_v21, %v100_v12 }
 0x13f   :  { %v44_v25 = vmul.f32 0.6931472, %v108_v23  ;;  %v47_v26 = vmul.f32 %v45_v22, %v39_v20 }
 0x140   :  { %v77_v28 = vsel %vm18_vm0, %v40_v24, 0.0 }
 0x141   :  { %v49_v29 = vsel %vm18_vm0, %v47_v26, 0.0  ;;  %v46_v30 = vsub.f32 %v26_v8, %v44_v25  ;;  %v78_v31 = vadd.f32 %v77_v28, %v76_v27 }
 0x142   :  { %50 = vadd.xlane.f32.xlu0 %v49_v29 }
 0x143   :  { %v48_v32 = vmul.f32 %v46_v30, %v40_v24  ;;  %v79_v33 = vrot.slane %v78_v31, 4 }
 0x145   :  { %v52_v34 = vsel %vm18_vm0, %v48_v32, 0.0  ;;  %v80_v35 = vadd.f32 %v79_v33, %v78_v31 }
 0x146   :  { %53 = vadd.xlane.f32.xlu1 %v52_v34 }
 0x147   :  { %v81_v36 = vrot.slane %v80_v35, 2 }
 0x149   :  { %v82_v37 = vadd.f32 %v81_v36, %v80_v35 }
 0x14b   :  { %v83_v38 = vrot.slane %v82_v37, 1 }
 0x14d   :  { %v84_v40 = vadd.f32 %v83_v38, %v82_v37 }
 0x14f   :  { %v85_v41 = vadd.f32 %v84_v40, %v75_v39 }
 0x151   :  { %87 = vst.msk [vmem:[%s157_s2] sm:$0x1] %vm14_vm1, %v85_v41 }
 0x1cf   :  { %v51_v42 = vpop.xlane.xlu0 %50 }
 0x1d0   :  { %v55_v43 = vsub.f32 0.0, %v51_v42 }
 0x1d2   :  { %58 = vst.msk [vmem:[%s158_s1] sm:$0xff] %vm57_vm2, %v55_v43 }
 0x1d3   :  { %v54_v44 = vpop.xlane.xlu1 %53 }
 0x1d4   :  { %v56_v45 = vsub.f32 0.0, %v54_v44 }
 0x1d6   :  { %59 = vst.msk [vmem:[%s158_s1 + $0x8] sm:$0xff] %vm57_vm2, %v56_v45 }

// kernel: contrastive_da_loss_with_mi_forward.6
= control target key start
LH: loop header
LB: loop body
LE: loop exit
PB: predicated region body
PF: predicated region fallthrough
CT: control target
= control target key end

     0   :  { %s1971_s12 = smov 0   ;;  %s1973_s13 = smov 0   ;;  %s2880_s0 = inlined_call_operand.vmem [shape: bf16[256,32], index: 0, kind: input, shape index: {}, may-alias: {0,1}]   ;;  %s2881_s1 = inlined_call_operand.vmem [shape: bf16[256,32], index: 1, kind: input, shape index: {}, may-alias: {0,1}]   ;;  %s2882_s2 = inlined_call_operand.vmem [shape: f32[256,1], index: 2, kind: input, shape index: {}]   ;;  %s2883_s3 = inlined_call_operand.vmem [shape: f32[256,1], index: 3, kind: output, shape index: {}]  }
   0x1   :  { %s1975_s14 = smov 0   ;;  %s1977_s15 = smov 0  }
   0x2   :  { %s1979_s16 = smov 0  }
   0x3 LB: > { %s22_s17 = sadd.s32 1, %s1937_s14  ;;  %s25_s18 = sadd.s32 1, %s1941_s15  ;;  %s1945_s16 = sphi %s1979_s16, %s13_s16   ;;  %s1941_s15 = sphi %s1977_s15, %s2975_s15   ;;  %s1937_s14 = sphi %s1975_s14, %s2974_s14   ;;  %s1933_s13 = sphi %s1973_s13, %s2973_s13   ;;  %s1929_s12 = sphi %s1971_s12, %s2972_s12  }
   0x4   : > { %p23_p0 = scmp.ge.s32.totalorder %s22_s17, 2  ;;  %p1564_p1 = scmp.ge.s32.totalorder %s1945_s16, 1 }
   0x5   : > { %p172_p2 = scmp.lt.s32.totalorder %s1945_s16, 5 }
   0x6   : > { %s2977_s17 = smov (%p23_p0, %s22_s17), 0  ;;  %s2979_s18 = smov (!%p23_p0, %s25_s18), %s1941_s15 }
   0x7   : > { %p173_p3 = pnand %p1564_p1, %p172_p2  ;;  %p27_p4 = scmp.ge.s32.totalorder %s2979_s18, 2 }
   0x9   : > { %s2981_s18 = smov (%p27_p4, %s2979_s18), 0  ;;  %176 = sbr.rel (%p173_p3) target bundleno = 1303 (0x517), region = 32 }
  0x10   : > { %s1565_s19 = sshll.u32 %s1933_s13, 4  ;;  %s1567_s20 = sshll.u32 %s1929_s12, 4 }
  0x11   : > { %p207_p5 = scmp.lt.s32.totalorder %s1565_s19, 31  ;;  %p213_p6 = scmp.lt.s32.totalorder %s1567_s20, 31 }
  0x12   : > { %p1573_p7 = scmp.ne.s32.totalorder %s1929_s12, 0 }
  0x13   : > { %s2983_s19 = smov (!%p207_p5, %s1565_s19), 31  ;;  %s2985_s20 = smov (!%p213_p6, %s1567_s20), 31 }
  0x14   : > { %s1566_s21 = sshll.u32 %s2983_s19, 2  ;;  %s1570_s22 = sshll.u32 %s2983_s19, 3  ;;  %vm235_vm0 = vcmask (!%p1573_p7), 7168   ;;  %v1947_v0 = vmov (!%p1573_p7), -1e+30   ;;  %v1948_v1 = vmov (!%p1573_p7), 0.0  }
  0x15   : > { %s2010_s25 = scalar_lea.vmem %s2880_s0, %s1566_s21  ;;  %s1568_s26 = sshll.u32 %s2985_s20, 2  ;;  %236 = vst.msk [vmem:[#allocation2] sm:$0xff] (!%p1573_p7), %vm235_vm0, %v1947_v0  ;;  %237 = vst.msk [vmem:[#allocation2 + $0x8] sm:$0xff] (!%p1573_p7), %vm235_vm0, %v1947_v0 }
  0x16   : > { %s2015_s29 = scalar_lea.vmem %s2881_s1, %s1568_s26  ;;  %s2020_s5 = scalar_lea.vmem %s2882_s2, %s1570_s22  ;;  %238 = vst.msk [vmem:[#allocation2 + $0x10] sm:$0xff] (!%p1573_p7), %vm235_vm0, %v1947_v0  ;;  %239 = vst.msk [vmem:[#allocation2 + $0x18] sm:$0xff] (!%p1573_p7), %vm235_vm0, %v1947_v0 }
  0x17   : > { %s2025_s8 = scalar_lea.vmem %s2883_s3, %s1570_s22  ;;  %234 = sbr.rel (%p1573_p7) target bundleno = 37 (0x25), region = 36  ;;  %240 = vst.msk [vmem:[#allocation2 + $0x20] sm:$0xff] (!%p1573_p7), %vm235_vm0, %v1947_v0  ;;  %241 = vst.msk [vmem:[#allocation2 + $0x28] sm:$0xff] (!%p1573_p7), %vm235_vm0, %v1947_v0 }
  0x18   : > { %242 = vst.msk [vmem:[#allocation2 + $0x30] sm:$0xff] (!%p1573_p7), %vm235_vm0, %v1947_v0  ;;  %243 = vst.msk [vmem:[#allocation2 + $0x38] sm:$0xff] (!%p1573_p7), %vm235_vm0, %v1947_v0 }
  0x19   : > { %244 = vst.msk [vmem:[#allocation2 + $0x40] sm:$0xff] (!%p1573_p7), %vm235_vm0, %v1947_v0  ;;  %245 = vst.msk [vmem:[#allocation2 + $0x48] sm:$0xff] (!%p1573_p7), %vm235_vm0, %v1947_v0 }
  0x1a   : > { %246 = vst.msk [vmem:[#allocation2 + $0x50] sm:$0xff] (!%p1573_p7), %vm235_vm0, %v1947_v0  ;;  %247 = vst.msk [vmem:[#allocation2 + $0x58] sm:$0xff] (!%p1573_p7), %vm235_vm0, %v1947_v0 }
  0x1b   : > { %248 = vst.msk [vmem:[#allocation2 + $0x60] sm:$0xff] (!%p1573_p7), %vm235_vm0, %v1947_v0  ;;  %249 = vst.msk [vmem:[#allocation2 + $0x68] sm:$0xff] (!%p1573_p7), %vm235_vm0, %v1947_v0 }
  0x1c   : > { %250 = vst.msk [vmem:[#allocation2 + $0x70] sm:$0xff] (!%p1573_p7), %vm235_vm0, %v1947_v0  ;;  %251 = vst.msk [vmem:[#allocation2 + $0x78] sm:$0xff] (!%p1573_p7), %vm235_vm0, %v1947_v0 }
  0x1d   : > { %252 = vst.msk [vmem:[#allocation3] sm:$0xff] (!%p1573_p7), %vm235_vm0, %v1948_v1  ;;  %253 = vst.msk [vmem:[#allocation3 + $0x8] sm:$0xff] (!%p1573_p7), %vm235_vm0, %v1948_v1 }
  0x1e   : > { %254 = vst.msk [vmem:[#allocation3 + $0x10] sm:$0xff] %vm235_vm0, %v1948_v1  ;;  %255 = vst.msk [vmem:[#allocation3 + $0x18] sm:$0xff] %vm235_vm0, %v1948_v1 }
  0x1f   : > { %256 = vst.msk [vmem:[#allocation3 + $0x20] sm:$0xff] %vm235_vm0, %v1948_v1  ;;  %257 = vst.msk [vmem:[#allocation3 + $0x28] sm:$0xff] %vm235_vm0, %v1948_v1 }
  0x20   : > { %258 = vst.msk [vmem:[#allocation3 + $0x30] sm:$0xff] %vm235_vm0, %v1948_v1  ;;  %259 = vst.msk [vmem:[#allocation3 + $0x38] sm:$0xff] %vm235_vm0, %v1948_v1 }
  0x21   : > { %260 = vst.msk [vmem:[#allocation3 + $0x40] sm:$0xff] %vm235_vm0, %v1948_v1  ;;  %261 = vst.msk [vmem:[#allocation3 + $0x48] sm:$0xff] %vm235_vm0, %v1948_v1 }
  0x22   : > { %262 = vst.msk [vmem:[#allocation3 + $0x50] sm:$0xff] %vm235_vm0, %v1948_v1  ;;  %263 = vst.msk [vmem:[#allocation3 + $0x58] sm:$0xff] %vm235_vm0, %v1948_v1 }
  0x23   : > { %264 = vst.msk [vmem:[#allocation3 + $0x60] sm:$0xff] %vm235_vm0, %v1948_v1  ;;  %265 = vst.msk [vmem:[#allocation3 + $0x68] sm:$0xff] %vm235_vm0, %v1948_v1 }
  0x24   : > { %266 = vst.msk [vmem:[#allocation3 + $0x70] sm:$0xff] %vm235_vm0, %v1948_v1  ;;  %267 = vst.msk [vmem:[#allocation3 + $0x78] sm:$0xff] %vm235_vm0, %v1948_v1 }
  0x25 PF: > { %v1727_v2 = vld [vmem:[%s2015_s29] sm:$0xff]   ;;  %vm380_vm1 = vcmask 261120   ;;  %v1728_v3 = vld [vmem:[%s2015_s29 + $0x8] sm:$0xff]   ;;  %v1729_v5 = vld [vmem:[%s2015_s29 + $0x10] sm:$0xff]   ;;  %s1598_s9 = sshll.u32 %s1933_s13, 7  ;;  %s2110_s10 = sshll.u32 %s1929_s12, 7 }
  0x26   : > { %1667 = vmatprep.subr.msk.bf16.mxu0 %vm380_vm1, %v1727_v2  ;;  %1668 = vmatprep.subr.msk.bf16.mxu1 %vm380_vm1, %v1727_v2  ;;  %v406_v4 = vsel %vm380_vm1, %v1727_v2, 0  ;;  %v409_v6 = vsel %vm380_vm1, %v1728_v3, 0  ;;  %v1735_v7 = vld [vmem:[%s2010_s25] sm:$0xff]   ;;  %v412_v9 = vsel %vm380_vm1, %v1729_v5, 0  ;;  %v1730_v10 = vld [vmem:[%s2015_s29 + $0x18] sm:$0xff]   ;;  %v1732_v14 = vld [vmem:[%s2015_s29 + $0x28] sm:$0xff]  }
  0x27   : > { %1620 = vmatpush3.bf16.xpose.msra.mxu0 %v406_v4  ;;  %1659 = vmatpush3.bf16.xpose.msra.mxu1 %v406_v4  ;;  %v1736_v8 = vld [vmem:[%s2010_s25 + $0x20] sm:$0xff]   ;;  %v415_v11 = vsel %vm380_vm1, %v1730_v10, 0  ;;  %v421_v15 = vsel %vm380_vm1, %v1732_v14, 0  ;;  %v1733_v16 = vld [vmem:[%s2015_s29 + $0x30] sm:$0xff]   ;;  %v1734_v18 = vld [vmem:[%s2015_s29 + $0x38] sm:$0xff]   ;;  %s528_s11 = sadd.s32 128, %s2110_s10 }
  0x28   : > { %1669 = vmatprep.subr.msk.bf16.mxu0 %vm380_vm1, %v1728_v3  ;;  %1670 = vmatprep.subr.msk.bf16.mxu1 %vm380_vm1, %v1728_v3  ;;  %v1731_v12 = vld [vmem:[%s2015_s29 + $0x20] sm:$0xff]   ;;  %v424_v17 = vsel %vm380_vm1, %v1733_v16, 0  ;;  %v427_v19 = vsel %vm380_vm1, %v1734_v18, 0  ;;  %v1737_v20 = vld [vmem:[%s2010_s25 + $0x8] sm:$0xff]   ;;  %v1739_v22 = vld [vmem:[%s2010_s25 + $0x10] sm:$0xff]   ;;  %s530_s19 = sadd.s32 128, %s1598_s9  ;;  %p529_p8 = scmp.lt.s32.totalorder %s1598_s9, %s528_s11 }
  0x29   : > { %1635 = vmatprep.mubr.msk.bf16.mxu0 %vm380_vm1, %v1735_v7  ;;  %1643 = vmatprep.mubr.msk.bf16.mxu1 %vm380_vm1, %v1736_v8  ;;  %v418_v13 = vsel %vm380_vm1, %v1731_v12, 0  ;;  %v1738_v21 = vld [vmem:[%s2010_s25 + $0x28] sm:$0xff]   ;;  %v1740_v23 = vld [vmem:[%s2010_s25 + $0x30] sm:$0xff]   ;;  %v1741_v24 = vld [vmem:[%s2010_s25 + $0x18] sm:$0xff]   ;;  %p531_p9 = scmp.lt.s32.totalorder %s2110_s10, %s530_s19  ;;  %p2118_p12 = scmp.gt.s32.totalorder %s528_s11, 248 }
  0x2a   : > { %v1742_v25 = vld [vmem:[%s2010_s25 + $0x38] sm:$0xff]  }
  0x2b   : > { %p532_p10 = pnand %p531_p9, %p529_p8 }
  0x2d   : > { %p2114_p11 = pneg %p532_p10 }
  0x2f   : > { %1622 = vmatpush3.bf16.xpose.msra.mxu0 %v409_v6  ;;  %1660 = vmatpush3.bf16.xpose.msra.mxu1 %v409_v6  ;;  %p535_p13 = por %p2118_p12, %p2114_p11 }
  0x30   : > { %1671 = vmatprep.subr.msk.bf16.mxu0 %vm380_vm1, %v1729_v5  ;;  %1672 = vmatprep.subr.msk.bf16.mxu1 %vm380_vm1, %v1729_v5  ;;  %v539_v42 = vlaneseq (%p535_p13)  ;;  %v2163_v43 = vstv (%p535_p13), %s1598_s9  ;;  %v575_v44 = vstv (%p535_p13), %s2110_s10 }
  0x32   : > { %v2166_v45 = vshrl.u32 (%p535_p13), %v539_v42, 7  ;;  %v574_v46 = vand.u32 (%p535_p13), 127, %v539_v42 }
  0x34   : > { %v557_v47 = vadd.s32 (%p535_p13), %v2163_v43, %v2166_v45  ;;  %v2170_v48 = vadd.s32 (%p535_p13), %v575_v44, %v574_v46  ;;  %v542_v49 = vadd.s32 (%p535_p13), 16, %v2166_v45  ;;  %v541_v50 = vadd.s32 (%p535_p13), 8, %v2166_v45 }
  0x35   : > { %v543_v51 = vadd.s32 (%p535_p13), 24, %v2166_v45  ;;  %v545_v52 = vadd.s32 (%p535_p13), 40, %v2166_v45  ;;  %v547_v53 = vadd.s32 (%p535_p13), 56, %v2166_v45  ;;  %v544_v54 = vadd.s32 (%p535_p13), 32, %v2166_v45 }
  0x36   : > { %vm577_vm2 = vcmp.eq.s32.totalorder (%p535_p13), %v557_v47, %v2170_v48  ;;  %vm593_vm3 = vcmp.ge.s32.totalorder (%p535_p13), %v2170_v48, 248  ;;  %v559_v55 = vadd.s32 (%p535_p13), %v2163_v43, %v542_v49  ;;  %v558_v56 = vadd.s32 (%p535_p13), %v2163_v43, %v541_v50  ;;  %v2315_v49 = vld [vmem:[#allocation2] sm:$0xff] (%p535_p13) }
  0x37   : > { %1624 = vmatpush3.bf16.xpose.msra.mxu0 %v412_v9  ;;  %1661 = vmatpush3.bf16.xpose.msra.mxu1 %v412_v9  ;;  %vm594_vm4 = vmor (%p535_p13), %vm577_vm2, %vm593_vm3  ;;  %v560_v57 = vadd.s32 (%p535_p13), %v2163_v43, %v543_v51  ;;  %v562_v58 = vadd.s32 (%p535_p13), %v2163_v43, %v545_v52  ;;  %v561_v59 = vadd.s32 (%p535_p13), %v2163_v43, %v544_v54  ;;  %v549_v63 = vadd.s32 (%p535_p13), 72, %v2166_v45  ;;  %v2438_v54 = vld [vmem:[#allocation2 + $0x70] sm:$0xff] (%p535_p13) }
  0x38   : > { %1673 = vmatprep.subr.msk.bf16.mxu0 %vm380_vm1, %v1730_v10  ;;  %1674 = vmatprep.subr.msk.bf16.mxu1 %vm380_vm1, %v1730_v10  ;;  %vm579_vm5 = vcmp.eq.s32.totalorder (%p535_p13), %v559_v55, %v2170_v48  ;;  %vm578_vm6 = vcmp.eq.s32.totalorder (%p535_p13), %v558_v56, %v2170_v48  ;;  %v564_v61 = vadd.s32 (%p535_p13), %v2163_v43, %v547_v53  ;;  %v546_v0 = vadd.s32 (%p535_p13), 48, %v2166_v45  ;;  %v2322_v53 = vld [vmem:[#allocation2 + $0x8] sm:$0xff] (%p535_p13) }
  0x39   : > { %vm596_vm7 = vmor (%p535_p13), %vm579_vm5, %vm593_vm3  ;;  %vm580_vm8 = vcmp.eq.s32.totalorder (%p535_p13), %v560_v57, %v2170_v48  ;;  %vm582_vm10 = vcmp.eq.s32.totalorder (%p535_p13), %v562_v58, %v2170_v48  ;;  %vm581_vm12 = vcmp.eq.s32.totalorder (%p535_p13), %v561_v59, %v2170_v48  ;;  %v548_v2 = vadd.s32 (%p535_p13), 64, %v2166_v45  ;;  %v2332_v57 = vld [vmem:[#allocation2 + $0x18] sm:$0xff] (%p535_p13) }
  0x3a   : > { %vm595_vm9 = vmor (%p535_p13), %vm578_vm6, %vm593_vm3  ;;  %v563_v4 = vadd.s32 (%p535_p13), %v2163_v43, %v546_v0  ;;  %vm584_vm14 = vcmp.eq.s32.totalorder (%p535_p13), %v564_v61, %v2170_v48  ;;  %v566_v6 = vadd.s32 (%p535_p13), %v2163_v43, %v549_v63  ;;  %v551_v7 = vadd.s32 (%p535_p13), 88, %v2166_v45  ;;  %v2341_v63 = vld [vmem:[#allocation2 + $0x20] sm:$0xff] (%p535_p13) }
  0x3b   : > { %vm597_vm11 = vmor (%p535_p13), %vm580_vm8, %vm593_vm3  ;;  %v565_v5 = vadd.s32 (%p535_p13), %v2163_v43, %v548_v2  ;;  %v550_v8 = vadd.s32 (%p535_p13), 80, %v2166_v45 }
  0x3c   : > { %vm599_vm13 = vmor (%p535_p13), %vm582_vm10, %vm593_vm3  ;;  %vm583_vm0 = vcmp.eq.s32.totalorder (%p535_p13), %v563_v4, %v2170_v48  ;;  %vm586_vm5 = vcmp.eq.s32.totalorder (%p535_p13), %v566_v6, %v2170_v48  ;;  %v2351_v4 = vld [vmem:[#allocation2 + $0x28] sm:$0xff] (%p535_p13) }
  0x3d   : > { %vm598_vm15 = vmor (%p535_p13), %vm581_vm12, %vm593_vm3 }
  0x3e   : > { %vm600_vm2 = vmor (%p535_p13), %vm583_vm0, %vm593_vm3 }
  0x3f   : > { %1626 = vmatpush3.bf16.xpose.msra.mxu0 %v415_v11  ;;  %1662 = vmatpush3.bf16.xpose.msra.mxu1 %v415_v11  ;;  %v567_v11 = vadd.s32 (%p535_p13), %v2163_v43, %v550_v8  ;;  %vm603_vm8 = vmor (%p535_p13), %vm586_vm5, %vm593_vm3  ;;  %vm946_vm5 = vcmask (%p535_p13), 7168  }
  0x40   : > { %1675 = vmatprep.subr.msk.bf16.mxu0 %vm380_vm1, %v1731_v12  ;;  %1676 = vmatprep.subr.msk.bf16.mxu1 %vm380_vm1, %v1731_v12  ;;  %v552_v12 = vadd.s32 (%p535_p13), 96, %v2166_v45 }
  0x47   : > { %1628 = vmatpush3.bf16.xpose.msra.mxu0 %v418_v13  ;;  %1663 = vmatpush3.bf16.xpose.msra.mxu1 %v418_v13  ;;  %v568_v13 = vadd.s32 (%p535_p13), %v2163_v43, %v551_v7 }
  0x48   : > { %1677 = vmatprep.subr.msk.bf16.mxu0 %vm380_vm1, %v1732_v14  ;;  %1678 = vmatprep.subr.msk.bf16.mxu1 %vm380_vm1, %v1732_v14 }
  0x4f   : > { %1630 = vmatpush3.bf16.xpose.msra.mxu0 %v421_v15  ;;  %1664 = vmatpush3.bf16.xpose.msra.mxu1 %v421_v15  ;;  %v553_v15 = vadd.s32 (%p535_p13), 104, %v2166_v45 }
  0x50   : > { %1679 = vmatprep.subr.msk.bf16.mxu0 %vm380_vm1, %v1733_v16  ;;  %1680 = vmatprep.subr.msk.bf16.mxu1 %vm380_vm1, %v1733_v16 }
  0x57   : > { %1632 = vmatpush3.bf16.xpose.msra.mxu0 %v424_v17  ;;  %1665 = vmatpush3.bf16.xpose.msra.mxu1 %v424_v17  ;;  %v569_v17 = vadd.s32 (%p535_p13), %v2163_v43, %v552_v12 }
  0x58   : > { %1681 = vmatprep.subr.msk.bf16.mxu0 %vm380_vm1, %v1734_v18  ;;  %1682 = vmatprep.subr.msk.bf16.mxu1 %vm380_vm1, %v1734_v18  ;;  %v554_v18 = vadd.s32 (%p535_p13), 112, %v2166_v45 }
  0x5f   : > { %1634 = vmatpush3.bf16.xpose.msra.mxu0 %v427_v19  ;;  %1666 = vmatpush3.bf16.xpose.msra.mxu1 %v427_v19  ;;  %v570_v19 = vadd.s32 (%p535_p13), %v2163_v43, %v553_v15  ;;  %v2370_v15 = vld [vmem:[#allocation2 + $0x38] sm:$0xff] (%p535_p13) }
  0x66   : > { %1636 = vmatmul.mubr.msk.bf16.vlgmr.msra.gmra.mrb[0].mxu0 %vm380_vm1, %v1737_v20  ;;  %1644 = vmatmul.mubr.msk.bf16.vlgmr.msra.gmra.mrb[0].mxu1 %vm380_vm1, %v1738_v21  ;;  %v555_v20 = vadd.s32 (%p535_p13), 120, %v2166_v45 }
  0x67   : > { %1639 = vmatprep.mubr.msk.bf16.mxu0 %vm380_vm1, %v1739_v22  ;;  %1647 = vmatprep.mubr.msk.bf16.mxu1 %vm380_vm1, %v1740_v23  ;;  %v571_v23 = vadd.s32 (%p535_p13), %v2163_v43, %v554_v18 }
  0x6e   : > { %1640 = vmatmul.mubr.msk.bf16.gmra.mrb[4].mxu0 %vm380_vm1, %v1741_v24  ;;  %1648 = vmatmul.mubr.msk.bf16.gmra.mrb[4].mxu1 %vm380_vm1, %v1742_v25  ;;  %vm601_vm1 = vmor (%p535_p13), %vm584_vm14, %vm593_vm3  ;;  %v1949_v24 = vmov (%p535_p13), 0   ;;  %v572_v25 = vadd.s32 (%p535_p13), %v2163_v43, %v555_v20 }
  0x6f   : > { %1743 = vset.pattern.permute.xlu0 (%p535_p13), %v1949_v24  ;;  %1744 = vset.pattern.permute.xlu1 (%p535_p13), %v1949_v24 }
 0x139   : > { %v2126_v26 = vpop.f32.mrb[0].mxu0  ;;  %v2128_v27 = vpop.f32.mrb[0].mxu1 }
 0x13a   : > { %2914 = vst [vmem:[#allocation4_spill] sm:$0xff] %v2128_v27  ;;  %v2130_v28 = vpop.f32.mrb[1].mxu0  ;;  %v2132_v29 = vpop.f32.mrb[1].mxu1  ;;  %v2198_v62 = vsel (%p535_p13), %vm596_vm7, -1e+30, %v2126_v26  ;;  %vm587_vm7 = vcmp.eq.s32.totalorder (%p535_p13), %v567_v11, %v2170_v48  ;;  %v2360_v11 = vld [vmem:[#allocation2 + $0x30] sm:$0xff] (%p535_p13) }
 0x13b   : > { %2915 = vst [vmem:[#allocation5_spill] sm:$0xff] %v2132_v29  ;;  %v2134_v30 = vpop.f32.mrb[2].mxu0  ;;  %v2136_v31 = vpop.f32.mrb[2].mxu1  ;;  %v2188_v60 = vsel (%p535_p13), %vm594_vm4, -1e+30, %v2130_v28  ;;  %646 = vmax.xlane.f32.xlu1 (%p535_p13), %v2198_v62  ;;  %vm585_vm4 = vcmp.eq.s32.totalorder (%p535_p13), %v565_v5, %v2170_v48  ;;  %vm604_vm10 = vmor (%p535_p13), %vm587_vm7, %vm593_vm3 }
 0x13c   : > { %2916 = vst [vmem:[#allocation6_spill] sm:$0xff] %v2134_v30  ;;  %2917 = vst [vmem:[#allocation7_spill] sm:$0xff] %v2136_v31  ;;  %v2138_v32 = vpop.f32.mrb[3].mxu0  ;;  %v2140_v33 = vpop.f32.mrb[3].mxu1  ;;  %642 = vmax.xlane.f32.xlu0 (%p535_p13), %v2188_v60  ;;  %v2214_v3 = vsel (%p535_p13), %vm597_vm11, -1e+30, %v2134_v30  ;;  %vm589_vm11 = vcmp.eq.s32.totalorder (%p535_p13), %v569_v17, %v2170_v48 }
 0x13d   : > { %2918 = vst [vmem:[#allocation8_spill] sm:$0xff] %v2138_v32  ;;  %2919 = vst [vmem:[#allocation9_spill] sm:$0xff] %v2140_v33  ;;  %v2207_v1 = vsel (%p535_p13), %vm595_vm9, -1e+30, %v2138_v32  ;;  %vm588_vm9 = vcmp.eq.s32.totalorder (%p535_p13), %v568_v13, %v2170_v48  ;;  %v2271_v22 = vsel (%p535_p13), %vm603_vm8, -1e+30, %v2140_v33 }
 0x13e   : > { %vm602_vm6 = vmor (%p535_p13), %vm585_vm4, %vm593_vm3  ;;  %v2281_v42 = vsel (%p535_p13), %vm604_vm10, -1e+30, %v2128_v27  ;;  %v2418_v13 = vld [vmem:[#allocation2 + $0x60] sm:$0xff] (%p535_p13) }
 0x13f   : > { %538 = sbr.rel (!%p535_p13) target bundleno = 792 (0x318), region = 40  ;;  %648 = vmax.xlane.f32.xlu1 (%p535_p13), %v2214_v3  ;;  %v2265_v21 = vsel (%p535_p13), %vm602_vm6, -1e+30, %v2132_v29  ;;  %vm605_vm12 = vmor (%p535_p13), %vm588_vm9, %vm593_vm3 }
 0x140   : > { %644 = vmax.xlane.f32.xlu0 (%p535_p13), %v2207_v1  ;;  %vm606_vm14 = vmor (%p535_p13), %vm589_vm11, %vm593_vm3  ;;  %v2287_v44 = vsel (%p535_p13), %vm605_vm12, -1e+30, %v2136_v31 }
 0x141   : > { %v2142_v34 = vpop.f32.mrb[4].mxu0  ;;  %v2144_v35 = vpop.f32.mrb[4].mxu1 }
 0x142   : > { %2920 = vst [vmem:[#allocation10_spill] sm:$0xff] %v2142_v34  ;;  %2921 = vst [vmem:[#allocation11_spill] sm:$0xff] %v2144_v35  ;;  %v2146_v36 = vpop.f32.mrb[5].mxu0  ;;  %v2148_v37 = vpop.f32.mrb[5].mxu1  ;;  %v2246_v14 = vsel (%p535_p13), %vm600_vm2, -1e+30, %v2142_v34 }
 0x143   : > { %2922 = vst [vmem:[#allocation12_spill] sm:$0xff] %v2146_v36  ;;  %2923 = vst [vmem:[#allocation13_spill] sm:$0xff] %v2148_v37  ;;  %v2150_v38 = vpop.f32.mrb[6].mxu0  ;;  %v2152_v39 = vpop.f32.mrb[6].mxu1  ;;  %v2230_v9 = vsel (%p535_p13), %vm598_vm15, -1e+30, %v2146_v36  ;;  %vm591_vm15 = vcmp.eq.s32.totalorder (%p535_p13), %v571_v23, %v2170_v48 }
 0x144   : > { %2924 = vst [vmem:[#allocation14_spill] sm:$0xff] %v2150_v38  ;;  %2925 = vst [vmem:[#allocation15_spill] sm:$0xff] %v2152_v39  ;;  %v2154_v40 = vpop.f32.mrb[7].mxu0  ;;  %v2156_v41 = vpop.f32.mrb[7].mxu1  ;;  %650 = vmax.xlane.f32.xlu0 (%p535_p13), %v2230_v9  ;;  %v2251_v16 = vsel (%p535_p13), %vm601_vm1, -1e+30, %v2150_v38  ;;  %vm592_vm1 = vcmp.eq.s32.totalorder (%p535_p13), %v572_v25, %v2170_v48 }
 0x145   : > { %2926 = vst [vmem:[#allocation16_spill] sm:$0xff] %v2154_v40  ;;  %2927 = vst [vmem:[#allocation17_spill] sm:$0xff] %v2156_v41  ;;  %v2233_v10 = vsel (%p535_p13), %vm599_vm13, -1e+30, %v2154_v40  ;;  %vm590_vm13 = vcmp.eq.s32.totalorder (%p535_p13), %v570_v19, %v2170_v48  ;;  %v2295_v43 = vsel (%p535_p13), %vm606_vm14, -1e+30, %v2148_v37 }
 0x146   : > { %652 = vmax.xlane.f32.xlu1 %v2233_v10  ;;  %vm607_vm0 = vmor %vm590_vm13, %vm593_vm3  ;;  %v2317_v48 = vld [vmem:[#allocation2 + $0x10] sm:$0xff]  ;;  %v2379_v23 = vld [vmem:[#allocation2 + $0x40] sm:$0xff] }
 0x147   : > { %vm608_vm2 = vmor %vm591_vm15, %vm593_vm3  ;;  %v2301_v45 = vsel %vm607_vm0, -1e+30, %v2156_v41 }
 0x148   : > { %654 = vmax.xlane.f32.xlu0 %v2246_v14  ;;  %vm609_vm4 = vmor %vm592_vm1, %vm593_vm3  ;;  %v2307_v46 = vsel %vm608_vm2, -1e+30, %v2144_v35 }
 0x149   : > { %v2311_v47 = vsel %vm609_vm4, -1e+30, %v2152_v39 }
 0x14a   : > { %656 = vmax.xlane.f32.xlu1 %v2251_v16 }
 0x14c   : > { %658 = vmax.xlane.f32.xlu0 %v2265_v21 }
 0x14e   : > { %660 = vmax.xlane.f32.xlu1 %v2271_v22 }
 0x150   : > { %662 = vmax.xlane.f32.xlu0 %v2281_v42 }
 0x152   : > { %664 = vmax.xlane.f32.xlu1 %v2287_v44 }
 0x154   : > { %666 = vmax.xlane.f32.xlu0 %v2295_v43 }
 0x156   : > { %668 = vmax.xlane.f32.xlu1 %v2301_v45 }
 0x158   : > { %670 = vmax.xlane.f32.xlu0 %v2307_v46 }
 0x15a   : > { %672 = vmax.xlane.f32.xlu1 %v2311_v47 }
 0x1c8   : > { %v647_v52 = vpop.xlane.xlu1 %646 }
 0x1c9   : > { %v643_v50 = vpop.xlane.xlu0 %642  ;;  %v2329_v55 = vmax.f32 %v2317_v48, %v647_v52 }
 0x1ca   : > { %v2320_v51 = vmax.f32 %v2315_v49, %v643_v50  ;;  %v2389_v50 = vld [vmem:[#allocation2 + $0x48] sm:$0xff] }
 0x1cb   : > { %965 = vst.msk [vmem:[#allocation2 + $0x10] sm:$0xff] %vm946_vm5, %v2329_v55 }
 0x1cc   : > { %963 = vst.msk [vmem:[#allocation2] sm:$0xff] %vm946_vm5, %v2320_v51  ;;  %772 = vperm.xlu0 %1743, %v2320_v51   ;;  %v649_v61 = vpop.xlane.xlu1 %648 }
 0x1cd   : > { %v645_v56 = vpop.xlane.xlu0 %644  ;;  %v2348_v2 = vmax.f32 %v2332_v57, %v649_v61 }
 0x1ce   : > { %v2339_v59 = vmax.f32 %v2322_v53, %v645_v56  ;;  %v2408_v56 = vld [vmem:[#allocation2 + $0x58] sm:$0xff] }
 0x1cf   : > { %966 = vst.msk [vmem:[#allocation2 + $0x18] sm:$0xff] %vm946_vm5, %v2348_v2 }
 0x1d0   : > { %964 = vst.msk [vmem:[#allocation2 + $0x8] sm:$0xff] %vm946_vm5, %v2339_v59  ;;  %777 = vperm.xlu1 %1744, %v2339_v59  }
 0x1d1   : > { %v651_v5 = vpop.xlane.xlu0 %650 }
 0x1d2   : > { %v2358_v7 = vmax.f32 %v2341_v63, %v651_v5 }
 0x1d3   : > { %v653_v8 = vpop.xlane.xlu1 %652 }
 0x1d4   : > { %v2363_v12 = vmax.f32 %v2351_v4, %v653_v8  ;;  %782 = vperm.xlu1 %1744, %v2329_v55   ;;  %967 = vst.msk [vmem:[#allocation2 + $0x20] sm:$0xff] %vm946_vm5, %v2358_v7  ;;  %v2398_v8 = vld [vmem:[#allocation2 + $0x50] sm:$0xff] }
 0x1d5   : > { %v655_v17 = vpop.xlane.xlu0 %654 }
 0x1d6   : > { %968 = vst.msk [vmem:[#allocation2 + $0x28] sm:$0xff] %vm946_vm5, %v2363_v12  ;;  %v2377_v19 = vmax.f32 %v2360_v11, %v655_v17 }
 0x1d7   : > { %v657_v20 = vpop.xlane.xlu1 %656 }
 0x1d8   : > { %v2382_v24 = vmax.f32 %v2370_v15, %v657_v20  ;;  %787 = vperm.xlu1 %1744, %v2348_v2   ;;  %969 = vst.msk [vmem:[#allocation2 + $0x30] sm:$0xff] %vm946_vm5, %v2377_v19 }
 0x1d9   : > { %v659_v52 = vpop.xlane.xlu0 %658 }
 0x1da   : > { %970 = vst.msk [vmem:[#allocation2 + $0x38] sm:$0xff] %vm946_vm5, %v2382_v24  ;;  %v2396_v61 = vmax.f32 %v2379_v23, %v659_v52  ;;  %v2428_v52 = vld [vmem:[#allocation2 + $0x68] sm:$0xff] }
 0x1db   : > { %v661_v5 = vpop.xlane.xlu1 %660 }
 0x1dc   : > { %v2401_v17 = vmax.f32 %v2389_v50, %v661_v5  ;;  %792 = vperm.xlu1 %1744, %v2358_v7   ;;  %971 = vst.msk [vmem:[#allocation2 + $0x40] sm:$0xff] %vm946_vm5, %v2396_v61 }
 0x1dd   : > { %v663_v25 = vpop.xlane.xlu0 %662 }
 0x1de   : > { %972 = vst.msk [vmem:[#allocation2 + $0x48] sm:$0xff] %vm946_vm5, %v2401_v17  ;;  %817 = vperm.xlu0 %1743, %v2401_v17   ;;  %v2416_v5 = vmax.f32 %v2398_v8, %v663_v25  ;;  %v2448_v25 = vld [vmem:[#allocation2 + $0x78] sm:$0xff] }
 0x1df   : > { %v665_v18 = vpop.xlane.xlu1 %664 }
 0x1e0   : > { %v2421_v20 = vmax.f32 %v2408_v56, %v665_v18  ;;  %797 = vperm.xlu1 %1744, %v2363_v12   ;;  %973 = vst.msk [vmem:[#allocation2 + $0x50] sm:$0xff] %vm946_vm5, %v2416_v5 }
 0x1e1   : > { %v667_v58 = vpop.xlane.xlu0 %666 }
 0x1e2   : > { %974 = vst.msk [vmem:[#allocation2 + $0x58] sm:$0xff] %vm946_vm5, %v2421_v20  ;;  %827 = vperm.xlu0 %1743, %v2421_v20   ;;  %v2436_v18 = vmax.f32 %v2418_v13, %v667_v58 }
 0x1e3   : > { %v669_v0 = vpop.xlane.xlu1 %668 }
 0x1e4   : > { %v2441_v6 = vmax.f32 %v2428_v52, %v669_v0  ;;  %802 = vperm.xlu1 %1744, %v2377_v19   ;;  %975 = vst.msk [vmem:[#allocation2 + $0x60] sm:$0xff] %vm946_vm5, %v2436_v18 }
 0x1e5   : > { %v671_v39 = vpop.xlane.xlu0 %670 }
 0x1e6   : > { %976 = vst.msk [vmem:[#allocation2 + $0x68] sm:$0xff] %vm946_vm5, %v2441_v6  ;;  %837 = vperm.xlu0 %1743, %v2441_v6   ;;  %v2456_v0 = vmax.f32 %v2438_v54, %v671_v39 }
 0x1e7   : > { %v673_v37 = vpop.xlane.xlu1 %672 }
 0x1e8   : > { %v2459_v35 = vmax.f32 %v2448_v25, %v673_v37  ;;  %807 = vperm.xlu1 %1744, %v2382_v24   ;;  %977 = vst.msk [vmem:[#allocation2 + $0x70] sm:$0xff] %vm946_vm5, %v2456_v0 }
 0x1ea   : > { %978 = vst.msk [vmem:[#allocation2 + $0x78] sm:$0xff] %vm946_vm5, %v2459_v35  ;;  %847 = vperm.xlu0 %1743, %v2459_v35  }
 0x1ec   : > { %812 = vperm.xlu1 %1744, %v2396_v61  }
 0x1f0   : > { %822 = vperm.xlu1 %1744, %v2416_v5  }
 0x1f4   : > { %832 = vperm.xlu1 %1744, %v2436_v18  }
 0x1f8   : > { %842 = vperm.xlu1 %1744, %v2456_v0  }
 0x24b   : > { %v773_v37 = vpop.permute.xlu0 %772 }
 0x24c   : > { %v850_v39 = vsub.f32 %v2188_v60, %v773_v37 }
 0x24e   : > { %v866_v41 = vmul.f32 1.442695, %v850_v39 }
 0x24f   : > { %v778_v27 = vpop.permute.xlu1 %777 }
 0x250   : > { %1745 = vpow2.f32 %v866_v41  ;;  %v851_v58 = vsub.f32 %v2207_v1, %v778_v27 }
 0x252   : > { %v868_v31 = vmul.f32 1.442695, %v851_v58 }
 0x253   : > { %v783_v29 = vpop.permute.xlu1 %782 }
 0x254   : > { %1747 = vpow2.f32 %v868_v31  ;;  %v852_v33 = vsub.f32 %v2198_v62, %v783_v29 }
 0x256   : > { %v870_v34 = vmul.f32 1.442695, %v852_v33 }
 0x257   : > { %v788_v38 = vpop.permute.xlu1 %787 }
 0x258   : > { %1749 = vpow2.f32 %v870_v34  ;;  %v853_v36 = vsub.f32 %v2214_v3, %v788_v38 }
 0x25a   : > { %v1746_v40 = vpop.eup %1745  ;;  %v872_v32 = vmul.f32 1.442695, %v853_v36 }
 0x25b   : > { %v793_v30 = vpop.permute.xlu1 %792  ;;  %898 = vadd.xlane.f32.xlu1 %v1746_v40 }
 0x25c   : > { %1751 = vpow2.f32 %v872_v32  ;;  %v854_v60 = vsub.f32 %v2230_v9, %v793_v30 }
 0x25d   : > { %v818_v27 = vpop.permute.xlu0 %817 }
 0x25e   : > { %v1748_v41 = vpop.eup %1747  ;;  %v874_v37 = vmul.f32 1.442695, %v854_v60  ;;  %v859_v30 = vsub.f32 %v2271_v22, %v818_v27 }
 0x25f   : > { %900 = vadd.xlane.f32.xlu0 %v1748_v41  ;;  %v798_v1 = vpop.permute.xlu1 %797 }
 0x260   : > { %1753 = vpow2.f32 %v874_v37  ;;  %v855_v29 = vsub.f32 %v2233_v10, %v798_v1  ;;  %v884_v39 = vmul.f32 1.442695, %v859_v30 }
 0x261   : > { %v828_v38 = vpop.permute.xlu0 %827 }
 0x262   : > { %v1750_v31 = vpop.eup %1749  ;;  %v876_v33 = vmul.f32 1.442695, %v855_v29  ;;  %v861_v60 = vsub.f32 %v2287_v44, %v828_v38 }
 0x263   : > { %902 = vadd.xlane.f32.xlu0 %v1750_v31  ;;  %v803_v34 = vpop.permute.xlu1 %802 }
 0x264   : > { %1755 = vpow2.f32 %v876_v33  ;;  %v856_v36 = vsub.f32 %v2246_v14, %v803_v34  ;;  %v888_v22 = vmul.f32 1.442695, %v861_v60 }
 0x265   : > { %v838_v58 = vpop.permute.xlu0 %837 }
 0x266   : > { %v1752_v40 = vpop.eup %1751  ;;  %v878_v32 = vmul.f32 1.442695, %v856_v36  ;;  %v863_v27 = vsub.f32 %v2301_v45, %v838_v58 }
 0x267   : > { %v808_v62 = vpop.permute.xlu1 %807  ;;  %904 = vadd.xlane.f32.xlu1 %v1752_v40 }
 0x268   : > { %1757 = vpow2.f32 %v878_v32  ;;  %v857_v3 = vsub.f32 %v2251_v16, %v808_v62  ;;  %v892_v44 = vmul.f32 1.442695, %v863_v27  ;;  %v2931_v27 = vsub.f32 %v2332_v57, %v2348_v2 }
 0x269   : > { %v848_v16 = vpop.permute.xlu0 %847 }
 0x26a   : > { %v1754_v9 = vpop.eup %1753  ;;  %v880_v10 = vmul.f32 1.442695, %v857_v3  ;;  %v865_v38 = vsub.f32 %v2311_v47, %v848_v16 }
 0x26b   : > { %906 = vadd.xlane.f32.xlu0 %v1754_v9  ;;  %v813_v41 = vpop.permute.xlu1 %812 }
 0x26c   : > { %1759 = vpow2.f32 %v880_v10  ;;  %v858_v14 = vsub.f32 %v2265_v21, %v813_v41  ;;  %v896_v45 = vmul.f32 1.442695, %v865_v38 }
 0x26d   : > { %1761 = vpow2.f32 %v884_v39 }
 0x26e   : > { %v1756_v37 = vpop.eup %1755  ;;  %v882_v1 = vmul.f32 1.442695, %v858_v14  ;;  %v2929_v14 = vsub.f32 %v2322_v53, %v2339_v59 }
 0x26f   : > { %v823_v29 = vpop.permute.xlu1 %822  ;;  %908 = vadd.xlane.f32.xlu1 %v1756_v37 }
 0x270   : > { %1763 = vpow2.f32 %v882_v1  ;;  %v860_v31 = vsub.f32 %v2281_v42, %v823_v29  ;;  %v708_v37 = vmul.f32 1.442695, %v2929_v14  ;;  %v2930_v1 = vsub.f32 %v2317_v48, %v2329_v55 }
 0x271   : > { %1765 = vpow2.f32 %v888_v22  ;;  %v712_v29 = vmul.f32 1.442695, %v2931_v27  ;;  %v2933_v48 = vsub.f32 %v2351_v4, %v2363_v12  ;;  %v741_v4 = vld [vmem:[#allocation3 + $0x18] sm:$0xff] }
 0x272   : > { %v1758_v33 = vpop.eup %1757  ;;  %v886_v34 = vmul.f32 1.442695, %v860_v31  ;;  %v710_v22 = vmul.f32 1.442695, %v2930_v1  ;;  %v738_v31 = vld [vmem:[#allocation3] sm:$0xff]  ;;  %v744_v1 = vld [vmem:[#allocation3 + $0x30] sm:$0xff] }
 0x273   : > { %910 = vadd.xlane.f32.xlu0 %v1758_v33  ;;  %v833_v21 = vpop.permute.xlu1 %832  ;;  %v716_v55 = vmul.f32 1.442695, %v2933_v48 }
 0x274   : > { %1767 = vpow2.f32 %v886_v34  ;;  %v862_v36 = vsub.f32 %v2295_v43, %v833_v21  ;;  %v739_v34 = vld [vmem:[#allocation3 + $0x8] sm:$0xff]  ;;  %v740_v21 = vld [vmem:[#allocation3 + $0x10] sm:$0xff] }
 0x275   : > { %1769 = vpow2.f32 %v892_v44 }
 0x276   : > { %v1760_v40 = vpop.eup %1759  ;;  %v890_v32 = vmul.f32 1.442695, %v862_v36 }
 0x277   : > { %v843_v30 = vpop.permute.xlu1 %842  ;;  %912 = vadd.xlane.f32.xlu1 %v1760_v40  ;;  %v1762_v62 = vpop.eup %1761 }
 0x278   : > { %1771 = vpow2.f32 %v890_v32  ;;  %v864_v42 = vsub.f32 %v2307_v46, %v843_v30  ;;  %v2928_v46 = vsub.f32 %v2315_v49, %v2320_v51  ;;  %v2932_v49 = vsub.f32 %v2341_v63, %v2358_v7 }
 0x279   : > { %1773 = vpow2.f32 %v896_v45  ;;  %v2934_v63 = vsub.f32 %v2360_v11, %v2377_v19  ;;  %v2935_v30 = vsub.f32 %v2370_v15, %v2382_v24  ;;  %v2936_v11 = vsub.f32 %v2379_v23, %v2396_v61 }
 0x27a   : > { %v1764_v3 = vpop.eup %1763  ;;  %v894_v9 = vmul.f32 1.442695, %v864_v42  ;;  %v706_v41 = vmul.f32 1.442695, %v2928_v46  ;;  %v714_v51 = vmul.f32 1.442695, %v2932_v49  ;;  %v2938_v46 = vsub.f32 %v2398_v8, %v2416_v5 }
 0x27b   : > { %914 = vadd.xlane.f32.xlu0 %v1764_v3  ;;  %916 = vadd.xlane.f32.xlu1 %v1762_v62  ;;  %v1766_v47 = vpop.eup %1765  ;;  %v718_v7 = vmul.f32 1.442695, %v2934_v63  ;;  %v720_v42 = vmul.f32 1.442695, %v2935_v30  ;;  %v722_v19 = vmul.f32 1.442695, %v2936_v11  ;;  %v2939_v23 = vsub.f32 %v2408_v56, %v2421_v20 }
 0x27c   : > { %1775 = vpow2.f32 %v894_v9  ;;  %v2941_v8 = vsub.f32 %v2428_v52, %v2441_v6  ;;  %v2942_v49 = vsub.f32 %v2438_v54, %v2456_v0  ;;  %v750_v30 = vld [vmem:[#allocation3 + $0x60] sm:$0xff] }
 0x27d   : > { %1777 = vpow2.f32 %v706_v41  ;;  %v726_v41 = vmul.f32 1.442695, %v2938_v46  ;;  %v728_v61 = vmul.f32 1.442695, %v2939_v23 }
 0x27e   : > { %v1768_v58 = vpop.eup %1767  ;;  %1779 = vpow2.f32 %v708_v37  ;;  %v732_v5 = vmul.f32 1.442695, %v2941_v8 }
 0x27f   : > { %918 = vadd.xlane.f32.xlu0 %v1768_v58  ;;  %920 = vadd.xlane.f32.xlu1 %v1766_v47  ;;  %v1770_v43 = vpop.eup %1769  ;;  %1781 = vpow2.f32 %v710_v22  ;;  %v742_v47 = vld [vmem:[#allocation3 + $0x20] sm:$0xff]  ;;  %v2940_v22 = vsub.f32 %v2418_v13, %v2436_v18  ;;  %v2943_v13 = vsub.f32 %v2448_v25, %v2459_v35  ;;  %v749_v25 = vld [vmem:[#allocation3 + $0x58] sm:$0xff] }
 0x280   : > { %1783 = vpow2.f32 %v712_v29 }
 0x281   : > { %1785 = vpow2.f32 %v714_v51  ;;  %v730_v27 = vmul.f32 1.442695, %v2940_v22  ;;  %v734_v51 = vmul.f32 1.442695, %v2942_v49  ;;  %v736_v18 = vmul.f32 1.442695, %v2943_v13 }
 0x282   : > { %v1772_v10 = vpop.eup %1771  ;;  %1787 = vpow2.f32 %v716_v55 }
 0x283   : > { %922 = vadd.xlane.f32.xlu0 %v1772_v10  ;;  %924 = vadd.xlane.f32.xlu1 %v1770_v43  ;;  %v1774_v39 = vpop.eup %1773  ;;  %1789 = vpow2.f32 %v718_v7  ;;  %v2937_v43 = vsub.f32 %v2389_v50, %v2401_v17 }
 0x284   : > { %1791 = vpow2.f32 %v720_v42 }
 0x285   : > { %v724_v10 = vmul.f32 1.442695, %v2937_v43  ;;  %1793 = vpow2.f32 %v722_v19  ;;  %v753_v43 = vld [vmem:[#allocation3 + $0x78] sm:$0xff] }
 0x286   : > { %v1776_v60 = vpop.eup %1775 }
 0x287   : > { %926 = vadd.xlane.f32.xlu0 %v1776_v60  ;;  %928 = vadd.xlane.f32.xlu1 %v1774_v39  ;;  %v1778_v16 = vpop.eup %1777  ;;  %v743_v60 = vld [vmem:[#allocation3 + $0x28] sm:$0xff]  ;;  %1795 = vpow2.f32 %v724_v10  ;;  %v752_v10 = vld [vmem:[#allocation3 + $0x70] sm:$0xff] }
 0x288   : > { %v754_v33 = vmul.f32 %v1778_v16, %v738_v31  ;;  %v1780_v53 = vpop.eup %1779  ;;  %1797 = vpow2.f32 %v726_v41  ;;  %v745_v31 = vld [vmem:[#allocation3 + $0x38] sm:$0xff] }
 0x289   : > { %v755_v57 = vmul.f32 %v1780_v53, %v739_v34  ;;  %v1782_v2 = vpop.eup %1781  ;;  %1799 = vpow2.f32 %v728_v61  ;;  %v747_v34 = vld [vmem:[#allocation3 + $0x48] sm:$0xff] }
 0x28a   : > { %v756_v40 = vmul.f32 %v1782_v2, %v740_v21  ;;  %v1784_v32 = vpop.eup %1783  ;;  %1801 = vpow2.f32 %v730_v27 }
 0x28b   : > { %v757_v62 = vmul.f32 %v1784_v32, %v741_v4  ;;  %v1786_v3 = vpop.eup %1785  ;;  %1803 = vpow2.f32 %v732_v5 }
 0x28c   : > { %v758_v15 = vmul.f32 %v1786_v3, %v742_v47  ;;  %v1788_v24 = vpop.eup %1787  ;;  %1805 = vpow2.f32 %v734_v51 }
 0x28d   : > { %v759_v50 = vmul.f32 %v1788_v24, %v743_v60  ;;  %v1790_v17 = vpop.eup %1789  ;;  %1807 = vpow2.f32 %v736_v18 }
 0x28e   : > { %v760_v56 = vmul.f32 %v1790_v17, %v744_v1  ;;  %v1792_v20 = vpop.eup %1791 }
 0x28f   : > { %v1794_v53 = vpop.eup %1793  ;;  %v761_v6 = vmul.f32 %v1792_v20, %v745_v31 }
 0x291   : > { %v1796_v52 = vpop.eup %1795 }
 0x292   : > { %v1798_v55 = vpop.eup %1797  ;;  %v763_v54 = vmul.f32 %v1796_v52, %v747_v34 }
 0x2e8   : > { %v899_v59 = vpop.xlane.xlu1 %898 }
 0x2e9   : > { %v930_v44 = vadd.f32 %v899_v59, %v754_v33 }
 0x2eb   : > { %947 = vst.msk [vmem:[#allocation3] sm:$0xff] %vm946_vm5, %v930_v44  ;;  %v746_v44 = vld [vmem:[#allocation3 + $0x40] sm:$0xff] }
 0x2ec   : > { %v901_v38 = vpop.xlane.xlu0 %900  ;;  %v762_v0 = vmul.f32 %v1794_v53, %v746_v44 }
 0x2ed   : > { %v931_v36 = vadd.f32 %v901_v38, %v755_v57  ;;  %v1800_v57 = vpop.eup %1799  ;;  %v748_v38 = vld [vmem:[#allocation3 + $0x50] sm:$0xff] }
 0x2ee   : > { %v1802_v63 = vpop.eup %1801  ;;  %v765_v7 = vmul.f32 %v1800_v57, %v749_v25 }
 0x2ef   : > { %948 = vst.msk [vmem:[#allocation3 + $0x8] sm:$0xff] %vm946_vm5, %v931_v36  ;;  %v1804_v32 = vpop.eup %1803  ;;  %v766_v47 = vmul.f32 %v1802_v63, %v750_v30 }
 0x2f0   : > { %v903_v45 = vpop.xlane.xlu0 %902  ;;  %v1806_v3 = vpop.eup %1805 }
 0x2f1   : > { %v932_v12 = vadd.f32 %v903_v45, %v756_v40  ;;  %v764_v40 = vmul.f32 %v1798_v55, %v748_v38  ;;  %v1808_v11 = vpop.eup %1807  ;;  %v768_v60 = vmul.f32 %v1806_v3, %v752_v10 }
 0x2f3   : > { %949 = vst.msk [vmem:[#allocation3 + $0x10] sm:$0xff] %vm946_vm5, %v932_v12  ;;  %v751_v12 = vld [vmem:[#allocation3 + $0x68] sm:$0xff] }
 0x2f4   : > { %v905_v9 = vpop.xlane.xlu1 %904 }
 0x2f5   : > { %v933_v58 = vadd.f32 %v905_v9, %v757_v62  ;;  %v767_v9 = vmul.f32 %v1804_v32, %v751_v12 }
 0x2f7   : > { %950 = vst.msk [vmem:[#allocation3 + $0x18] sm:$0xff] %vm946_vm5, %v933_v58 }
 0x2f8   : > { %v907_v39 = vpop.xlane.xlu0 %906 }
 0x2f9   : > { %v934_v14 = vadd.f32 %v907_v39, %v758_v15  ;;  %v769_v39 = vmul.f32 %v1808_v11, %v753_v43 }
 0x2fb   : > { %951 = vst.msk [vmem:[#allocation3 + $0x20] sm:$0xff] %vm946_vm5, %v934_v14 }
 0x2fc   : > { %v909_v37 = vpop.xlane.xlu1 %908 }
 0x2fd   : > { %v935_v29 = vadd.f32 %v909_v37, %v759_v50 }
 0x2ff   : > { %952 = vst.msk [vmem:[#allocation3 + $0x28] sm:$0xff] %vm946_vm5, %v935_v29 }
 0x300   : > { %v911_v16 = vpop.xlane.xlu0 %910 }
 0x301   : > { %v936_v33 = vadd.f32 %v911_v16, %v760_v56 }
 0x303   : > { %953 = vst.msk [vmem:[#allocation3 + $0x30] sm:$0xff] %vm946_vm5, %v936_v33 }
 0x304   : > { %v913_v59 = vpop.xlane.xlu1 %912 }
 0x305   : > { %v937_v48 = vadd.f32 %v913_v59, %v761_v6 }
 0x307   : > { %954 = vst.msk [vmem:[#allocation3 + $0x38] sm:$0xff] %vm946_vm5, %v937_v48 }
 0x308   : > { %v917_v2 = vpop.xlane.xlu1 %916  ;;  %v915_v35 = vpop.xlane.xlu0 %914 }
 0x309   : > { %v939_v21 = vadd.f32 %v917_v2, %v763_v54  ;;  %v938_v36 = vadd.f32 %v915_v35, %v762_v0 }
 0x30b   : > { %956 = vst.msk [vmem:[#allocation3 + $0x48] sm:$0xff] %vm946_vm5, %v939_v21  ;;  %955 = vst.msk [vmem:[#allocation3 + $0x40] sm:$0xff] %vm946_vm5, %v938_v36 }
 0x30c   : > { %v921_v45 = vpop.xlane.xlu1 %920  ;;  %v919_v4 = vpop.xlane.xlu0 %918 }
 0x30d   : > { %v941_v42 = vadd.f32 %v921_v45, %v765_v7  ;;  %v940_v62 = vadd.f32 %v919_v4, %v764_v40 }
 0x30f   : > { %958 = vst.msk [vmem:[#allocation3 + $0x58] sm:$0xff] %vm946_vm5, %v941_v42  ;;  %957 = vst.msk [vmem:[#allocation3 + $0x50] sm:$0xff] %vm946_vm5, %v940_v62 }
 0x310   : > { %v925_v19 = vpop.xlane.xlu1 %924  ;;  %v923_v58 = vpop.xlane.xlu0 %922 }
 0x311   : > { %v943_v15 = vadd.f32 %v925_v19, %v767_v9  ;;  %v942_v24 = vadd.f32 %v923_v58, %v766_v47 }
 0x313   : > { %960 = vst.msk [vmem:[#allocation3 + $0x68] sm:$0xff] %vm946_vm5, %v943_v15  ;;  %959 = vst.msk [vmem:[#allocation3 + $0x60] sm:$0xff] %vm946_vm5, %v942_v24 }
 0x314   : > { %v929_v46 = vpop.xlane.xlu1 %928  ;;  %v927_v41 = vpop.xlane.xlu0 %926 }
 0x315   : > { %v945_v14 = vadd.f32 %v929_v46, %v769_v39  ;;  %v944_v23 = vadd.f32 %v927_v41, %v768_v60 }
 0x317   : > { %962 = vst.msk [vmem:[#allocation3 + $0x78] sm:$0xff] %vm946_vm5, %v945_v14  ;;  %961 = vst.msk [vmem:[#allocation3 + $0x70] sm:$0xff] %vm946_vm5, %v944_v23 }
 0x318 PF: > { %981 = sbr.rel (%p535_p13) target bundleno = 1268 (0x4f4), region = 44  ;;  %1002 = vmax.xlane.f32.xlu1 (!%p535_p13), %v2126_v26  ;;  %998 = vmax.xlane.f32.xlu0 (!%p535_p13), %v2130_v28  ;;  %v2944_v61 = vld [vmem:[#allocation6_spill] sm:$0xff] (!%p535_p13)  ;;  %v2945_v50 = vld [vmem:[#allocation8_spill] sm:$0xff] (!%p535_p13)  ;;  %v2950_v27 = vld [vmem:[#allocation9_spill] sm:$0xff] (!%p535_p13)  ;;  %v1950_v8 = vmov (!%p535_p13), 0   ;;  %vm1302_vm3 = vcmask (!%p535_p13), 7168  }
 0x319   : > { %v2951_v29 = vld [vmem:[#allocation5_spill] sm:$0xff] (!%p535_p13)  ;;  %1809 = vset.pattern.permute.xlu0 (!%p535_p13), %v1950_v8  ;;  %1810 = vset.pattern.permute.xlu1 (!%p535_p13), %v1950_v8  ;;  %v2952_v5 = vld [vmem:[#allocation7_spill] sm:$0xff] (!%p535_p13)  ;;  %v2953_v56 = vld [vmem:[#allocation4_spill] sm:$0xff] (!%p535_p13) }
 0x31a   : > { %v2576_v51 = vld [vmem:[#allocation2 + $0x10] sm:$0xff] (!%p535_p13)  ;;  %v2578_v33 = vld [vmem:[#allocation2] sm:$0xff] (!%p535_p13)  ;;  %v2586_v52 = vld [vmem:[#allocation2 + $0x18] sm:$0xff] (!%p535_p13) }
 0x31b   : > { %v2949_v22 = vld [vmem:[#allocation10_spill] sm:$0xff] (!%p535_p13)  ;;  %v2957_v49 = vld [vmem:[#allocation11_spill] sm:$0xff] (!%p535_p13)  ;;  %v2588_v59 = vld [vmem:[#allocation2 + $0x8] sm:$0xff] (!%p535_p13) }
 0x31c   : > { %1004 = vmax.xlane.f32.xlu1 (!%p535_p13), %v2944_v61  ;;  %1000 = vmax.xlane.f32.xlu0 (!%p535_p13), %v2945_v50  ;;  %v2947_v37 = vld [vmem:[#allocation12_spill] sm:$0xff] (!%p535_p13)  ;;  %v2955_v16 = vld [vmem:[#allocation13_spill] sm:$0xff] (!%p535_p13)  ;;  %v2624_v7 = vld [vmem:[#allocation2 + $0x38] sm:$0xff] (!%p535_p13) }
 0x31d   : > { %v2948_v1 = vld [vmem:[#allocation14_spill] sm:$0xff] (!%p535_p13)  ;;  %v2956_v31 = vld [vmem:[#allocation15_spill] sm:$0xff] (!%p535_p13)  ;;  %v2605_v57 = vld [vmem:[#allocation2 + $0x28] sm:$0xff] (!%p535_p13) }
 0x31e   : > { %v2946_v17 = vld [vmem:[#allocation16_spill] sm:$0xff] (!%p535_p13)  ;;  %v2954_v20 = vld [vmem:[#allocation17_spill] sm:$0xff] (!%p535_p13)  ;;  %v2626_v40 = vld [vmem:[#allocation2 + $0x30] sm:$0xff] (!%p535_p13) }
 0x31f   : > { %v2607_v2 = vld [vmem:[#allocation2 + $0x20] sm:$0xff]  ;;  %v2643_v62 = vld [vmem:[#allocation2 + $0x48] sm:$0xff]  ;;  %v2662_v10 = vld [vmem:[#allocation2 + $0x58] sm:$0xff] }
 0x320   : > { %1008 = vmax.xlane.f32.xlu1 %v2946_v17  ;;  %1006 = vmax.xlane.f32.xlu0 %v2947_v37  ;;  %v2645_v3 = vld [vmem:[#allocation2 + $0x40] sm:$0xff]  ;;  %v2664_v15 = vld [vmem:[#allocation2 + $0x50] sm:$0xff]  ;;  %v2682_v23 = vld [vmem:[#allocation2 + $0x68] sm:$0xff] }
 0x321   : > { %v2684_v8 = vld [vmem:[#allocation2 + $0x60] sm:$0xff] }
 0x324   : > { %1012 = vmax.xlane.f32.xlu1 %v2948_v1  ;;  %1010 = vmax.xlane.f32.xlu0 %v2949_v22 }
 0x328   : > { %1016 = vmax.xlane.f32.xlu1 %v2950_v27  ;;  %1014 = vmax.xlane.f32.xlu0 %v2951_v29 }
 0x32c   : > { %1020 = vmax.xlane.f32.xlu1 %v2952_v5  ;;  %1018 = vmax.xlane.f32.xlu0 %v2953_v56 }
 0x330   : > { %1024 = vmax.xlane.f32.xlu1 %v2954_v20  ;;  %1022 = vmax.xlane.f32.xlu0 %v2955_v16 }
 0x334   : > { %1028 = vmax.xlane.f32.xlu1 %v2956_v31  ;;  %1026 = vmax.xlane.f32.xlu0 %v2957_v49 }
 0x3a5   : > { %v1003_v13 = vpop.xlane.xlu1 %1002  ;;  %v999_v18 = vpop.xlane.xlu0 %998 }
 0x3a6   : > { %v2581_v53 = vmax.f32 %v2576_v51, %v1003_v13  ;;  %v2584_v6 = vmax.f32 %v2578_v33, %v999_v18 }
 0x3a8   : > { %1321 = vst.msk [vmem:[#allocation2 + $0x10] sm:$0xff] %vm1302_vm3, %v2581_v53  ;;  %v1046_v44 = vsub.f32 %v2578_v33, %v2584_v6  ;;  %1319 = vst.msk [vmem:[#allocation2] sm:$0xff] %vm1302_vm3, %v2584_v6  ;;  %1128 = vperm.xlu0 %1809, %v2584_v6  }
 0x3a9   : > { %v1005_v48 = vpop.xlane.xlu1 %1004  ;;  %v1001_v55 = vpop.xlane.xlu0 %1000 }
 0x3aa   : > { %v2600_v54 = vmax.f32 %v2586_v52, %v1005_v48  ;;  %v2603_v0 = vmax.f32 %v2588_v59, %v1001_v55 }
 0x3ac   : > { %1322 = vst.msk [vmem:[#allocation2 + $0x18] sm:$0xff] %vm1302_vm3, %v2600_v54  ;;  %v1047_v25 = vsub.f32 %v2588_v59, %v2603_v0  ;;  %1320 = vst.msk [vmem:[#allocation2 + $0x8] sm:$0xff] %vm1302_vm3, %v2603_v0  ;;  %1133 = vperm.xlu1 %1810, %v2603_v0  }
 0x3ad   : > { %v1009_v38 = vpop.xlane.xlu1 %1008  ;;  %v1007_v21 = vpop.xlane.xlu0 %1006 }
 0x3ae   : > { %v2619_v36 = vmax.f32 %v2605_v57, %v1009_v38  ;;  %v2622_v63 = vmax.f32 %v2607_v2, %v1007_v21 }
 0x3b0   : > { %1324 = vst.msk [vmem:[#allocation2 + $0x28] sm:$0xff] %vm1302_vm3, %v2619_v36  ;;  %1138 = vperm.xlu1 %1810, %v2581_v53   ;;  %1323 = vst.msk [vmem:[#allocation2 + $0x20] sm:$0xff] %vm1302_vm3, %v2622_v63  ;;  %v2960_v33 = vsub.f32 %v2607_v2, %v2622_v63 }
 0x3b1   : > { %v1013_v4 = vpop.xlane.xlu1 %1012  ;;  %v1011_v12 = vpop.xlane.xlu0 %1010 }
 0x3b2   : > { %v2638_v30 = vmax.f32 %v2624_v7, %v1013_v4  ;;  %v2641_v42 = vmax.f32 %v2626_v40, %v1011_v12  ;;  %v2702_v4 = vld [vmem:[#allocation2 + $0x78] sm:$0xff]  ;;  %v2704_v12 = vld [vmem:[#allocation2 + $0x70] sm:$0xff]  ;;  %v1070_v6 = vmul.f32 1.442695, %v2960_v33 }
 0x3b4   : > { %1326 = vst.msk [vmem:[#allocation2 + $0x38] sm:$0xff] %vm1302_vm3, %v2638_v30  ;;  %1143 = vperm.xlu1 %1810, %v2600_v54   ;;  %1325 = vst.msk [vmem:[#allocation2 + $0x30] sm:$0xff] %vm1302_vm3, %v2641_v42  ;;  %v2962_v2 = vsub.f32 %v2626_v40, %v2641_v42 }
 0x3b5   : > { %v1017_v11 = vpop.xlane.xlu1 %1016  ;;  %v1015_v19 = vpop.xlane.xlu0 %1014 }
 0x3b6   : > { %v2657_v58 = vmax.f32 %v2643_v62, %v1017_v11  ;;  %v2660_v43 = vmax.f32 %v2645_v3, %v1015_v19 }
 0x3b8   : > { %1328 = vst.msk [vmem:[#allocation2 + $0x48] sm:$0xff] %vm1302_vm3, %v2657_v58  ;;  %1148 = vperm.xlu1 %1810, %v2622_v63   ;;  %1173 = vperm.xlu0 %1809, %v2657_v58   ;;  %1327 = vst.msk [vmem:[#allocation2 + $0x40] sm:$0xff] %vm1302_vm3, %v2660_v43  ;;  %v1074_v63 = vmul.f32 1.442695, %v2962_v2  ;;  %v2964_v40 = vsub.f32 %v2643_v62, %v2657_v58 }
 0x3b9   : > { %v1021_v60 = vpop.xlane.xlu1 %1020  ;;  %v1019_v46 = vpop.xlane.xlu0 %1018 }
 0x3ba   : > { %v2677_v41 = vmax.f32 %v2662_v10, %v1021_v60  ;;  %v2680_v14 = vmax.f32 %v2664_v15, %v1019_v46 }
 0x3bc   : > { %1330 = vst.msk [vmem:[#allocation2 + $0x58] sm:$0xff] %vm1302_vm3, %v2677_v41  ;;  %1153 = vperm.xlu1 %1810, %v2619_v36   ;;  %1183 = vperm.xlu0 %1809, %v2677_v41   ;;  %1329 = vst.msk [vmem:[#allocation2 + $0x50] sm:$0xff] %vm1302_vm3, %v2680_v14  ;;  %v2967_v62 = vsub.f32 %v2664_v15, %v2680_v14 }
 0x3bd   : > { %v1025_v48 = vpop.xlane.xlu1 %1024  ;;  %v1023_v55 = vpop.xlane.xlu0 %1022 }
 0x3be   : > { %v2697_v38 = vmax.f32 %v2682_v23, %v1025_v48  ;;  %v2700_v21 = vmax.f32 %v2684_v8, %v1023_v55  ;;  %v1082_v58 = vmul.f32 1.442695, %v2967_v62 }
 0x3c0   : > { %1332 = vst.msk [vmem:[#allocation2 + $0x68] sm:$0xff] %vm1302_vm3, %v2697_v38  ;;  %1158 = vperm.xlu1 %1810, %v2641_v42   ;;  %1193 = vperm.xlu0 %1809, %v2697_v38   ;;  %1331 = vst.msk [vmem:[#allocation2 + $0x60] sm:$0xff] %vm1302_vm3, %v2700_v21  ;;  %v1080_v42 = vmul.f32 1.442695, %v2964_v40 }
 0x3c1   : > { %v1029_v60 = vpop.xlane.xlu1 %1028  ;;  %v1027_v46 = vpop.xlane.xlu0 %1026 }
 0x3c2   : > { %v2717_v48 = vmax.f32 %v2702_v4, %v1029_v60  ;;  %v2720_v55 = vmax.f32 %v2704_v12, %v1027_v46 }
 0x3c4   : > { %1334 = vst.msk [vmem:[#allocation2 + $0x78] sm:$0xff] %vm1302_vm3, %v2717_v48  ;;  %1163 = vperm.xlu1 %1810, %v2638_v30   ;;  %1203 = vperm.xlu0 %1809, %v2717_v48   ;;  %1333 = vst.msk [vmem:[#allocation2 + $0x70] sm:$0xff] %vm1302_vm3, %v2720_v55 }
 0x3c8   : > { %1168 = vperm.xlu1 %1810, %v2660_v43  }
 0x3cc   : > { %1178 = vperm.xlu1 %1810, %v2680_v14  }
 0x3d0   : > { %1188 = vperm.xlu1 %1810, %v2700_v21  }
 0x3d4   : > { %1198 = vperm.xlu1 %1810, %v2720_v55  }
 0x427   : > { %v1129_v60 = vpop.permute.xlu0 %1128 }
 0x428   : > { %v1206_v46 = vsub.f32 %v2130_v28, %v1129_v60 }
 0x42a   : > { %v1222_v11 = vmul.f32 1.442695, %v1206_v46 }
 0x42b   : > { %v1134_v18 = vpop.permute.xlu1 %1133 }
 0x42c   : > { %1811 = vpow2.f32 %v1222_v11  ;;  %v1207_v13 = vsub.f32 %v2945_v50, %v1134_v18 }
 0x42e   : > { %v1224_v19 = vmul.f32 1.442695, %v1207_v13 }
 0x42f   : > { %v1139_v39 = vpop.permute.xlu1 %1138 }
 0x430   : > { %1813 = vpow2.f32 %v1224_v19  ;;  %v1208_v24 = vsub.f32 %v2126_v26, %v1139_v39 }
 0x432   : > { %v1226_v9 = vmul.f32 1.442695, %v1208_v24 }
 0x433   : > { %v1144_v47 = vpop.permute.xlu1 %1143 }
 0x434   : > { %1815 = vpow2.f32 %v1226_v9  ;;  %v1209_v32 = vsub.f32 %v2944_v61, %v1144_v47 }
 0x436   : > { %v1812_v45 = vpop.eup %1811  ;;  %v1228_v35 = vmul.f32 1.442695, %v1209_v32 }
 0x437   : > { %v1149_v34 = vpop.permute.xlu1 %1148  ;;  %1254 = vadd.xlane.f32.xlu1 %v1812_v45  ;;  %v1174_v50 = vpop.permute.xlu0 %1173 }
 0x438   : > { %1817 = vpow2.f32 %v1228_v35  ;;  %v1210_v28 = vsub.f32 %v2947_v37, %v1149_v34  ;;  %v1215_v37 = vsub.f32 %v2950_v27, %v1174_v50 }
 0x43a   : > { %v1814_v11 = vpop.eup %1813  ;;  %v1230_v60 = vmul.f32 1.442695, %v1210_v28  ;;  %v1240_v46 = vmul.f32 1.442695, %v1215_v37 }
 0x43b   : > { %v1154_v13 = vpop.permute.xlu1 %1153  ;;  %1256 = vadd.xlane.f32.xlu0 %v1814_v11  ;;  %v1184_v61 = vpop.permute.xlu0 %1183 }
 0x43c   : > { %1819 = vpow2.f32 %v1230_v60  ;;  %v1211_v26 = vsub.f32 %v2946_v17, %v1154_v13  ;;  %v1217_v28 = vsub.f32 %v2952_v5, %v1184_v61 }
 0x43e   : > { %v1816_v24 = vpop.eup %1815  ;;  %v1232_v39 = vmul.f32 1.442695, %v1211_v26  ;;  %v1244_v27 = vmul.f32 1.442695, %v1217_v28 }
 0x43f   : > { %v1159_v9 = vpop.permute.xlu1 %1158  ;;  %1258 = vadd.xlane.f32.xlu0 %v1816_v24  ;;  %v1194_v19 = vpop.permute.xlu0 %1193 }
 0x440   : > { %1821 = vpow2.f32 %v1232_v39  ;;  %v1212_v32 = vsub.f32 %v2949_v22, %v1159_v9  ;;  %v1219_v50 = vsub.f32 %v2954_v20, %v1194_v19 }
 0x442   : > { %v1818_v45 = vpop.eup %1817  ;;  %v1234_v35 = vmul.f32 1.442695, %v1212_v32  ;;  %v1248_v5 = vmul.f32 1.442695, %v1219_v50 }
 0x443   : > { %v1164_v34 = vpop.permute.xlu1 %1163  ;;  %1260 = vadd.xlane.f32.xlu1 %v1818_v45 }
 0x444   : > { %1823 = vpow2.f32 %v1234_v35  ;;  %v1213_v47 = vsub.f32 %v2948_v1, %v1164_v34  ;;  %v1204_v1 = vpop.permute.xlu0 %1203 }
 0x445   : > { %v1221_v61 = vsub.f32 %v2956_v31, %v1204_v1 }
 0x446   : > { %v1820_v18 = vpop.eup %1819  ;;  %v1236_v17 = vmul.f32 1.442695, %v1213_v47 }
 0x447   : > { %v1169_v11 = vpop.permute.xlu1 %1168  ;;  %1262 = vadd.xlane.f32.xlu0 %v1820_v18  ;;  %v1252_v20 = vmul.f32 1.442695, %v1221_v61 }
 0x448   : > { %1825 = vpow2.f32 %v1236_v17  ;;  %v1214_v22 = vsub.f32 %v2951_v29, %v1169_v11  ;;  %v1064_v11 = vmul.f32 1.442695, %v1047_v25  ;;  %v1095_v25 = vld [vmem:[#allocation3 + $0x8] sm:$0xff] }
 0x449   : > { %1827 = vpow2.f32 %v1240_v46 }
 0x44a   : > { %v1822_v60 = vpop.eup %1821  ;;  %v1238_v13 = vmul.f32 1.442695, %v1214_v22  ;;  %v2958_v22 = vsub.f32 %v2576_v51, %v2581_v53  ;;  %v2961_v51 = vsub.f32 %v2605_v57, %v2619_v36  ;;  %v1097_v57 = vld [vmem:[#allocation3 + $0x18] sm:$0xff] }
 0x44b   : > { %v1179_v26 = vpop.permute.xlu1 %1178  ;;  %1264 = vadd.xlane.f32.xlu1 %v1822_v60 }
 0x44c   : > { %1829 = vpow2.f32 %v1238_v13  ;;  %v1216_v24 = vsub.f32 %v2953_v56, %v1179_v26  ;;  %v1066_v60 = vmul.f32 1.442695, %v2958_v22  ;;  %v2959_v13 = vsub.f32 %v2586_v52, %v2600_v54  ;;  %v1094_v26 = vld [vmem:[#allocation3] sm:$0xff] }
 0x44d   : > { %1831 = vpow2.f32 %v1244_v27  ;;  %v1072_v53 = vmul.f32 1.442695, %v2961_v51 }
 0x44e   : > { %v1824_v39 = vpop.eup %1823  ;;  %v1242_v9 = vmul.f32 1.442695, %v1216_v24  ;;  %v1068_v27 = vmul.f32 1.442695, %v2959_v13 }
 0x44f   : > { %v1189_v32 = vpop.permute.xlu1 %1188  ;;  %1266 = vadd.xlane.f32.xlu0 %v1824_v39  ;;  %v1096_v39 = vld [vmem:[#allocation3 + $0x10] sm:$0xff] }
 0x450   : > { %1833 = vpow2.f32 %v1242_v9  ;;  %v1218_v29 = vsub.f32 %v2955_v16, %v1189_v32 }
 0x451   : > { %1835 = vpow2.f32 %v1248_v5 }
 0x452   : > { %v1826_v45 = vpop.eup %1825  ;;  %v1246_v35 = vmul.f32 1.442695, %v1218_v29  ;;  %v2963_v29 = vsub.f32 %v2624_v7, %v2638_v30 }
 0x453   : > { %v1199_v37 = vpop.permute.xlu1 %1198  ;;  %1268 = vadd.xlane.f32.xlu1 %v1826_v45  ;;  %v1828_v34 = vpop.eup %1827 }
 0x454   : > { %1837 = vpow2.f32 %v1246_v35  ;;  %v1220_v56 = vsub.f32 %v2957_v49, %v1199_v37  ;;  %v1062_v49 = vmul.f32 1.442695, %v1046_v44  ;;  %v1076_v45 = vmul.f32 1.442695, %v2963_v29 }
 0x455   : > { %1839 = vpow2.f32 %v1252_v20 }
 0x456   : > { %v1830_v47 = vpop.eup %1829  ;;  %v1250_v18 = vmul.f32 1.442695, %v1220_v56  ;;  %v1098_v56 = vld [vmem:[#allocation3 + $0x20] sm:$0xff] }
 0x457   : > { %1270 = vadd.xlane.f32.xlu0 %v1830_v47  ;;  %1272 = vadd.xlane.f32.xlu1 %v1828_v34  ;;  %v1832_v31 = vpop.eup %1831  ;;  %v2965_v47 = vsub.f32 %v2645_v3, %v2660_v43 }
 0x458   : > { %1841 = vpow2.f32 %v1250_v18 }
 0x459   : > { %1843 = vpow2.f32 %v1062_v49  ;;  %v1078_v18 = vmul.f32 1.442695, %v2965_v47  ;;  %v1100_v49 = vld [vmem:[#allocation3 + $0x30] sm:$0xff] }
 0x45a   : > { %v1834_v19 = vpop.eup %1833  ;;  %1845 = vpow2.f32 %v1064_v11  ;;  %v2968_v11 = vsub.f32 %v2682_v23, %v2697_v38  ;;  %v2971_v23 = vsub.f32 %v2704_v12, %v2720_v55  ;;  %v1105_v55 = vld [vmem:[#allocation3 + $0x58] sm:$0xff] }
 0x45b   : > { %1274 = vadd.xlane.f32.xlu0 %v1834_v19  ;;  %1276 = vadd.xlane.f32.xlu1 %v1832_v31  ;;  %v1836_v16 = vpop.eup %1835  ;;  %1847 = vpow2.f32 %v1066_v60  ;;  %v1099_v19 = vld [vmem:[#allocation3 + $0x28] sm:$0xff] }
 0x45c   : > { %1849 = vpow2.f32 %v1068_v27  ;;  %v1088_v22 = vmul.f32 1.442695, %v2968_v11  ;;  %v1101_v27 = vld [vmem:[#allocation3 + $0x38] sm:$0xff]  ;;  %v1090_v38 = vmul.f32 1.442695, %v2971_v23 }
 0x45d   : > { %1851 = vpow2.f32 %v1070_v6 }
 0x45e   : > { %v1838_v17 = vpop.eup %1837  ;;  %1853 = vpow2.f32 %v1072_v53 }
 0x45f   : > { %1278 = vadd.xlane.f32.xlu0 %v1838_v17  ;;  %1280 = vadd.xlane.f32.xlu1 %v1836_v16  ;;  %v1840_v46 = vpop.eup %1839  ;;  %1855 = vpow2.f32 %v1074_v63  ;;  %v2966_v16 = vsub.f32 %v2662_v10, %v2677_v41  ;;  %v2969_v10 = vsub.f32 %v2684_v8, %v2700_v21 }
 0x460   : > { %1857 = vpow2.f32 %v1076_v45 }
 0x461   : > { %1859 = vpow2.f32 %v1080_v42  ;;  %v1084_v17 = vmul.f32 1.442695, %v2966_v16  ;;  %v1086_v41 = vmul.f32 1.442695, %v2969_v10  ;;  %v1109_v42 = vld [vmem:[#allocation3 + $0x78] sm:$0xff] }
 0x462   : > { %v1842_v28 = vpop.eup %1841  ;;  %1861 = vpow2.f32 %v1078_v18 }
 0x463   : > { %1282 = vadd.xlane.f32.xlu0 %v1842_v28  ;;  %1284 = vadd.xlane.f32.xlu1 %v1840_v46  ;;  %v1844_v50 = vpop.eup %1843  ;;  %1863 = vpow2.f32 %v1084_v17 }
 0x464   : > { %v1110_v44 = vmul.f32 %v1844_v50, %v1094_v26  ;;  %v1846_v59 = vpop.eup %1845  ;;  %1865 = vpow2.f32 %v1082_v58  ;;  %v2970_v50 = vsub.f32 %v2702_v4, %v2717_v48 }
 0x465   : > { %v1111_v52 = vmul.f32 %v1846_v59, %v1095_v25  ;;  %v1848_v54 = vpop.eup %1847  ;;  %1867 = vpow2.f32 %v1088_v22  ;;  %v1103_v59 = vld [vmem:[#allocation3 + $0x48] sm:$0xff] }
 0x466   : > { %v1112_v5 = vmul.f32 %v1848_v54, %v1096_v39  ;;  %v1850_v61 = vpop.eup %1849  ;;  %v1092_v26 = vmul.f32 1.442695, %v2970_v50  ;;  %1869 = vpow2.f32 %v1086_v41 }
 0x467   : > { %v1113_v35 = vmul.f32 %v1850_v61, %v1097_v57  ;;  %v1852_v20 = vpop.eup %1851  ;;  %v1106_v57 = vld [vmem:[#allocation3 + $0x60] sm:$0xff] }
 0x468   : > { %v1114_v7 = vmul.f32 %v1852_v20, %v1098_v56  ;;  %v1854_v30 = vpop.eup %1853  ;;  %1871 = vpow2.f32 %v1092_v26 }
 0x469   : > { %v1115_v3 = vmul.f32 %v1854_v30, %v1099_v19  ;;  %v1856_v43 = vpop.eup %1855  ;;  %1873 = vpow2.f32 %v1090_v38 }
 0x46a   : > { %v1116_v15 = vmul.f32 %v1856_v43, %v1100_v49  ;;  %v1858_v14 = vpop.eup %1857 }
 0x46b   : > { %v1860_v6 = vpop.eup %1859  ;;  %v1117_v8 = vmul.f32 %v1858_v14, %v1101_v27 }
 0x46c   : > { %v1862_v21 = vpop.eup %1861  ;;  %v1119_v4 = vmul.f32 %v1860_v6, %v1103_v59 }
 0x4c4   : > { %v1255_v0 = vpop.xlane.xlu1 %1254 }
 0x4c5   : > { %v1286_v1 = vadd.f32 %v1255_v0, %v1110_v44  ;;  %v1102_v0 = vld [vmem:[#allocation3 + $0x40] sm:$0xff] }
 0x4c6   : > { %v1118_v48 = vmul.f32 %v1862_v21, %v1102_v0 }
 0x4c7   : > { %1303 = vst.msk [vmem:[#allocation3] sm:$0xff] %vm1302_vm3, %v1286_v1  ;;  %v1864_v1 = vpop.eup %1863 }
 0x4c8   : > { %v1257_v24 = vpop.xlane.xlu0 %1256  ;;  %v1866_v51 = vpop.eup %1865 }
 0x4c9   : > { %v1287_v9 = vadd.f32 %v1257_v24, %v1111_v52  ;;  %v1104_v52 = vld [vmem:[#allocation3 + $0x50] sm:$0xff]  ;;  %v1868_v39 = vpop.eup %1867 }
 0x4ca   : > { %v1120_v2 = vmul.f32 %v1866_v51, %v1104_v52  ;;  %v1870_v63 = vpop.eup %1869 }
 0x4cb   : > { %1304 = vst.msk [vmem:[#allocation3 + $0x8] sm:$0xff] %vm1302_vm3, %v1287_v9  ;;  %v1121_v9 = vmul.f32 %v1864_v1, %v1105_v55  ;;  %v1872_v45 = vpop.eup %1871  ;;  %v1122_v20 = vmul.f32 %v1870_v63, %v1106_v57 }
 0x4cc   : > { %v1259_v32 = vpop.xlane.xlu0 %1258 }
 0x4cd   : > { %v1288_v36 = vadd.f32 %v1259_v32, %v1112_v5  ;;  %v1107_v32 = vld [vmem:[#allocation3 + $0x68] sm:$0xff] }
 0x4cf   : > { %1305 = vst.msk [vmem:[#allocation3 + $0x10] sm:$0xff] %vm1302_vm3, %v1288_v36 }
 0x4d0   : > { %v1261_v37 = vpop.xlane.xlu1 %1260 }
 0x4d1   : > { %v1289_v34 = vadd.f32 %v1261_v37, %v1113_v35  ;;  %v1123_v35 = vmul.f32 %v1868_v39, %v1107_v32  ;;  %v1874_v37 = vpop.eup %1873 }
 0x4d3   : > { %1306 = vst.msk [vmem:[#allocation3 + $0x18] sm:$0xff] %vm1302_vm3, %v1289_v34  ;;  %v1108_v34 = vld [vmem:[#allocation3 + $0x70] sm:$0xff] }
 0x4d4   : > { %v1263_v31 = vpop.xlane.xlu0 %1262  ;;  %v1124_v30 = vmul.f32 %v1874_v37, %v1108_v34 }
 0x4d5   : > { %v1290_v46 = vadd.f32 %v1263_v31, %v1114_v7  ;;  %v1125_v7 = vmul.f32 %v1872_v45, %v1109_v42 }
 0x4d7   : > { %1307 = vst.msk [vmem:[#allocation3 + $0x20] sm:$0xff] %vm1302_vm3, %v1290_v46 }
 0x4d8   : > { %v1265_v28 = vpop.xlane.xlu1 %1264 }
 0x4d9   : > { %v1291_v60 = vadd.f32 %v1265_v28, %v1115_v3 }
 0x4db   : > { %1308 = vst.msk [vmem:[#allocation3 + $0x28] sm:$0xff] %vm1302_vm3, %v1291_v60 }
 0x4dc   : > { %v1267_v13 = vpop.xlane.xlu0 %1266 }
 0x4dd   : > { %v1292_v33 = vadd.f32 %v1267_v13, %v1116_v15 }
 0x4df   : > { %1309 = vst.msk [vmem:[#allocation3 + $0x30] sm:$0xff] %vm1302_vm3, %v1292_v33 }
 0x4e0   : > { %v1269_v44 = vpop.xlane.xlu1 %1268 }
 0x4e1   : > { %v1293_v25 = vadd.f32 %v1269_v44, %v1117_v8 }
 0x4e3   : > { %1310 = vst.msk [vmem:[#allocation3 + $0x38] sm:$0xff] %vm1302_vm3, %v1293_v25 }
 0x4e4   : > { %v1273_v53 = vpop.xlane.xlu1 %1272  ;;  %v1271_v12 = vpop.xlane.xlu0 %1270 }
 0x4e5   : > { %v1295_v54 = vadd.f32 %v1273_v53, %v1119_v4  ;;  %v1294_v24 = vadd.f32 %v1271_v12, %v1118_v48 }
 0x4e7   : > { %1312 = vst.msk [vmem:[#allocation3 + $0x48] sm:$0xff] %vm1302_vm3, %v1295_v54  ;;  %1311 = vst.msk [vmem:[#allocation3 + $0x40] sm:$0xff] %vm1302_vm3, %v1294_v24 }
 0x4e8   : > { %v1277_v5 = vpop.xlane.xlu1 %1276  ;;  %v1275_v61 = vpop.xlane.xlu0 %1274 }
 0x4e9   : > { %v1297_v36 = vadd.f32 %v1277_v5, %v1121_v9  ;;  %v1296_v29 = vadd.f32 %v1275_v61, %v1120_v2 }
 0x4eb   : > { %1314 = vst.msk [vmem:[#allocation3 + $0x58] sm:$0xff] %vm1302_vm3, %v1297_v36  ;;  %1313 = vst.msk [vmem:[#allocation3 + $0x50] sm:$0xff] %vm1302_vm3, %v1296_v29 }
 0x4ec   : > { %v1281_v56 = vpop.xlane.xlu1 %1280  ;;  %v1279_v40 = vpop.xlane.xlu0 %1278 }
 0x4ed   : > { %v1299_v47 = vadd.f32 %v1281_v56, %v1123_v35  ;;  %v1298_v18 = vadd.f32 %v1279_v40, %v1122_v20 }
 0x4ef   : > { %1316 = vst.msk [vmem:[#allocation3 + $0x68] sm:$0xff] %vm1302_vm3, %v1299_v47  ;;  %1315 = vst.msk [vmem:[#allocation3 + $0x60] sm:$0xff] %vm1302_vm3, %v1298_v18 }
 0x4f0   : > { %v1285_v31 = vpop.xlane.xlu1 %1284  ;;  %v1283_v19 = vpop.xlane.xlu0 %1282 }
 0x4f1   : > { %v1301_v16 = vadd.f32 %v1285_v31, %v1125_v7  ;;  %v1300_v17 = vadd.f32 %v1283_v19, %v1124_v30 }
 0x4f3   : > { %1318 = vst.msk [vmem:[#allocation3 + $0x78] sm:$0xff] %vm1302_vm3, %v1301_v16  ;;  %1317 = vst.msk [vmem:[#allocation3 + $0x70] sm:$0xff] %vm1302_vm3, %v1300_v17 }
 0x4f4 PF: > { %p1600_p0 = scmp.ne.s32.totalorder %s1929_s12, 1 }
 0x4f5   : > { %v1355_v46 = vld [vmem:[#allocation3] sm:$0xff] (!%p1600_p0)  ;;  %v1356_v62 = vld [vmem:[#allocation3 + $0x8] sm:$0xff] (!%p1600_p0)  ;;  %v1357_v58 = vld [vmem:[#allocation3 + $0x10] sm:$0xff] (!%p1600_p0)  ;;  %vm1451_vm6 = vcmask (!%p1600_p0), 7168  }
 0x4f6   : > { %1338 = sbr.rel (%p1600_p0) target bundleno = 1303 (0x517), region = 48  ;;  %1875 = vlog2.f32 (!%p1600_p0), %v1355_v46  ;;  %v1358_v3 = vld [vmem:[#allocation3 + $0x18] sm:$0xff] (!%p1600_p0)  ;;  %v1359_v43 = vld [vmem:[#allocation3 + $0x20] sm:$0xff] (!%p1600_p0)  ;;  %v1360_v28 = vld [vmem:[#allocation3 + $0x28] sm:$0xff] (!%p1600_p0) }
 0x4f7   : > { %1877 = vlog2.f32 (!%p1600_p0), %v1356_v62  ;;  %v1361_v49 = vld [vmem:[#allocation3 + $0x30] sm:$0xff] (!%p1600_p0)  ;;  %v1362_v11 = vld [vmem:[#allocation3 + $0x38] sm:$0xff] (!%p1600_p0)  ;;  %v1363_v22 = vld [vmem:[#allocation3 + $0x40] sm:$0xff] (!%p1600_p0) }
 0x4f8   : > { %1879 = vlog2.f32 (!%p1600_p0), %v1357_v58  ;;  %v1364_v60 = vld [vmem:[#allocation3 + $0x48] sm:$0xff] (!%p1600_p0)  ;;  %v1365_v10 = vld [vmem:[#allocation3 + $0x50] sm:$0xff] (!%p1600_p0)  ;;  %v1339_v15 = vld [vmem:[#allocation2] sm:$0xff] (!%p1600_p0) }
 0x4f9   : > { %1881 = vlog2.f32 (!%p1600_p0), %v1358_v3  ;;  %v1366_v14 = vld [vmem:[#allocation3 + $0x58] sm:$0xff] (!%p1600_p0)  ;;  %v1340_v50 = vld [vmem:[#allocation2 + $0x8] sm:$0xff] (!%p1600_p0)  ;;  %v1367_v26 = vld [vmem:[#allocation3 + $0x60] sm:$0xff] (!%p1600_p0) }
 0x4fa   : > { %1883 = vlog2.f32 (!%p1600_p0), %v1359_v43  ;;  %v1419_v23 = vld [vmem:[%s2020_s5] sm:$0xff] (!%p1600_p0)  ;;  %v1341_v6 = vld [vmem:[#allocation2 + $0x10] sm:$0xff] (!%p1600_p0)  ;;  %v1368_v8 = vld [vmem:[#allocation3 + $0x68] sm:$0xff] (!%p1600_p0) }
 0x4fb   : > { %1885 = vlog2.f32 (!%p1600_p0), %v1360_v28  ;;  %v1420_v59 = vld [vmem:[%s2020_s5 + $0x8] sm:$0xff] (!%p1600_p0)  ;;  %v1342_v25 = vld [vmem:[#allocation2 + $0x18] sm:$0xff] (!%p1600_p0)  ;;  %v1369_v1 = vld [vmem:[#allocation3 + $0x70] sm:$0xff] (!%p1600_p0) }
 0x4fc   : > { %1887 = vlog2.f32 (!%p1600_p0), %v1361_v49  ;;  %v1421_v51 = vld [vmem:[%s2020_s5 + $0x10] sm:$0xff] (!%p1600_p0)  ;;  %v1343_v12 = vld [vmem:[#allocation2 + $0x20] sm:$0xff] (!%p1600_p0)  ;;  %v1370_v55 = vld [vmem:[#allocation3 + $0x78] sm:$0xff] (!%p1600_p0) }
 0x4fd   : > { %1889 = vlog2.f32 %v1362_v11  ;;  %v1422_v39 = vld [vmem:[%s2020_s5 + $0x18] sm:$0xff]  ;;  %v1344_v2 = vld [vmem:[#allocation2 + $0x28] sm:$0xff]  ;;  %v1423_v32 = vld [vmem:[%s2020_s5 + $0x20] sm:$0xff] }
 0x4fe   : > { %1891 = vlog2.f32 %v1363_v22  ;;  %v1345_v36 = vld [vmem:[#allocation2 + $0x30] sm:$0xff]  ;;  %v1424_v20 = vld [vmem:[%s2020_s5 + $0x28] sm:$0xff]  ;;  %v1346_v56 = vld [vmem:[#allocation2 + $0x38] sm:$0xff] }
 0x4ff   : > { %1893 = vlog2.f32 %v1364_v60  ;;  %v1425_v47 = vld [vmem:[%s2020_s5 + $0x30] sm:$0xff]  ;;  %v1347_v7 = vld [vmem:[#allocation2 + $0x40] sm:$0xff]  ;;  %v1426_v16 = vld [vmem:[%s2020_s5 + $0x38] sm:$0xff] }
 0x500   : > { %v1876_v41 = vpop.eup %1875  ;;  %1895 = vlog2.f32 %v1365_v10  ;;  %v1348_v46 = vld [vmem:[#allocation2 + $0x48] sm:$0xff]  ;;  %v1427_v43 = vld [vmem:[%s2020_s5 + $0x40] sm:$0xff]  ;;  %v1349_v49 = vld [vmem:[#allocation2 + $0x50] sm:$0xff] }
 0x501   : > { %v1878_v13 = vpop.eup %1877  ;;  %v1372_v27 = vmul.f32 0.6931472, %v1876_v41  ;;  %1897 = vlog2.f32 %v1366_v14  ;;  %v1428_v10 = vld [vmem:[%s2020_s5 + $0x48] sm:$0xff] }
 0x502   : > { %v1880_v33 = vpop.eup %1879  ;;  %v1374_v38 = vmul.f32 0.6931472, %v1878_v13  ;;  %1899 = vlog2.f32 %v1367_v26 }
 0x503   : > { %v1882_v21 = vpop.eup %1881  ;;  %v1403_v44 = vadd.f32 %v1372_v27, %v1339_v15  ;;  %v1376_v0 = vmul.f32 0.6931472, %v1880_v33  ;;  %1901 = vlog2.f32 %v1368_v8  ;;  %v1350_v15 = vld [vmem:[#allocation2 + $0x58] sm:$0xff]  ;;  %v1351_v33 = vld [vmem:[#allocation2 + $0x60] sm:$0xff] }
 0x504   : > { %v1884_v4 = vpop.eup %1883  ;;  %v1404_v48 = vadd.f32 %v1374_v38, %v1340_v50  ;;  %v1378_v53 = vmul.f32 0.6931472, %v1882_v21  ;;  %1903 = vlog2.f32 %v1369_v1  ;;  %v1429_v50 = vld [vmem:[%s2020_s5 + $0x50] sm:$0xff]  ;;  %v1430_v8 = vld [vmem:[%s2020_s5 + $0x58] sm:$0xff]  ;;  %v1431_v1 = vld [vmem:[%s2020_s5 + $0x60] sm:$0xff] }
 0x505   : > { %v1886_v52 = vpop.eup %1885  ;;  %v1435_v54 = vsub.f32 %v1403_v44, %v1419_v23  ;;  %v1405_v24 = vadd.f32 %v1376_v0, %v1341_v6  ;;  %v1380_v9 = vmul.f32 0.6931472, %v1884_v4  ;;  %1905 = vlog2.f32 %v1370_v55  ;;  %v1352_v44 = vld [vmem:[#allocation2 + $0x68] sm:$0xff] }
 0x506   : > { %v1888_v63 = vpop.eup %1887  ;;  %v1436_v5 = vsub.f32 %v1404_v48, %v1420_v59  ;;  %v1406_v61 = vadd.f32 %v1378_v53, %v1342_v25  ;;  %v1382_v57 = vmul.f32 0.6931472, %v1886_v52  ;;  %v1353_v48 = vld [vmem:[#allocation2 + $0x70] sm:$0xff]  ;;  %v1432_v55 = vld [vmem:[%s2020_s5 + $0x68] sm:$0xff] }
 0x507   : > { %v1890_v29 = vpop.eup %1889  ;;  %1452 = vst.msk [vmem:[%s2025_s8] sm:$0xff] %vm1451_vm6, %v1435_v54  ;;  %v1437_v45 = vsub.f32 %v1405_v24, %v1421_v51  ;;  %v1407_v35 = vadd.f32 %v1380_v9, %v1343_v12  ;;  %v1384_v37 = vmul.f32 0.6931472, %v1888_v63  ;;  %v1354_v54 = vld [vmem:[#allocation2 + $0x78] sm:$0xff]  ;;  %v1433_v9 = vld [vmem:[%s2020_s5 + $0x70] sm:$0xff] }
 0x508   : > { %v1892_v40 = vpop.eup %1891  ;;  %1453 = vst.msk [vmem:[%s2025_s8 + $0x8] sm:$0xff] %vm1451_vm6, %v1436_v5  ;;  %v1438_v42 = vsub.f32 %v1406_v61, %v1422_v39  ;;  %v1408_v34 = vadd.f32 %v1382_v57, %v1344_v2  ;;  %v1386_v18 = vmul.f32 0.6931472, %v1890_v29  ;;  %v1434_v61 = vld [vmem:[%s2020_s5 + $0x78] sm:$0xff] }
 0x509   : > { %v1894_v30 = vpop.eup %1893  ;;  %1454 = vst.msk [vmem:[%s2025_s8 + $0x10] sm:$0xff] %vm1451_vm6, %v1437_v45  ;;  %v1439_v31 = vsub.f32 %v1407_v35, %v1423_v32  ;;  %v1409_v19 = vadd.f32 %v1384_v37, %v1345_v36  ;;  %v1388_v17 = vmul.f32 0.6931472, %v1892_v40 }
 0x50a   : > { %v1896_v62 = vpop.eup %1895  ;;  %1455 = vst.msk [vmem:[%s2025_s8 + $0x18] sm:$0xff] %vm1451_vm6, %v1438_v42  ;;  %v1440_v58 = vsub.f32 %v1408_v34, %v1424_v20  ;;  %v1410_v3 = vadd.f32 %v1386_v18, %v1346_v56  ;;  %v1390_v28 = vmul.f32 0.6931472, %v1894_v30 }
 0x50b   : > { %v1898_v11 = vpop.eup %1897  ;;  %1456 = vst.msk [vmem:[%s2025_s8 + $0x20] sm:$0xff] %vm1451_vm6, %v1439_v31  ;;  %v1441_v22 = vsub.f32 %v1409_v19, %v1425_v47  ;;  %v1411_v60 = vadd.f32 %v1388_v17, %v1347_v7  ;;  %v1392_v41 = vmul.f32 0.6931472, %v1896_v62 }
 0x50c   : > { %v1900_v14 = vpop.eup %1899  ;;  %1457 = vst.msk [vmem:[%s2025_s8 + $0x28] sm:$0xff] %vm1451_vm6, %v1440_v58  ;;  %v1442_v13 = vsub.f32 %v1410_v3, %v1426_v16  ;;  %v1412_v27 = vadd.f32 %v1390_v28, %v1348_v46  ;;  %v1394_v26 = vmul.f32 0.6931472, %v1898_v11 }
 0x50d   : > { %v1902_v23 = vpop.eup %1901  ;;  %1458 = vst.msk [vmem:[%s2025_s8 + $0x30] sm:$0xff] %vm1451_vm6, %v1441_v22  ;;  %v1443_v38 = vsub.f32 %v1411_v60, %v1427_v43  ;;  %v1413_v6 = vadd.f32 %v1392_v41, %v1349_v49  ;;  %v1396_v21 = vmul.f32 0.6931472, %v1900_v14 }
 0x50e   : > { %v1904_v59 = vpop.eup %1903  ;;  %1459 = vst.msk [vmem:[%s2025_s8 + $0x38] sm:$0xff] %vm1451_vm6, %v1442_v13  ;;  %v1444_v0 = vsub.f32 %v1412_v27, %v1428_v10  ;;  %v1414_v25 = vadd.f32 %v1394_v26, %v1350_v15  ;;  %v1398_v4 = vmul.f32 0.6931472, %v1902_v23 }
 0x50f   : > { %v1906_v51 = vpop.eup %1905  ;;  %1460 = vst.msk [vmem:[%s2025_s8 + $0x40] sm:$0xff] %vm1451_vm6, %v1443_v38  ;;  %v1445_v53 = vsub.f32 %v1413_v6, %v1429_v50  ;;  %v1415_v12 = vadd.f32 %v1396_v21, %v1351_v33  ;;  %v1400_v52 = vmul.f32 0.6931472, %v1904_v59 }
 0x510   : > { %1461 = vst.msk [vmem:[%s2025_s8 + $0x48] sm:$0xff] %vm1451_vm6, %v1444_v0  ;;  %v1446_v24 = vsub.f32 %v1414_v25, %v1430_v8  ;;  %v1416_v39 = vadd.f32 %v1398_v4, %v1352_v44  ;;  %v1402_v2 = vmul.f32 0.6931472, %v1906_v51 }
 0x511   : > { %1462 = vst.msk [vmem:[%s2025_s8 + $0x50] sm:$0xff] %vm1451_vm6, %v1445_v53  ;;  %v1447_v63 = vsub.f32 %v1415_v12, %v1431_v1  ;;  %v1417_v5 = vadd.f32 %v1400_v52, %v1353_v48 }
 0x512   : > { %1463 = vst.msk [vmem:[%s2025_s8 + $0x58] sm:$0xff] %vm1451_vm6, %v1446_v24  ;;  %v1448_v32 = vsub.f32 %v1416_v39, %v1432_v55  ;;  %v1418_v57 = vadd.f32 %v1402_v2, %v1354_v54 }
 0x513   : > { %1464 = vst.msk [vmem:[%s2025_s8 + $0x60] sm:$0xff] %vm1451_vm6, %v1447_v63  ;;  %v1449_v36 = vsub.f32 %v1417_v5, %v1433_v9 }
 0x514   : > { %1465 = vst.msk [vmem:[%s2025_s8 + $0x68] sm:$0xff] %vm1451_vm6, %v1448_v32  ;;  %v1450_v29 = vsub.f32 %v1418_v57, %v1434_v61 }
 0x515   : > { %1466 = vst.msk [vmem:[%s2025_s8 + $0x70] sm:$0xff] %vm1451_vm6, %v1449_v36 }
 0x516   : > { %1467 = vst.msk [vmem:[%s2025_s8 + $0x78] sm:$0xff] %vm1451_vm6, %v1450_v29 }
 0x517 PF: > { %s13_s16 = sadd.s32 1, %s1945_s16   ;;  %s2972_s12 = smov %s1937_s14 }
 0x518   : > { %p10_p1 = scmp.ge.s32.totalorder %s13_s16, 6   ;;  %s2973_s13 = smov %s1941_s15 }
 0x519   : > { %s2974_s14 = smov %s2977_s17  ;;  %s2975_s15 = smov %s2981_s18 }
 0x51a   :  { %12 = sbr.rel (!%p10_p1) target bundleno = 3 (0x3), region = 84 }

</bundles_post_ra>
